<compile_context>
chip_gen: v6e
topology: v6e:2x2x1
jax: 0.10.0
libtpu: 0.0.40
codegen_flags: <defaults>
</compile_context>

<pallas_src>
import functools

import jax
import jax.numpy as jnp
from jax.experimental import pallas as pl
from jax.experimental.pallas import tpu as pltpu

_VMEM_LIMIT = 48 * 1024 * 1024   # stay comfortably under v7x's 64 MiB physical VMEM
_EPS = 1e-5
_NEG_SLOPE = 0.1


def _cparams(n_grid_axes):
    return pltpu.CompilerParams(
        dimension_semantics=("parallel",) * n_grid_axes,
        vmem_limit_bytes=_VMEM_LIMIT)


def _pick_tile_m(m, max_tile):
    """Largest divisor of m that is a multiple of 8 and <= max_tile."""
    for d in range(min(max_tile, m), 7, -1):
        if m % d == 0 and d % 8 == 0:
            return d
    return m   # fall back to a single whole block


# ---------------------------------------------------------------------------
# Kernels
# ---------------------------------------------------------------------------
def _conv1x1_kernel(x_ref, w_ref, y_ref, psum_ref, psumsq_ref):
    # x: (TILE_M, Cin) f32, w: (Cin, Cout) bf16.  Raw conv output (pre-BN) plus
    # per-tile partial sum / sum-of-squares for the BN statistics.
    y = jnp.dot(x_ref[...].astype(jnp.bfloat16), w_ref[...],
                preferred_element_type=jnp.float32)
    y_ref[...] = y
    psum_ref[...] = jnp.sum(y, axis=0, keepdims=True)
    psumsq_ref[...] = jnp.sum(y * y, axis=0, keepdims=True)


def _conv3x3_kernel(hp_ref, w_ref, y_ref, psum_ref, psumsq_ref, *, H, W):
    # hp: (H+2, W+2, Cin) bf16 zero-padded image; w: (9, Cin, Cout) bf16.
    # 3x3 conv as nine shifted tap matmuls (no im2col expansion in HBM).
    hp = hp_ref[...].astype(jnp.float32)      # f32 for cheap shifted slices
    w = w_ref[...]
    cin = hp.shape[-1]
    cout = w.shape[-1]
    acc = jnp.zeros((H * W, cout), jnp.float32)
    for dy in range(3):
        for dx in range(3):
            tap = hp[dy:dy + H, dx:dx + W, :].reshape(H * W, cin)
            acc = acc + jnp.dot(tap.astype(jnp.bfloat16), w[dy * 3 + dx],
                                preferred_element_type=jnp.float32)
    y_ref[...] = acc
    psum_ref[...] = jnp.sum(acc, axis=0, keepdims=True)
    psumsq_ref[...] = jnp.sum(acc * acc, axis=0, keepdims=True)


def _bn_act_kernel(*refs, add_residual):
    # z = y*scale + shift (BN affine folded), LeakyReLU(0.1) as max, optional
    # fused residual add.
    if add_residual:
        y_ref, sc_ref, sh_ref, res_ref, o_ref = refs
    else:
        y_ref, sc_ref, sh_ref, o_ref = refs
    z = y_ref[...] * sc_ref[...] + sh_ref[...]
    a = jnp.maximum(z, _NEG_SLOPE * z)
    if add_residual:
        a = a + res_ref[...]
    o_ref[...] = a.astype(o_ref.dtype)


# ---------------------------------------------------------------------------
# pallas_call wrappers
# ---------------------------------------------------------------------------
def _conv1x1(x_flat, w_bf16, *, tile_m):
    m, cin = x_flat.shape
    cout = w_bf16.shape[1]
    nt = m // tile_m
    return pl.pallas_call(
        _conv1x1_kernel,
        grid=(nt,),
        in_specs=[pl.BlockSpec((tile_m, cin), lambda i: (i, 0)),
                  pl.BlockSpec((cin, cout), lambda i: (0, 0))],
        out_specs=(pl.BlockSpec((tile_m, cout), lambda i: (i, 0)),
                   pl.BlockSpec((None, 1, cout), lambda i: (i, 0, 0)),
                   pl.BlockSpec((None, 1, cout), lambda i: (i, 0, 0))),
        out_shape=(jax.ShapeDtypeStruct((m, cout), jnp.float32),
                   jax.ShapeDtypeStruct((nt, 1, cout), jnp.float32),
                   jax.ShapeDtypeStruct((nt, 1, cout), jnp.float32)),
        compiler_params=_cparams(1),
    )(x_flat, w_bf16)


def _conv3x3(h_pad, w_taps_bf16):
    # Grid over images; each step holds one zero-padded NHWC image in VMEM.
    # TODO(synk): for very large H*W (or W not a multiple of the sublane tile)
    # switch to halo-tiled rows via manual DMA instead of whole-image blocks.
    n, hp, wp, cin = h_pad.shape
    hh, ww = hp - 2, wp - 2
    cout = w_taps_bf16.shape[-1]
    m = n * hh * ww
    return pl.pallas_call(
        functools.partial(_conv3x3_kernel, H=hh, W=ww),
        grid=(n,),
        in_specs=[pl.BlockSpec((None, hp, wp, cin), lambda i: (i, 0, 0, 0)),
                  pl.BlockSpec((9, cin, cout), lambda i: (0, 0, 0))],
        out_specs=(pl.BlockSpec((hh * ww, cout), lambda i: (i, 0)),
                   pl.BlockSpec((None, 1, cout), lambda i: (i, 0, 0)),
                   pl.BlockSpec((None, 1, cout), lambda i: (i, 0, 0))),
        out_shape=(jax.ShapeDtypeStruct((m, cout), jnp.float32),
                   jax.ShapeDtypeStruct((n, 1, cout), jnp.float32),
                   jax.ShapeDtypeStruct((n, 1, cout), jnp.float32)),
        compiler_params=_cparams(1),
    )(h_pad, w_taps_bf16)


def _bn_act(y_flat, scale, shift, *, residual=None, out_dtype, tile_m):
    m, c = y_flat.shape
    nt = m // tile_m
    sc = scale.reshape(1, c).astype(jnp.float32)
    sh = shift.reshape(1, c).astype(jnp.float32)
    operands = [y_flat, sc, sh]
    in_specs = [pl.BlockSpec((tile_m, c), lambda i: (i, 0)),
                pl.BlockSpec((1, c), lambda i: (0, 0)),
                pl.BlockSpec((1, c), lambda i: (0, 0))]
    if residual is not None:
        operands.append(residual)
        in_specs.append(pl.BlockSpec((tile_m, c), lambda i: (i, 0)))
    return pl.pallas_call(
        functools.partial(_bn_act_kernel, add_residual=residual is not None),
        grid=(nt,),
        in_specs=in_specs,
        out_specs=pl.BlockSpec((tile_m, c), lambda i: (i, 0)),
        out_shape=jax.ShapeDtypeStruct((m, c), out_dtype),
        compiler_params=_cparams(1),
    )(*operands)


def _bn_scale_shift(psum, psumsq, gamma, beta, count):
    # Tiny per-channel reduction over the per-tile partials (plain JAX).
    s = jnp.sum(psum, axis=(0, 1))
    ss = jnp.sum(psumsq, axis=(0, 1))
    mean = s / count
    var = jnp.maximum(ss / count - mean * mean, 0.0)   # biased var (PyTorch train)
    scale = gamma * jax.lax.rsqrt(var + _EPS)
    shift = beta - mean * scale
    return scale, shift


# ---------------------------------------------------------------------------
# ResidualBlock forward
# ---------------------------------------------------------------------------
def residual_block(x_nchw, params, *, max_tile_m=1024):
    """ResidualBlock forward. x_nchw: (N, C, H, W) f32. Returns (N, C, H, W)."""
    n, c, h, w = x_nchw.shape
    cm = c // 2
    m = n * h * w
    tile_m = _pick_tile_m(m, max_tile_m)
    x_flat = jnp.transpose(x_nchw, (0, 2, 3, 1)).reshape(m, c)   # NHWC rows

    for p in params:
        # --- CBR2d #1: 1x1 conv C -> C/2 (conv bias cancelled by train-mode BN)
        w1 = jnp.transpose(p["w1"][:, :, 0, 0], (1, 0)).astype(jnp.bfloat16)
        y1, ps1, pss1 = _conv1x1(x_flat, w1, tile_m=tile_m)
        sc1, sh1 = _bn_scale_shift(ps1, pss1, p["g1"], p["be1"], m)
        h_act = _bn_act(y1, sc1, sh1, out_dtype=jnp.bfloat16, tile_m=tile_m)

        # --- CBR2d #2: 3x3 conv C/2 -> C, pad=1, nine in-kernel tap matmuls ---
        h_pad = jnp.pad(h_act.reshape(n, h, w, cm),
                        ((0, 0), (1, 1), (1, 1), (0, 0)))
        w2 = jnp.transpose(p["w2"], (2, 3, 1, 0)).reshape(9, cm, c)
        w2 = w2.astype(jnp.bfloat16)
        y2, ps2, pss2 = _conv3x3(h_pad, w2)
        sc2, sh2 = _bn_scale_shift(ps2, pss2, p["g2"], p["be2"], m)
        # residual add (x = x + layer(x)) fused into the normalize+activate pass
        x_flat = _bn_act(y2, sc2, sh2, residual=x_flat,
                         out_dtype=jnp.float32, tile_m=tile_m)

    return jnp.transpose(x_flat.reshape(n, h, w, c), (0, 3, 1, 2))   # -> NCHW


# ---------------------------------------------------------------------------
# Deterministic parameter init (shapes follow the PyTorch module __init__)
# ---------------------------------------------------------------------------
def init_params(key, channels, num_repeats=2):
    params = []
    cm = channels // 2
    for r in range(num_repeats):
        k = jax.random.fold_in(key, r)
        k1, k2, k3, k4, k5, k6, k7, k8 = jax.random.split(k, 8)
        params.append(dict(
            w1=0.3 * jax.random.normal(k1, (cm, channels, 1, 1), jnp.float32),
            b1=0.1 * jax.random.normal(k2, (cm,), jnp.float32),
            g1=1.0 + 0.1 * jax.random.normal(k3, (cm,), jnp.float32),
            be1=0.1 * jax.random.normal(k4, (cm,), jnp.float32),
            w2=0.2 * jax.random.normal(k5, (channels, cm, 3, 3), jnp.float32),
            b2=0.1 * jax.random.normal(k6, (channels,), jnp.float32),
            g2=1.0 + 0.1 * jax.random.normal(k7, (channels,), jnp.float32),
            be2=0.1 * jax.random.normal(k8, (channels,), jnp.float32),
        ))
    return params


# ---------------------------------------------------------------------------
# Pure-JAX reference (NCHW, f32, includes the conv bias) for verification
# ---------------------------------------------------------------------------
def _cbr_ref(x, w, b, g, be, padding):
    y = jax.lax.conv_general_dilated(
        x, w, window_strides=(1, 1),
        padding=[(padding, padding), (padding, padding)],
        dimension_numbers=("NCHW", "OIHW", "NCHW"),
        precision=jax.lax.Precision.HIGHEST,
    ) + b[None, :, None, None]
    mean = y.mean(axis=(0, 2, 3), keepdims=True)
    var = ((y - mean) ** 2).mean(axis=(0, 2, 3), keepdims=True)
    yn = (y - mean) * jax.lax.rsqrt(var + _EPS)
    yn = yn * g[None, :, None, None] + be[None, :, None, None]
    return jnp.where(yn >= 0, yn, _NEG_SLOPE * yn)


def residual_block_ref(x, params):
    for p in params:
        h = _cbr_ref(x, p["w1"], p["b1"], p["g1"], p["be1"], padding=0)
        x = x + _cbr_ref(h, p["w2"], p["b2"], p["g2"], p["be2"], padding=1)
    return x


if __name__ == "__main__":
    key = jax.random.PRNGKey(0)
    kx, kp = jax.random.split(key)

    N, C, H, W = 2, 4, 16, 16
    x = jax.random.normal(kx, (N, C, H, W), jnp.float32)
    params = init_params(kp, C, num_repeats=2)

    # max_tile_m=128 so this toy shape still exercises the multi-tile /
    # partial-stats path (M = 512 -> 4 tiles); at real sizes keep the default.
    fwd = jax.jit(functools.partial(residual_block, max_tile_m=128))
    out = jax.block_until_ready(fwd(x, params))

    ref = jax.block_until_ready(residual_block_ref(x, params))
    assert out.shape == (N, C, H, W), out.shape
    # Tolerance loosened vs an all-f32 check because the MXU matmuls run with
    # bf16 inputs (f32 accumulation) and h is stored bf16, per the perf review.
    assert jnp.allclose(out, ref, rtol=2e-2, atol=2e-2), (
        float(jnp.max(jnp.abs(out - ref))))
    print("KERNEL_OK")
</pallas_src>

<mosaic_0001>
module attributes {stable_mosaic.version = 11 : i64} {
  func.func @_conv1x1_kernel(%arg0: i32, %arg1: memref<128x4xf32, #tpu.memory_space<vmem>>, %arg2: memref<4x2xbf16, #tpu.memory_space<vmem>>, %arg3: memref<128x2xf32, #tpu.memory_space<vmem>>, %arg4: memref<1x1x2xf32, #tpu.memory_space<vmem>>, %arg5: memref<1x1x2xf32, #tpu.memory_space<vmem>>) attributes {dimension_semantics = [#tpu.dimension_semantics<parallel>], iteration_bounds = array<i64: 4>, scalar_prefetch = 0 : i64, scratch_operands = 0 : i64, tpu.core_type = #tpu.core_type<tc>, window_params = [{transform_indices = @transform_0, window_bounds = array<i64: 128, 4>}, {pipeline_mode = #tpu.pipeline_mode<synchronous>, transform_indices = @transform_1, window_bounds = array<i64: 4, 2>}, {transform_indices = @transform_2, window_bounds = array<i64: 128, 2>}, {transform_indices = @transform_3, window_bounds = array<i64: 1, 1, 2>}, {transform_indices = @transform_4, window_bounds = array<i64: 1, 1, 2>}]} {
    %c0 = arith.constant 0 : index
    %c0_0 = arith.constant 0 : index
    %0 = vector.load %arg1[%c0, %c0_0] : memref<128x4xf32, #tpu.memory_space<vmem>>, vector<128x4xf32>
    %1 = arith.truncf %0 : vector<128x4xf32> to vector<128x4xbf16>
    %c0_1 = arith.constant 0 : index
    %c0_2 = arith.constant 0 : index
    %2 = vector.load %arg2[%c0_1, %c0_2] : memref<4x2xbf16, #tpu.memory_space<vmem>>, vector<4x2xbf16>
    %cst = arith.constant dense<0.000000e+00> : vector<128x2xf32>
    %3 = tpu.matmul %1, %2, %cst {dimension_numbers = #tpu.dot_dimension_numbers<[1], [0], [0], [1], [0, 0, 1, 1], [], []>} : vector<128x4xbf16>, vector<4x2xbf16>, vector<128x2xf32> -> vector<128x2xf32>
    %c0_3 = arith.constant 0 : index
    %c0_4 = arith.constant 0 : index
    %4 = vector.load %arg3[%c0_3, %c0_4] : memref<128x2xf32, #tpu.memory_space<vmem>>, vector<128x2xf32>
    tpu.vector_store %arg3[%c0_3, %c0_4], %3 {strides = array<i32>} : memref<128x2xf32, #tpu.memory_space<vmem>>, vector<128x2xf32>,
    %cst_5 = arith.constant dense<0.000000e+00> : vector<2xf32>
    %5 = vector.multi_reduction <add>, %3, %cst_5 [0] : vector<128x2xf32> to vector<2xf32>
    %6 = vector.shape_cast %5 : vector<2xf32> to vector<1x2xf32>
    %c0_6 = arith.constant 0 : index
    %c0_7 = arith.constant 0 : index
    %c0_8 = arith.constant 0 : index
    %7 = vector.load %arg4[%c0_6, %c0_7, %c0_8] : memref<1x1x2xf32, #tpu.memory_space<vmem>>, vector<1x1x2xf32>
    %8 = vector.shape_cast %7 : vector<1x1x2xf32> to vector<1x2xf32>
    %9 = vector.shape_cast %6 : vector<1x2xf32> to vector<1x1x2xf32>
    tpu.vector_store %arg4[%c0_6, %c0_7, %c0_8], %9 {strides = array<i32>} : memref<1x1x2xf32, #tpu.memory_space<vmem>>, vector<1x1x2xf32>,
    %10 = arith.mulf %3, %3 : vector<128x2xf32>
    %cst_9 = arith.constant dense<0.000000e+00> : vector<2xf32>
    %11 = vector.multi_reduction <add>, %10, %cst_9 [0] : vector<128x2xf32> to vector<2xf32>
    %12 = vector.shape_cast %11 : vector<2xf32> to vector<1x2xf32>
    %c0_10 = arith.constant 0 : index
    %c0_11 = arith.constant 0 : index
    %c0_12 = arith.constant 0 : index
    %13 = vector.load %arg5[%c0_10, %c0_11, %c0_12] : memref<1x1x2xf32, #tpu.memory_space<vmem>>, vector<1x1x2xf32>
    %14 = vector.shape_cast %13 : vector<1x1x2xf32> to vector<1x2xf32>
    %15 = vector.shape_cast %12 : vector<1x2xf32> to vector<1x1x2xf32>
    tpu.vector_store %arg5[%c0_10, %c0_11, %c0_12], %15 {strides = array<i32>} : memref<1x1x2xf32, #tpu.memory_space<vmem>>, vector<1x1x2xf32>,
    return
  }
  func.func @transform_0(%arg0: i32) -> (i32, i32) {
    %c0_i32 = arith.constant 0 : i32
    %c0_i32_0 = arith.constant 0 : i32
    return %arg0, %c0_i32 : i32, i32
  }
  func.func @transform_1(%arg0: i32) -> (i32, i32) {
    %c0_i32 = arith.constant 0 : i32
    %c0_i32_0 = arith.constant 0 : i32
    %c0_i32_1 = arith.constant 0 : i32
    return %c0_i32, %c0_i32_0 : i32, i32
  }
  func.func @transform_2(%arg0: i32) -> (i32, i32) {
    %c0_i32 = arith.constant 0 : i32
    %c0_i32_0 = arith.constant 0 : i32
    return %arg0, %c0_i32 : i32, i32
  }
  func.func @transform_3(%arg0: i32) -> (i32, i32, i32) {
    %c0_i32 = arith.constant 0 : i32
    %c0_i32_0 = arith.constant 0 : i32
    %c0_i32_1 = arith.constant 0 : i32
    return %arg0, %c0_i32, %c0_i32_0 : i32, i32, i32
  }
  func.func @transform_4(%arg0: i32) -> (i32, i32, i32) {
    %c0_i32 = arith.constant 0 : i32
    %c0_i32_0 = arith.constant 0 : i32
    %c0_i32_1 = arith.constant 0 : i32
    return %arg0, %c0_i32, %c0_i32_0 : i32, i32, i32
  }
}

module attributes {stable_mosaic.version = 11 : i64} {
  func.func @_bn_act_kernel(%arg0: i32, %arg1: memref<128x2xf32, #tpu.memory_space<vmem>>, %arg2: memref<1x2xf32, #tpu.memory_space<vmem>>, %arg3: memref<1x2xf32, #tpu.memory_space<vmem>>, %arg4: memref<128x2xbf16, #tpu.memory_space<vmem>>) attributes {dimension_semantics = [#tpu.dimension_semantics<parallel>], iteration_bounds = array<i64: 4>, scalar_prefetch = 0 : i64, scratch_operands = 0 : i64, tpu.core_type = #tpu.core_type<tc>, window_params = [{transform_indices = @transform_0, window_bounds = array<i64: 128, 2>}, {pipeline_mode = #tpu.pipeline_mode<synchronous>, transform_indices = @transform_1, window_bounds = array<i64: 1, 2>}, {pipeline_mode = #tpu.pipeline_mode<synchronous>, transform_indices = @transform_2, window_bounds = array<i64: 1, 2>}, {transform_indices = @transform_3, window_bounds = array<i64: 128, 2>}]} {
    %c0 = arith.constant 0 : index
    %c0_0 = arith.constant 0 : index
    %0 = vector.load %arg1[%c0, %c0_0] : memref<128x2xf32, #tpu.memory_space<vmem>>, vector<128x2xf32>
    %c0_1 = arith.constant 0 : index
    %c0_2 = arith.constant 0 : index
    %1 = vector.load %arg2[%c0_1, %c0_2] : memref<1x2xf32, #tpu.memory_space<vmem>>, vector<1x2xf32>
    %2 = vector.broadcast %1 : vector<1x2xf32> to vector<128x2xf32>
    %3 = arith.mulf %0, %2 : vector<128x2xf32>
    %c0_3 = arith.constant 0 : index
    %c0_4 = arith.constant 0 : index
    %4 = vector.load %arg3[%c0_3, %c0_4] : memref<1x2xf32, #tpu.memory_space<vmem>>, vector<1x2xf32>
    %5 = vector.broadcast %4 : vector<1x2xf32> to vector<128x2xf32>
    %6 = arith.addf %3, %5 : vector<128x2xf32>
    %cst = arith.constant 1.000000e-01 : f32
    %7 = vector.broadcast %cst : f32 to vector<128x2xf32>
    %8 = arith.mulf %7, %6 : vector<128x2xf32>
    %9 = arith.maximumf %6, %8 : vector<128x2xf32>
    %10 = arith.truncf %9 : vector<128x2xf32> to vector<128x2xbf16>
    %c0_5 = arith.constant 0 : index
    %c0_6 = arith.constant 0 : index
    %11 = vector.load %arg4[%c0_5, %c0_6] : memref<128x2xbf16, #tpu.memory_space<vmem>>, vector<128x2xbf16>
    tpu.vector_store %arg4[%c0_5, %c0_6], %10 {strides = array<i32>} : memref<128x2xbf16, #tpu.memory_space<vmem>>, vector<128x2xbf16>,
    return
  }
  func.func @transform_0(%arg0: i32) -> (i32, i32) {
    %c0_i32 = arith.constant 0 : i32
    %c0_i32_0 = arith.constant 0 : i32
    return %arg0, %c0_i32 : i32, i32
  }
  func.func @transform_1(%arg0: i32) -> (i32, i32) {
    %c0_i32 = arith.constant 0 : i32
    %c0_i32_0 = arith.constant 0 : i32
    %c0_i32_1 = arith.constant 0 : i32
    return %c0_i32, %c0_i32_0 : i32, i32
  }
  func.func @transform_2(%arg0: i32) -> (i32, i32) {
    %c0_i32 = arith.constant 0 : i32
    %c0_i32_0 = arith.constant 0 : i32
    %c0_i32_1 = arith.constant 0 : i32
    return %c0_i32, %c0_i32_0 : i32, i32
  }
  func.func @transform_3(%arg0: i32) -> (i32, i32) {
    %c0_i32 = arith.constant 0 : i32
    %c0_i32_0 = arith.constant 0 : i32
    return %arg0, %c0_i32 : i32, i32
  }
}

module attributes {stable_mosaic.version = 11 : i64} {
  func.func @_conv3x3_kernel(%arg0: i32, %arg1: memref<1x18x18x2xbf16, #tpu.memory_space<vmem>>, %arg2: memref<9x2x4xbf16, #tpu.memory_space<vmem>>, %arg3: memref<256x4xf32, #tpu.memory_space<vmem>>, %arg4: memref<1x1x4xf32, #tpu.memory_space<vmem>>, %arg5: memref<1x1x4xf32, #tpu.memory_space<vmem>>) attributes {dimension_semantics = [#tpu.dimension_semantics<parallel>], iteration_bounds = array<i64: 2>, scalar_prefetch = 0 : i64, scratch_operands = 0 : i64, tpu.core_type = #tpu.core_type<tc>, window_params = [{transform_indices = @transform_0, window_bounds = array<i64: 1, 18, 18, 2>}, {pipeline_mode = #tpu.pipeline_mode<synchronous>, transform_indices = @transform_1, window_bounds = array<i64: 9, 2, 4>}, {transform_indices = @transform_2, window_bounds = array<i64: 256, 4>}, {transform_indices = @transform_3, window_bounds = array<i64: 1, 1, 4>}, {transform_indices = @transform_4, window_bounds = array<i64: 1, 1, 4>}]} {
    %c0 = arith.constant 0 : index
    %c0_0 = arith.constant 0 : index
    %c0_1 = arith.constant 0 : index
    %c0_2 = arith.constant 0 : index
    %0 = vector.load %arg1[%c0, %c0_0, %c0_1, %c0_2] : memref<1x18x18x2xbf16, #tpu.memory_space<vmem>>, vector<1x18x18x2xbf16>
    %1 = vector.shape_cast %0 : vector<1x18x18x2xbf16> to vector<18x18x2xbf16>
    %2 = arith.extf %1 : vector<18x18x2xbf16> to vector<18x18x2xf32>
    %c0_3 = arith.constant 0 : index
    %c0_4 = arith.constant 0 : index
    %c0_5 = arith.constant 0 : index
    %3 = vector.load %arg2[%c0_3, %c0_4, %c0_5] : memref<9x2x4xbf16, #tpu.memory_space<vmem>>, vector<9x2x4xbf16>
    %cst = arith.constant 0.000000e+00 : f32
    %4 = vector.broadcast %cst : f32 to vector<256x4xf32>
    %5 = vector.extract_strided_slice %2 {offsets = [0, 0, 0], sizes = [16, 16, 2], strides = [1, 1, 1]} : vector<18x18x2xf32> to vector<16x16x2xf32>
    %6 = vector.shape_cast %5 : vector<16x16x2xf32> to vector<256x2xf32>
    %7 = arith.truncf %6 : vector<256x2xf32> to vector<256x2xbf16>
    %8 = vector.extract_strided_slice %3 {offsets = [0, 0, 0], sizes = [1, 2, 4], strides = [1, 1, 1]} : vector<9x2x4xbf16> to vector<1x2x4xbf16>
    %9 = vector.shape_cast %8 : vector<1x2x4xbf16> to vector<2x4xbf16>
    %cst_6 = arith.constant dense<0.000000e+00> : vector<256x4xf32>
    %10 = tpu.matmul %7, %9, %cst_6 {dimension_numbers = #tpu.dot_dimension_numbers<[1], [0], [0], [1], [0, 0, 1, 1], [], []>} : vector<256x2xbf16>, vector<2x4xbf16>, vector<256x4xf32> -> vector<256x4xf32>
    %11 = arith.addf %4, %10 : vector<256x4xf32>
    %12 = vector.extract_strided_slice %2 {offsets = [0, 1, 0], sizes = [16, 16, 2], strides = [1, 1, 1]} : vector<18x18x2xf32> to vector<16x16x2xf32>
    %13 = vector.shape_cast %12 : vector<16x16x2xf32> to vector<256x2xf32>
    %14 = arith.truncf %13 : vector<256x2xf32> to vector<256x2xbf16>
    %15 = vector.extract_strided_slice %3 {offsets = [1, 0, 0], sizes = [1, 2, 4], strides = [1, 1, 1]} : vector<9x2x4xbf16> to vector<1x2x4xbf16>
    %16 = vector.shape_cast %15 : vector<1x2x4xbf16> to vector<2x4xbf16>
    %cst_7 = arith.constant dense<0.000000e+00> : vector<256x4xf32>
    %17 = tpu.matmul %14, %16, %cst_7 {dimension_numbers = #tpu.dot_dimension_numbers<[1], [0], [0], [1], [0, 0, 1, 1], [], []>} : vector<256x2xbf16>, vector<2x4xbf16>, vector<256x4xf32> -> vector<256x4xf32>
    %18 = arith.addf %11, %17 : vector<256x4xf32>
    %19 = vector.extract_strided_slice %2 {offsets = [0, 2, 0], sizes = [16, 16, 2], strides = [1, 1, 1]} : vector<18x18x2xf32> to vector<16x16x2xf32>
    %20 = vector.shape_cast %19 : vector<16x16x2xf32> to vector<256x2xf32>
    %21 = arith.truncf %20 : vector<256x2xf32> to vector<256x2xbf16>
    %22 = vector.extract_strided_slice %3 {offsets = [2, 0, 0], sizes = [1, 2, 4], strides = [1, 1, 1]} : vector<9x2x4xbf16> to vector<1x2x4xbf16>
    %23 = vector.shape_cast %22 : vector<1x2x4xbf16> to vector<2x4xbf16>
    %cst_8 = arith.constant dense<0.000000e+00> : vector<256x4xf32>
    %24 = tpu.matmul %21, %23, %cst_8 {dimension_numbers = #tpu.dot_dimension_numbers<[1], [0], [0], [1], [0, 0, 1, 1], [], []>} : vector<256x2xbf16>, vector<2x4xbf16>, vector<256x4xf32> -> vector<256x4xf32>
    %25 = arith.addf %18, %24 : vector<256x4xf32>
    %26 = vector.extract_strided_slice %2 {offsets = [1, 0, 0], sizes = [16, 16, 2], strides = [1, 1, 1]} : vector<18x18x2xf32> to vector<16x16x2xf32>
    %27 = vector.shape_cast %26 : vector<16x16x2xf32> to vector<256x2xf32>
    %28 = arith.truncf %27 : vector<256x2xf32> to vector<256x2xbf16>
    %29 = vector.extract_strided_slice %3 {offsets = [3, 0, 0], sizes = [1, 2, 4], strides = [1, 1, 1]} : vector<9x2x4xbf16> to vector<1x2x4xbf16>
    %30 = vector.shape_cast %29 : vector<1x2x4xbf16> to vector<2x4xbf16>
    %cst_9 = arith.constant dense<0.000000e+00> : vector<256x4xf32>
    %31 = tpu.matmul %28, %30, %cst_9 {dimension_numbers = #tpu.dot_dimension_numbers<[1], [0], [0], [1], [0, 0, 1, 1], [], []>} : vector<256x2xbf16>, vector<2x4xbf16>, vector<256x4xf32> -> vector<256x4xf32>
    %32 = arith.addf %25, %31 : vector<256x4xf32>
    %33 = vector.extract_strided_slice %2 {offsets = [1, 1, 0], sizes = [16, 16, 2], strides = [1, 1, 1]} : vector<18x18x2xf32> to vector<16x16x2xf32>
    %34 = vector.shape_cast %33 : vector<16x16x2xf32> to vector<256x2xf32>
    %35 = arith.truncf %34 : vector<256x2xf32> to vector<256x2xbf16>
    %36 = vector.extract_strided_slice %3 {offsets = [4, 0, 0], sizes = [1, 2, 4], strides = [1, 1, 1]} : vector<9x2x4xbf16> to vector<1x2x4xbf16>
    %37 = vector.shape_cast %36 : vector<1x2x4xbf16> to vector<2x4xbf16>
    %cst_10 = arith.constant dense<0.000000e+00> : vector<256x4xf32>
    %38 = tpu.matmul %35, %37, %cst_10 {dimension_numbers = #tpu.dot_dimension_numbers<[1], [0], [0], [1], [0, 0, 1, 1], [], []>} : vector<256x2xbf16>, vector<2x4xbf16>, vector<256x4xf32> -> vector<256x4xf32>
    %39 = arith.addf %32, %38 : vector<256x4xf32>
    %40 = vector.extract_strided_slice %2 {offsets = [1, 2, 0], sizes = [16, 16, 2], strides = [1, 1, 1]} : vector<18x18x2xf32> to vector<16x16x2xf32>
    %41 = vector.shape_cast %40 : vector<16x16x2xf32> to vector<256x2xf32>
    %42 = arith.truncf %41 : vector<256x2xf32> to vector<256x2xbf16>
    %43 = vector.extract_strided_slice %3 {offsets = [5, 0, 0], sizes = [1, 2, 4], strides = [1, 1, 1]} : vector<9x2x4xbf16> to vector<1x2x4xbf16>
    %44 = vector.shape_cast %43 : vector<1x2x4xbf16> to vector<2x4xbf16>
    %cst_11 = arith.constant dense<0.000000e+00> : vector<256x4xf32>
    %45 = tpu.matmul %42, %44, %cst_11 {dimension_numbers = #tpu.dot_dimension_numbers<[1], [0], [0], [1], [0, 0, 1, 1], [], []>} : vector<256x2xbf16>, vector<2x4xbf16>, vector<256x4xf32> -> vector<256x4xf32>
    %46 = arith.addf %39, %45 : vector<256x4xf32>
    %47 = vector.extract_strided_slice %2 {offsets = [2, 0, 0], sizes = [16, 16, 2], strides = [1, 1, 1]} : vector<18x18x2xf32> to vector<16x16x2xf32>
    %48 = vector.shape_cast %47 : vector<16x16x2xf32> to vector<256x2xf32>
    %49 = arith.truncf %48 : vector<256x2xf32> to vector<256x2xbf16>
    %50 = vector.extract_strided_slice %3 {offsets = [6, 0, 0], sizes = [1, 2, 4], strides = [1, 1, 1]} : vector<9x2x4xbf16> to vector<1x2x4xbf16>
    %51 = vector.shape_cast %50 : vector<1x2x4xbf16> to vector<2x4xbf16>
    %cst_12 = arith.constant dense<0.000000e+00> : vector<256x4xf32>
    %52 = tpu.matmul %49, %51, %cst_12 {dimension_numbers = #tpu.dot_dimension_numbers<[1], [0], [0], [1], [0, 0, 1, 1], [], []>} : vector<256x2xbf16>, vector<2x4xbf16>, vector<256x4xf32> -> vector<256x4xf32>
    %53 = arith.addf %46, %52 : vector<256x4xf32>
    %54 = vector.extract_strided_slice %2 {offsets = [2, 1, 0], sizes = [16, 16, 2], strides = [1, 1, 1]} : vector<18x18x2xf32> to vector<16x16x2xf32>
    %55 = vector.shape_cast %54 : vector<16x16x2xf32> to vector<256x2xf32>
    %56 = arith.truncf %55 : vector<256x2xf32> to vector<256x2xbf16>
    %57 = vector.extract_strided_slice %3 {offsets = [7, 0, 0], sizes = [1, 2, 4], strides = [1, 1, 1]} : vector<9x2x4xbf16> to vector<1x2x4xbf16>
    %58 = vector.shape_cast %57 : vector<1x2x4xbf16> to vector<2x4xbf16>
    %cst_13 = arith.constant dense<0.000000e+00> : vector<256x4xf32>
    %59 = tpu.matmul %56, %58, %cst_13 {dimension_numbers = #tpu.dot_dimension_numbers<[1], [0], [0], [1], [0, 0, 1, 1], [], []>} : vector<256x2xbf16>, vector<2x4xbf16>, vector<256x4xf32> -> vector<256x4xf32>
    %60 = arith.addf %53, %59 : vector<256x4xf32>
    %61 = vector.extract_strided_slice %2 {offsets = [2, 2, 0], sizes = [16, 16, 2], strides = [1, 1, 1]} : vector<18x18x2xf32> to vector<16x16x2xf32>
    %62 = vector.shape_cast %61 : vector<16x16x2xf32> to vector<256x2xf32>
    %63 = arith.truncf %62 : vector<256x2xf32> to vector<256x2xbf16>
    %64 = vector.extract_strided_slice %3 {offsets = [8, 0, 0], sizes = [1, 2, 4], strides = [1, 1, 1]} : vector<9x2x4xbf16> to vector<1x2x4xbf16>
    %65 = vector.shape_cast %64 : vector<1x2x4xbf16> to vector<2x4xbf16>
    %cst_14 = arith.constant dense<0.000000e+00> : vector<256x4xf32>
    %66 = tpu.matmul %63, %65, %cst_14 {dimension_numbers = #tpu.dot_dimension_numbers<[1], [0], [0], [1], [0, 0, 1, 1], [], []>} : vector<256x2xbf16>, vector<2x4xbf16>, vector<256x4xf32> -> vector<256x4xf32>
    %67 = arith.addf %60, %66 : vector<256x4xf32>
    %c0_15 = arith.constant 0 : index
    %c0_16 = arith.constant 0 : index
    %68 = vector.load %arg3[%c0_15, %c0_16] : memref<256x4xf32, #tpu.memory_space<vmem>>, vector<256x4xf32>
    tpu.vector_store %arg3[%c0_15, %c0_16], %67 {strides = array<i32>} : memref<256x4xf32, #tpu.memory_space<vmem>>, vector<256x4xf32>,
    %cst_17 = arith.constant dense<0.000000e+00> : vector<4xf32>
    %69 = vector.multi_reduction <add>, %67, %cst_17 [0] : vector<256x4xf32> to vector<4xf32>
    %70 = vector.shape_cast %69 : vector<4xf32> to vector<1x4xf32>
    %c0_18 = arith.constant 0 : index
    %c0_19 = arith.constant 0 : index
    %c0_20 = arith.constant 0 : index
    %71 = vector.load %arg4[%c0_18, %c0_19, %c0_20] : memref<1x1x4xf32, #tpu.memory_space<vmem>>, vector<1x1x4xf32>
    %72 = vector.shape_cast %71 : vector<1x1x4xf32> to vector<1x4xf32>
    %73 = vector.shape_cast %70 : vector<1x4xf32> to vector<1x1x4xf32>
    tpu.vector_store %arg4[%c0_18, %c0_19, %c0_20], %73 {strides = array<i32>} : memref<1x1x4xf32, #tpu.memory_space<vmem>>, vector<1x1x4xf32>,
    %74 = arith.mulf %67, %67 : vector<256x4xf32>
    %cst_21 = arith.constant dense<0.000000e+00> : vector<4xf32>
    %75 = vector.multi_reduction <add>, %74, %cst_21 [0] : vector<256x4xf32> to vector<4xf32>
    %76 = vector.shape_cast %75 : vector<4xf32> to vector<1x4xf32>
    %c0_22 = arith.constant 0 : index
    %c0_23 = arith.constant 0 : index
    %c0_24 = arith.constant 0 : index
    %77 = vector.load %arg5[%c0_22, %c0_23, %c0_24] : memref<1x1x4xf32, #tpu.memory_space<vmem>>, vector<1x1x4xf32>
    %78 = vector.shape_cast %77 : vector<1x1x4xf32> to vector<1x4xf32>
    %79 = vector.shape_cast %76 : vector<1x4xf32> to vector<1x1x4xf32>
    tpu.vector_store %arg5[%c0_22, %c0_23, %c0_24], %79 {strides = array<i32>} : memref<1x1x4xf32, #tpu.memory_space<vmem>>, vector<1x1x4xf32>,
    return
  }
  func.func @transform_0(%arg0: i32) -> (i32, i32, i32, i32) {
    %c0_i32 = arith.constant 0 : i32
    %c0_i32_0 = arith.constant 0 : i32
    %c0_i32_1 = arith.constant 0 : i32
    %c0_i32_2 = arith.constant 0 : i32
    return %arg0, %c0_i32, %c0_i32_0, %c0_i32_1 : i32, i32, i32, i32
  }
  func.func @transform_1(%arg0: i32) -> (i32, i32, i32) {
    %c0_i32 = arith.constant 0 : i32
    %c0_i32_0 = arith.constant 0 : i32
    %c0_i32_1 = arith.constant 0 : i32
    %c0_i32_2 = arith.constant 0 : i32
    return %c0_i32, %c0_i32_0, %c0_i32_1 : i32, i32, i32
  }
  func.func @transform_2(%arg0: i32) -> (i32, i32) {
    %c0_i32 = arith.constant 0 : i32
    %c0_i32_0 = arith.constant 0 : i32
    return %arg0, %c0_i32 : i32, i32
  }
  func.func @transform_3(%arg0: i32) -> (i32, i32, i32) {
    %c0_i32 = arith.constant 0 : i32
    %c0_i32_0 = arith.constant 0 : i32
    %c0_i32_1 = arith.constant 0 : i32
    return %arg0, %c0_i32, %c0_i32_0 : i32, i32, i32
  }
  func.func @transform_4(%arg0: i32) -> (i32, i32, i32) {
    %c0_i32 = arith.constant 0 : i32
    %c0_i32_0 = arith.constant 0 : i32
    %c0_i32_1 = arith.constant 0 : i32
    return %arg0, %c0_i32, %c0_i32_0 : i32, i32, i32
  }
}

module attributes {stable_mosaic.version = 11 : i64} {
  func.func @_bn_act_kernel(%arg0: i32, %arg1: memref<128x4xf32, #tpu.memory_space<vmem>>, %arg2: memref<1x4xf32, #tpu.memory_space<vmem>>, %arg3: memref<1x4xf32, #tpu.memory_space<vmem>>, %arg4: memref<128x4xf32, #tpu.memory_space<vmem>>, %arg5: memref<128x4xf32, #tpu.memory_space<vmem>>) attributes {dimension_semantics = [#tpu.dimension_semantics<parallel>], iteration_bounds = array<i64: 4>, scalar_prefetch = 0 : i64, scratch_operands = 0 : i64, tpu.core_type = #tpu.core_type<tc>, window_params = [{transform_indices = @transform_0, window_bounds = array<i64: 128, 4>}, {pipeline_mode = #tpu.pipeline_mode<synchronous>, transform_indices = @transform_1, window_bounds = array<i64: 1, 4>}, {pipeline_mode = #tpu.pipeline_mode<synchronous>, transform_indices = @transform_2, window_bounds = array<i64: 1, 4>}, {transform_indices = @transform_3, window_bounds = array<i64: 128, 4>}, {transform_indices = @transform_4, window_bounds = array<i64: 128, 4>}]} {
    %c0 = arith.constant 0 : index
    %c0_0 = arith.constant 0 : index
    %0 = vector.load %arg1[%c0, %c0_0] : memref<128x4xf32, #tpu.memory_space<vmem>>, vector<128x4xf32>
    %c0_1 = arith.constant 0 : index
    %c0_2 = arith.constant 0 : index
    %1 = vector.load %arg2[%c0_1, %c0_2] : memref<1x4xf32, #tpu.memory_space<vmem>>, vector<1x4xf32>
    %2 = vector.broadcast %1 : vector<1x4xf32> to vector<128x4xf32>
    %3 = arith.mulf %0, %2 : vector<128x4xf32>
    %c0_3 = arith.constant 0 : index
    %c0_4 = arith.constant 0 : index
    %4 = vector.load %arg3[%c0_3, %c0_4] : memref<1x4xf32, #tpu.memory_space<vmem>>, vector<1x4xf32>
    %5 = vector.broadcast %4 : vector<1x4xf32> to vector<128x4xf32>
    %6 = arith.addf %3, %5 : vector<128x4xf32>
    %cst = arith.constant 1.000000e-01 : f32
    %7 = vector.broadcast %cst : f32 to vector<128x4xf32>
    %8 = arith.mulf %7, %6 : vector<128x4xf32>
    %9 = arith.maximumf %6, %8 : vector<128x4xf32>
    %c0_5 = arith.constant 0 : index
    %c0_6 = arith.constant 0 : index
    %10 = vector.load %arg4[%c0_5, %c0_6] : memref<128x4xf32, #tpu.memory_space<vmem>>, vector<128x4xf32>
    %11 = arith.addf %9, %10 : vector<128x4xf32>
    %c0_7 = arith.constant 0 : index
    %c0_8 = arith.constant 0 : index
    %12 = vector.load %arg5[%c0_7, %c0_8] : memref<128x4xf32, #tpu.memory_space<vmem>>, vector<128x4xf32>
    tpu.vector_store %arg5[%c0_7, %c0_8], %11 {strides = array<i32>} : memref<128x4xf32, #tpu.memory_space<vmem>>, vector<128x4xf32>,
    return
  }
  func.func @transform_0(%arg0: i32) -> (i32, i32) {
    %c0_i32 = arith.constant 0 : i32
    %c0_i32_0 = arith.constant 0 : i32
    return %arg0, %c0_i32 : i32, i32
  }
  func.func @transform_1(%arg0: i32) -> (i32, i32) {
    %c0_i32 = arith.constant 0 : i32
    %c0_i32_0 = arith.constant 0 : i32
    %c0_i32_1 = arith.constant 0 : i32
    return %c0_i32, %c0_i32_0 : i32, i32
  }
  func.func @transform_2(%arg0: i32) -> (i32, i32) {
    %c0_i32 = arith.constant 0 : i32
    %c0_i32_0 = arith.constant 0 : i32
    %c0_i32_1 = arith.constant 0 : i32
    return %c0_i32, %c0_i32_0 : i32, i32
  }
  func.func @transform_3(%arg0: i32) -> (i32, i32) {
    %c0_i32 = arith.constant 0 : i32
    %c0_i32_0 = arith.constant 0 : i32
    return %arg0, %c0_i32 : i32, i32
  }
  func.func @transform_4(%arg0: i32) -> (i32, i32) {
    %c0_i32 = arith.constant 0 : i32
    %c0_i32_0 = arith.constant 0 : i32
    return %arg0, %c0_i32 : i32, i32
  }
}

</mosaic_0001>

<bundles_post_ra>
// kernel: residual_block.8
= control target key start
LH: loop header
LB: loop body
LE: loop exit
PB: predicated region body
PF: predicated region fallthrough
CT: control target
= control target key end

     0   :  { %s677_s15 = smov 0   ;;  %s807_s0 = inlined_call_operand.vmem [shape: f32[512,4], index: 0, kind: input, shape index: {}]   ;;  %s808_s1 = inlined_call_operand.vmem [shape: bf16[4,2], index: 1, kind: input, shape index: {}]   ;;  %s809_s2 = inlined_call_operand.vmem [shape: f32[512,2], index: 2, kind: output, shape index: {0}]   ;;  %s810_s3 = inlined_call_operand.vmem [shape: f32[4,1,2], index: 3, kind: output, shape index: {1}]   ;;  %s811_s4 = inlined_call_operand.vmem [shape: f32[4,1,2], index: 4, kind: output, shape index: {2}]  }
   0x1 LB: > { %s683_s16 = sadd.s32 4294967295, %s650_s15   ;;  %p590_p0 = scmp.ge.s32.totalorder %s650_s15, 1  ;;  %s650_s15 = sphi %s677_s15, %s15_s15  }
   0x2   : > { %p168_p1 = scmp.lt.s32.totalorder %s650_s15, 5 }
   0x4   : > { %p169_p2 = pnand %p590_p0, %p168_p1 }
   0x5   : > { %s591_s19 = sshll.u32 (!%p169_p2), %s683_s16, 4  ;;  %p212_p4 = scmp.lt.s32.totalorder (!%p169_p2), %s683_s16, 3 }
   0x6   : > { %172 = sbr.rel (%p169_p2) target bundleno = 263 (0x107), region = 28  ;;  %p201_p3 = scmp.lt.s32.totalorder (!%p169_p2), %s591_s19, 63 }
   0xb   : > { %v243_v0 = vld [vmem:[%s808_s1] sm:$0x3]  ;;  %vm269_vm0 = vcmask 1041408   ;;  %s813_s19 = smov (!%p201_p3, %s591_s19), 63  ;;  %vm244_vm1 = vcmask 31744   ;;  %vm370_vm2 = vcmask 15360  }
   0xc   : > { %634 = vmatprep.subr.msk.bf16.mxu0 %vm269_vm0, %v243_v0  ;;  %v271_v1 = vsel %vm269_vm0, %v243_v0, 0  ;;  %635 = vmatprep.subr.msk.bf16.mxu1 %vm269_vm0, %v243_v0  ;;  %s592_s20 = sshll.u32 %s813_s19, 3  ;;  %s815_s16 = smov (!%p212_p4, %s683_s16), 3  ;;  %vm424_vm3 = vcmask 8192  }
   0xd   : > { %615 = vmatpush3.bf16.msra.mxu0 %v271_v1  ;;  %633 = vmatpush3.bf16.msra.mxu1 %v271_v1  ;;  %s204_s23 = scalar_lea.vmem %s807_s0, %s592_s20  ;;  %s712_s26 = scalar_lea.vmem %s809_s2, %s592_s20 }
   0xe   : > { %v219_v2 = vld [vmem:[%s204_s23] sm:$0xff]  ;;  %v220_v3 = vld [vmem:[%s204_s23 + $0x8] sm:$0xff]  ;;  %v221_v4 = vld [vmem:[%s204_s23 + $0x10] sm:$0xff]  ;;  %s214_s29 = scalar_lea.vmem %s810_s3, %s815_s16  ;;  %s217_s6 = scalar_lea.vmem %s811_s4, %s815_s16 }
   0xf   : > { %v235_v5 = vpack.c.bf16 %v220_v3, %v219_v2  ;;  %v222_v6 = vld [vmem:[%s204_s23 + $0x18] sm:$0xff]  ;;  %v223_v7 = vld [vmem:[%s204_s23 + $0x20] sm:$0xff]  ;;  %v224_v8 = vld [vmem:[%s204_s23 + $0x28] sm:$0xff] }
  0x10   : > { %v236_v9 = vpack.c.bf16 %v222_v6, %v221_v4  ;;  %v237_v10 = vpack.c.bf16 %v224_v8, %v223_v7  ;;  %v227_v11 = vld [vmem:[%s204_s23 + $0x40] sm:$0xff]  ;;  %v228_v12 = vld [vmem:[%s204_s23 + $0x48] sm:$0xff]  ;;  %v229_v13 = vld [vmem:[%s204_s23 + $0x50] sm:$0xff] }
  0x11   : > { %616 = vmatprep.mubr.msk.bf16.mxu0 %vm244_vm1, %v235_v5  ;;  %v230_v14 = vld [vmem:[%s204_s23 + $0x58] sm:$0xff]  ;;  %v239_v15 = vpack.c.bf16 %v228_v12, %v227_v11  ;;  %v231_v17 = vld [vmem:[%s204_s23 + $0x60] sm:$0xff]  ;;  %v232_v18 = vld [vmem:[%s204_s23 + $0x68] sm:$0xff] }
  0x12   : > { %617 = vmatmul.mubr.msk.bf16.vlgmr.msra.gmra.mxu0 %vm244_vm1, %v236_v9  ;;  %v240_v16 = vpack.c.bf16 %v230_v14, %v229_v13  ;;  %v225_v19 = vld [vmem:[%s204_s23 + $0x30] sm:$0xff]  ;;  %v226_v20 = vld [vmem:[%s204_s23 + $0x38] sm:$0xff]  ;;  %v241_v21 = vpack.c.bf16 %v232_v18, %v231_v17 }
  0x13   : > { %620 = vmatprep.mubr.msk.bf16.mxu0 %vm244_vm1, %v237_v10  ;;  %624 = vmatprep.mubr.msk.bf16.mxu1 %vm244_vm1, %v239_v15  ;;  %v238_v22 = vpack.c.bf16 %v226_v20, %v225_v19  ;;  %v233_v23 = vld [vmem:[%s204_s23 + $0x70] sm:$0xff]  ;;  %v234_v24 = vld [vmem:[%s204_s23 + $0x78] sm:$0xff] }
  0x14   : > { %625 = vmatmul.mubr.msk.bf16.vlgmr.msra.gmra.mxu1 %vm244_vm1, %v240_v16  ;;  %v242_v25 = vpack.c.bf16 %v234_v24, %v233_v23 }
  0x15   : > { %628 = vmatprep.mubr.msk.bf16.mxu1 %vm244_vm1, %v241_v21 }
  0x1a   : > { %621 = vmatmul.mubr.msk.bf16.gmra.mxu0 %vm244_vm1, %v238_v22 }
  0x1c   : > { %629 = vmatmul.mubr.msk.bf16.gmra.mxu1 %vm244_vm1, %v242_v25 }
  0xd2   : > { %v618_v26 = vpop.f32.mrf.mxu0 }
  0xd3   : > { %373 = vst.msk [vmem:[%s712_s26 + $0x10] sm:$0xff] %vm370_vm2, %v618_v26  ;;  %v428_v33 = vmul.f32 %v618_v26, %v618_v26  ;;  %v390_v40 = vsel %vm370_vm2, %v618_v26, 0.0 }
  0xd4   : > { %v307_v27 = vpop.f32.mrf.mxu0  ;;  %v718_v28 = vpop.f32.mrf.mxu1 }
  0xd5   : > { %371 = vst.msk [vmem:[%s712_s26] sm:$0xff] %vm370_vm2, %v307_v27  ;;  %381 = vst.msk [vmem:[%s712_s26 + $0x50] sm:$0xff] %vm370_vm2, %v718_v28  ;;  %v426_v30 = vmul.f32 %v307_v27, %v307_v27  ;;  %v387_v34 = vsel %vm370_vm2, %v307_v27, 0.0  ;;  %v445_v48 = vsel %vm370_vm2, %v428_v33, 0.0  ;;  %v436_v20 = vmul.f32 %v718_v28, %v718_v28 }
  0xd6   : > { %v619_v29 = vpop.f32.mrf.mxu0  ;;  %v339_v31 = vpop.f32.mrf.mxu1  ;;  %v406_v25 = vsel %vm370_vm2, %v718_v28, 0.0 }
  0xd7   : > { %374 = vst.msk [vmem:[%s712_s26 + $0x18] sm:$0xff] %vm370_vm2, %v619_v29  ;;  %379 = vst.msk [vmem:[%s712_s26 + $0x40] sm:$0xff] %vm370_vm2, %v339_v31  ;;  %v442_v41 = vsel %vm370_vm2, %v426_v30, 0.0  ;;  %v429_v42 = vmul.f32 %v619_v29, %v619_v29  ;;  %v392_v49 = vsel %vm370_vm2, %v619_v29, 0.0  ;;  %v434_v12 = vmul.f32 %v339_v31, %v339_v31 }
  0xd8   : > { %v310_v32 = vpop.f32.mrf.mxu0  ;;  %v731_v37 = vpop.f32.mrf.mxu1  ;;  %v402_v16 = vsel %vm370_vm2, %v339_v31, 0.0  ;;  %v461_v31 = vsel %vm370_vm2, %v436_v20, 0.0 }
  0xd9   : > { %372 = vst.msk [vmem:[%s712_s26 + $0x8] sm:$0xff] %vm370_vm2, %v310_v32  ;;  %v388_v35 = vsel %vm370_vm2, %v310_v32, 0.0  ;;  %v427_v36 = vmul.f32 %v310_v32, %v310_v32  ;;  %382 = vst.msk [vmem:[%s712_s26 + $0x58] sm:$0xff] %vm370_vm2, %v731_v37  ;;  %v447_v55 = vsel %vm370_vm2, %v429_v42, 0.0  ;;  %v457_v21 = vsel %vm370_vm2, %v434_v12, 0.0 }
  0xda   : > { %v389_v38 = vadd.f32 %v388_v35, %v387_v34  ;;  %v622_v39 = vpop.f32.mrf.mxu0  ;;  %v342_v44 = vpop.f32.mrf.mxu1  ;;  %v437_v26 = vmul.f32 %v731_v37, %v731_v37  ;;  %v408_v32 = vsel %vm370_vm2, %v731_v37, 0.0 }
  0xdb   : > { %v443_v43 = vsel %vm370_vm2, %v427_v36, 0.0  ;;  %377 = vst.msk [vmem:[%s712_s26 + $0x30] sm:$0xff] %vm370_vm2, %v622_v39  ;;  %380 = vst.msk [vmem:[%s712_s26 + $0x48] sm:$0xff] %vm370_vm2, %v342_v44  ;;  %v432_v61 = vmul.f32 %v622_v39, %v622_v39  ;;  %v398_v4 = vsel %vm370_vm2, %v622_v39, 0.0  ;;  %v435_v17 = vmul.f32 %v342_v44, %v342_v44 }
  0xdc   : > { %v391_v45 = vadd.f32 %v390_v40, %v389_v38  ;;  %v444_v46 = vadd.f32 %v443_v43, %v442_v41  ;;  %v323_v47 = vpop.f32.mrf.mxu0  ;;  %v747_v51 = vpop.f32.mrf.mxu1  ;;  %v404_v22 = vsel %vm370_vm2, %v342_v44, 0.0  ;;  %v463_v36 = vsel %vm370_vm2, %v437_v26, 0.0 }
  0xdd   : > { %375 = vst.msk [vmem:[%s712_s26 + $0x20] sm:$0xff] %vm370_vm2, %v323_v47  ;;  %v430_v50 = vmul.f32 %v323_v47, %v323_v47  ;;  %385 = vst.msk [vmem:[%s712_s26 + $0x70] sm:$0xff] %vm370_vm2, %v747_v51  ;;  %v394_v56 = vsel %vm370_vm2, %v323_v47, 0.0  ;;  %v453_v10 = vsel %vm370_vm2, %v432_v61, 0.0  ;;  %v459_v27 = vsel %vm370_vm2, %v435_v17, 0.0 }
  0xde   : > { %v446_v52 = vadd.f32 %v445_v48, %v444_v46  ;;  %v393_v53 = vadd.f32 %v392_v49, %v391_v45  ;;  %v623_v54 = vpop.f32.mrf.mxu0  ;;  %v355_v57 = vpop.f32.mrf.mxu1  ;;  %v440_v41 = vmul.f32 %v747_v51, %v747_v51  ;;  %v414_v45 = vsel %vm370_vm2, %v747_v51, 0.0 }
  0xdf   : > { %378 = vst.msk [vmem:[%s712_s26 + $0x38] sm:$0xff] %vm370_vm2, %v623_v54  ;;  %383 = vst.msk [vmem:[%s712_s26 + $0x60] sm:$0xff] %vm370_vm2, %v355_v57  ;;  %v449_v62 = vsel %vm370_vm2, %v430_v50, 0.0  ;;  %v433_v5 = vmul.f32 %v623_v54, %v623_v54  ;;  %v400_v11 = vsel %vm370_vm2, %v623_v54, 0.0  ;;  %v438_v33 = vmul.f32 %v355_v57, %v355_v57 }
  0xe0   : > { %v395_v58 = vadd.f32 %v394_v56, %v393_v53  ;;  %v448_v59 = vadd.f32 %v447_v55, %v446_v52  ;;  %v326_v60 = vpop.f32.mrf.mxu0  ;;  %v631_v1 = vpop.f32.mrf.mxu1  ;;  %v410_v38 = vsel %vm370_vm2, %v355_v57, 0.0  ;;  %v469_v50 = vsel %vm370_vm2, %v440_v41, 0.0 }
  0xe1   : > { %376 = vst.msk [vmem:[%s712_s26 + $0x28] sm:$0xff] %vm370_vm2, %v326_v60  ;;  %v396_v63 = vsel %vm370_vm2, %v326_v60, 0.0  ;;  %v431_v0 = vmul.f32 %v326_v60, %v326_v60  ;;  %386 = vst.msk [vmem:[%s712_s26 + $0x78] sm:$0xff] %vm370_vm2, %v631_v1  ;;  %v455_v15 = vsel %vm370_vm2, %v433_v5, 0.0  ;;  %v465_v42 = vsel %vm370_vm2, %v438_v33, 0.0 }
  0xe2   : > { %v450_v2 = vadd.f32 %v449_v62, %v448_v59  ;;  %v397_v3 = vadd.f32 %v396_v63, %v395_v58  ;;  %v358_v7 = vpop.f32.mrf.mxu1  ;;  %v441_v46 = vmul.f32 %v631_v1, %v631_v1  ;;  %v416_v52 = vsel %vm370_vm2, %v631_v1, 0.0 }
  0xe3   : > { %v451_v6 = vsel %vm370_vm2, %v431_v0, 0.0  ;;  %384 = vst.msk [vmem:[%s712_s26 + $0x68] sm:$0xff] %vm370_vm2, %v358_v7  ;;  %v439_v28 = vmul.f32 %v358_v7, %v358_v7  ;;  %v412_v43 = vsel %vm370_vm2, %v358_v7, 0.0 }
  0xe4   : > { %v399_v8 = vadd.f32 %v398_v4, %v397_v3  ;;  %v452_v9 = vadd.f32 %v451_v6, %v450_v2  ;;  %v471_v55 = vsel %vm370_vm2, %v441_v46, 0.0 }
  0xe5   : > { %v467_v47 = vsel %vm370_vm2, %v439_v28, 0.0 }
  0xe6   : > { %v401_v13 = vadd.f32 %v400_v11, %v399_v8  ;;  %v454_v14 = vadd.f32 %v453_v10, %v452_v9 }
  0xe8   : > { %v456_v18 = vadd.f32 %v455_v15, %v454_v14  ;;  %v403_v19 = vadd.f32 %v402_v16, %v401_v13 }
  0xea   : > { %v405_v23 = vadd.f32 %v404_v22, %v403_v19  ;;  %v458_v24 = vadd.f32 %v457_v21, %v456_v18 }
  0xec   : > { %v407_v29 = vadd.f32 %v406_v25, %v405_v23  ;;  %v460_v30 = vadd.f32 %v459_v27, %v458_v24 }
  0xee   : > { %v462_v34 = vadd.f32 %v461_v31, %v460_v30  ;;  %v409_v35 = vadd.f32 %v408_v32, %v407_v29 }
  0xf0   : > { %v411_v39 = vadd.f32 %v410_v38, %v409_v35  ;;  %v464_v40 = vadd.f32 %v463_v36, %v462_v34 }
  0xf2   : > { %v466_v44 = vadd.f32 %v465_v42, %v464_v40  ;;  %v413_v37 = vadd.f32 %v412_v43, %v411_v39 }
  0xf4   : > { %v415_v48 = vadd.f32 %v414_v45, %v413_v37  ;;  %v468_v49 = vadd.f32 %v467_v47, %v466_v44 }
  0xf6   : > { %v417_v53 = vadd.f32 %v416_v52, %v415_v48  ;;  %v470_v54 = vadd.f32 %v469_v50, %v468_v49 }
  0xf8   : > { %v418_v56 = vrot.slane %v417_v53, 4  ;;  %v472_v57 = vadd.f32 %v471_v55, %v470_v54 }
  0xfa   : > { %v419_v58 = vadd.f32 %v418_v56, %v417_v53  ;;  %v473_v59 = vrot.slane %v472_v57, 4 }
  0xfc   : > { %v420_v51 = vrot.slane %v419_v58, 2  ;;  %v474_v60 = vadd.f32 %v473_v59, %v472_v57 }
  0xfe   : > { %v421_v61 = vadd.f32 %v420_v51, %v419_v58  ;;  %v475_v62 = vrot.slane %v474_v60, 2 }
 0x100   : > { %v422_v63 = vrot.slane %v421_v61, 1  ;;  %v476_v0 = vadd.f32 %v475_v62, %v474_v60 }
 0x102   : > { %v423_v1 = vadd.f32 %v422_v63, %v421_v61  ;;  %v477_v2 = vrot.slane %v476_v0, 1 }
 0x104   : > { %425 = vst.msk [vmem:[%s214_s29] sm:$0x1] %vm424_vm3, %v423_v1  ;;  %v478_v3 = vadd.f32 %v477_v2, %v476_v0 }
 0x106   : > { %479 = vst.msk [vmem:[%s217_s6] sm:$0x1] %vm424_vm3, %v478_v3 }
 0x107 PF: > { %s15_s15 = sadd.s32 1, %s650_s15  }
 0x108   : > { %p12_p5 = scmp.ge.s32.totalorder %s15_s15, 6  }
 0x10a   :  { %14 = sbr.rel (!%p12_p5) target bundleno = 1 (0x1), region = 82 }

// kernel: residual_block.9
= control target key start
LH: loop header
LB: loop body
LE: loop exit
PB: predicated region body
PF: predicated region fallthrough
CT: control target
= control target key end

     0   :  { %s486_s12 = smov 0   ;;  %s601_s0 = inlined_call_operand.vmem [shape: f32[512,2], index: 0, kind: input, shape index: {}]   ;;  %s602_s1 = inlined_call_operand.vmem [shape: f32[1,2], index: 1, kind: input, shape index: {}]   ;;  %s603_s2 = inlined_call_operand.vmem [shape: f32[1,2], index: 2, kind: input, shape index: {}]   ;;  %s604_s3 = inlined_call_operand.vmem [shape: bf16[512,2], index: 3, kind: output, shape index: {}]  }
   0x1 LB: > { %s405_s13 = sadd.s32 4294967295, %s464_s12   ;;  %p409_p0 = scmp.ge.s32.totalorder %s464_s12, 1  ;;  %s464_s12 = sphi %s486_s12, %s13_s12  }
   0x2   : > { %p138_p1 = scmp.lt.s32.totalorder %s464_s12, 5 }
   0x4   : > { %p139_p2 = pnand %p409_p0, %p138_p1 }
   0x5   : > { %s410_s14 = sshll.u32 (!%p139_p2), %s405_s13, 4 }
   0x6   : > { %142 = sbr.rel (%p139_p2) target bundleno = 40 (0x28), region = 32  ;;  %p163_p3 = scmp.lt.s32.totalorder (!%p139_p2), %s410_s14, 63 }
   0xb   : > { %s606_s14 = smov (!%p163_p3, %s410_s14), 63  ;;  %v500_v0 = vld [vmem:[%s602_s1] ss:$0 sm:$0xff]  ;;  %vm332_vm0 = vcmask 11264  }
   0xc   : > { %s411_s15 = sshll.u32 %s606_s14, 3  ;;  %v510_v1 = vld [vmem:[%s603_s2] ss:$0 sm:$0xff]  ;;  %s413_s23 = sshll.u32 %s606_s14, 2 }
   0xd   : > { %s505_s20 = scalar_lea.vmem %s601_s0, %s411_s15  ;;  %s540_s26 = scalar_lea.vmem %s604_s3, %s413_s23 }
   0xe   : > { %v174_v2 = vld [vmem:[%s505_s20] sm:$0xff]  ;;  %v175_v3 = vld [vmem:[%s505_s20 + $0x8] sm:$0xff]  ;;  %v176_v4 = vld [vmem:[%s505_s20 + $0x10] sm:$0xff] }
   0xf   : > { %v197_v5 = vmul.f32 %v500_v0, %v174_v2  ;;  %v198_v6 = vmul.f32 %v500_v0, %v175_v3  ;;  %v199_v7 = vmul.f32 %v500_v0, %v176_v4  ;;  %v177_v8 = vld [vmem:[%s505_s20 + $0x18] sm:$0xff]  ;;  %v178_v9 = vld [vmem:[%s505_s20 + $0x20] sm:$0xff]  ;;  %v179_v10 = vld [vmem:[%s505_s20 + $0x28] sm:$0xff] }
  0x10   : > { %v200_v11 = vmul.f32 %v500_v0, %v177_v8  ;;  %v201_v12 = vmul.f32 %v500_v0, %v178_v9  ;;  %v202_v13 = vmul.f32 %v500_v0, %v179_v10  ;;  %v180_v14 = vld [vmem:[%s505_s20 + $0x30] sm:$0xff]  ;;  %v181_v15 = vld [vmem:[%s505_s20 + $0x38] sm:$0xff]  ;;  %v182_v40 = vld [vmem:[%s505_s20 + $0x40] sm:$0xff] }
  0x11   : > { %v220_v16 = vadd.f32 %v510_v1, %v197_v5  ;;  %v221_v17 = vadd.f32 %v510_v1, %v198_v6  ;;  %v222_v18 = vadd.f32 %v510_v1, %v199_v7  ;;  %v203_v19 = vmul.f32 %v500_v0, %v180_v14  ;;  %v183_v41 = vld [vmem:[%s505_s20 + $0x48] sm:$0xff]  ;;  %v184_v42 = vld [vmem:[%s505_s20 + $0x50] sm:$0xff]  ;;  %v185_v47 = vld [vmem:[%s505_s20 + $0x58] sm:$0xff] }
  0x12   : > { %v223_v20 = vadd.f32 %v510_v1, %v200_v11  ;;  %v224_v21 = vadd.f32 %v510_v1, %v201_v12  ;;  %v225_v22 = vadd.f32 %v510_v1, %v202_v13  ;;  %v204_v23 = vmul.f32 %v500_v0, %v181_v15  ;;  %v186_v48 = vld [vmem:[%s505_s20 + $0x60] sm:$0xff]  ;;  %v187_v49 = vld [vmem:[%s505_s20 + $0x68] sm:$0xff]  ;;  %v188_v54 = vld [vmem:[%s505_s20 + $0x70] sm:$0xff] }
  0x13   : > { %v236_v24 = vmul.f32 0.1, %v220_v16  ;;  %v237_v25 = vmul.f32 0.1, %v221_v17  ;;  %v238_v26 = vmul.f32 0.1, %v222_v18  ;;  %v226_v27 = vadd.f32 %v510_v1, %v203_v19 }
  0x14   : > { %v239_v28 = vmul.f32 0.1, %v223_v20  ;;  %v240_v29 = vmul.f32 0.1, %v224_v21  ;;  %v241_v30 = vmul.f32 0.1, %v225_v22  ;;  %v227_v31 = vadd.f32 %v510_v1, %v204_v23 }
  0x15   : > { %v252_v32 = vmax.f32 %v220_v16, %v236_v24  ;;  %v253_v33 = vmax.f32 %v221_v17, %v237_v25  ;;  %v254_v34 = vmax.f32 %v222_v18, %v238_v26  ;;  %v242_v35 = vmul.f32 0.1, %v226_v27  ;;  %v189_v59 = vld [vmem:[%s505_s20 + $0x78] sm:$0xff] }
  0x16   : > { %v255_v36 = vmax.f32 %v223_v20, %v239_v28  ;;  %v256_v37 = vmax.f32 %v224_v21, %v240_v29  ;;  %v257_v38 = vmax.f32 %v225_v22, %v241_v30  ;;  %v243_v39 = vmul.f32 0.1, %v227_v31 }
  0x17   : > { %v434_v43 = vpack.c.bf16 %v252_v32, %v252_v32  ;;  %v435_v44 = vpack.c.bf16 %v253_v33, %v253_v33  ;;  %v436_v45 = vpack.c.bf16 %v254_v34, %v254_v34  ;;  %v258_v46 = vmax.f32 %v226_v27, %v242_v35 }
  0x18   : > { %v437_v50 = vpack.c.bf16 %v255_v36, %v255_v36  ;;  %v438_v51 = vpack.c.bf16 %v256_v37, %v256_v37  ;;  %v439_v52 = vpack.c.bf16 %v257_v38, %v257_v38  ;;  %v259_v53 = vmax.f32 %v227_v31, %v243_v39 }
  0x19   : > { %333 = vst.msk [vmem:[%s540_s26] sm:$0xf] %vm332_vm0, %v434_v43  ;;  %334 = vst.msk [vmem:[%s540_s26 + $0x4] sm:$0xf] %vm332_vm0, %v435_v44  ;;  %v440_v55 = vpack.c.bf16 %v258_v46, %v258_v46  ;;  %v205_v56 = vmul.f32 %v500_v0, %v182_v40  ;;  %v206_v57 = vmul.f32 %v500_v0, %v183_v41 }
  0x1a   : > { %335 = vst.msk [vmem:[%s540_s26 + $0x8] sm:$0xf] %vm332_vm0, %v436_v45  ;;  %v207_v58 = vmul.f32 %v500_v0, %v184_v42  ;;  %336 = vst.msk [vmem:[%s540_s26 + $0xc] sm:$0xf] %vm332_vm0, %v437_v50  ;;  %v441_v60 = vpack.c.bf16 %v259_v53, %v259_v53  ;;  %v208_v61 = vmul.f32 %v500_v0, %v185_v47 }
  0x1b   : > { %337 = vst.msk [vmem:[%s540_s26 + $0x10] sm:$0xf] %vm332_vm0, %v438_v51  ;;  %338 = vst.msk [vmem:[%s540_s26 + $0x14] sm:$0xf] %vm332_vm0, %v439_v52  ;;  %v209_v62 = vmul.f32 %v500_v0, %v186_v48  ;;  %v210_v63 = vmul.f32 %v500_v0, %v187_v49  ;;  %v228_v2 = vadd.f32 %v510_v1, %v205_v56 }
  0x1c   : > { %339 = vst.msk [vmem:[%s540_s26 + $0x18] sm:$0xf] %vm332_vm0, %v440_v55  ;;  %v229_v3 = vadd.f32 %v510_v1, %v206_v57  ;;  %v230_v4 = vadd.f32 %v510_v1, %v207_v58  ;;  %v211_v5 = vmul.f32 %v500_v0, %v188_v54  ;;  %340 = vst.msk [vmem:[%s540_s26 + $0x1c] sm:$0xf] %vm332_vm0, %v441_v60 }
  0x1d   : > { %v231_v6 = vadd.f32 %v510_v1, %v208_v61  ;;  %v232_v7 = vadd.f32 %v510_v1, %v209_v62  ;;  %v233_v8 = vadd.f32 %v510_v1, %v210_v63  ;;  %v212_v9 = vmul.f32 %v500_v0, %v189_v59 }
  0x1e   : > { %v244_v10 = vmul.f32 0.1, %v228_v2  ;;  %v245_v11 = vmul.f32 0.1, %v229_v3  ;;  %v246_v12 = vmul.f32 0.1, %v230_v4  ;;  %v234_v13 = vadd.f32 %v510_v1, %v211_v5 }
  0x1f   : > { %v247_v14 = vmul.f32 0.1, %v231_v6  ;;  %v248_v15 = vmul.f32 0.1, %v232_v7  ;;  %v249_v16 = vmul.f32 0.1, %v233_v8  ;;  %v235_v17 = vadd.f32 %v510_v1, %v212_v9 }
  0x20   : > { %v260_v18 = vmax.f32 %v228_v2, %v244_v10  ;;  %v261_v19 = vmax.f32 %v229_v3, %v245_v11  ;;  %v262_v20 = vmax.f32 %v230_v4, %v246_v12  ;;  %v250_v21 = vmul.f32 0.1, %v234_v13 }
  0x21   : > { %v263_v22 = vmax.f32 %v231_v6, %v247_v14  ;;  %v264_v0 = vmax.f32 %v232_v7, %v248_v15  ;;  %v265_v23 = vmax.f32 %v233_v8, %v249_v16  ;;  %v251_v24 = vmul.f32 0.1, %v235_v17 }
  0x22   : > { %v442_v25 = vpack.c.bf16 %v260_v18, %v260_v18  ;;  %v443_v26 = vpack.c.bf16 %v261_v19, %v261_v19  ;;  %v444_v27 = vpack.c.bf16 %v262_v20, %v262_v20  ;;  %v266_v1 = vmax.f32 %v234_v13, %v250_v21 }
  0x23   : > { %v445_v28 = vpack.c.bf16 %v263_v22, %v263_v22  ;;  %v446_v29 = vpack.c.bf16 %v264_v0, %v264_v0  ;;  %v447_v30 = vpack.c.bf16 %v265_v23, %v265_v23  ;;  %v267_v31 = vmax.f32 %v235_v17, %v251_v24 }
  0x24   : > { %341 = vst.msk [vmem:[%s540_s26 + $0x20] sm:$0xf] %vm332_vm0, %v442_v25  ;;  %342 = vst.msk [vmem:[%s540_s26 + $0x24] sm:$0xf] %vm332_vm0, %v443_v26  ;;  %v448_v32 = vpack.c.bf16 %v266_v1, %v266_v1 }
  0x25   : > { %343 = vst.msk [vmem:[%s540_s26 + $0x28] sm:$0xf] %vm332_vm0, %v444_v27  ;;  %344 = vst.msk [vmem:[%s540_s26 + $0x2c] sm:$0xf] %vm332_vm0, %v445_v28  ;;  %v449_v33 = vpack.c.bf16 %v267_v31, %v267_v31 }
  0x26   : > { %345 = vst.msk [vmem:[%s540_s26 + $0x30] sm:$0xf] %vm332_vm0, %v446_v29  ;;  %346 = vst.msk [vmem:[%s540_s26 + $0x34] sm:$0xf] %vm332_vm0, %v447_v30 }
  0x27   : > { %347 = vst.msk [vmem:[%s540_s26 + $0x38] sm:$0xf] %vm332_vm0, %v448_v32  ;;  %348 = vst.msk [vmem:[%s540_s26 + $0x3c] sm:$0xf] %vm332_vm0, %v449_v33 }
  0x28 PF: > { %s13_s12 = sadd.s32 1, %s464_s12  }
  0x29   : > { %p10_p4 = scmp.ge.s32.totalorder %s13_s12, 6  }
  0x2b   :  { %12 = sbr.rel (!%p10_p4) target bundleno = 1 (0x1), region = 62 }

// kernel: residual_block.11
= control target key start
LH: loop header
LB: loop body
LE: loop exit
PB: predicated region body
PF: predicated region fallthrough
CT: control target
= control target key end

     0   :  { %s490_s15 = smov 0   ;;  %s627_s0 = inlined_call_operand.vmem [shape: f32[512,4], index: 0, kind: input, shape index: {}]   ;;  %s628_s1 = inlined_call_operand.vmem [shape: f32[1,4], index: 1, kind: input, shape index: {}]   ;;  %s629_s2 = inlined_call_operand.vmem [shape: f32[1,4], index: 2, kind: input, shape index: {}]   ;;  %s630_s3 = inlined_call_operand.vmem [shape: f32[512,4], index: 3, kind: input, shape index: {}]   ;;  %s631_s4 = inlined_call_operand.vmem [shape: f32[512,4], index: 4, kind: output, shape index: {}]  }
   0x1 LB: > { %s434_s16 = sadd.s32 4294967295, %s463_s15   ;;  %p438_p0 = scmp.ge.s32.totalorder %s463_s15, 1  ;;  %s463_s15 = sphi %s490_s15, %s14_s15  }
   0x2   : > { %p174_p1 = scmp.lt.s32.totalorder %s463_s15, 5 }
   0x4   : > { %p175_p2 = pnand %p438_p0, %p174_p1 }
   0x5   : > { %s439_s17 = sshll.u32 (!%p175_p2), %s434_s16, 4 }
   0x6   : > { %178 = sbr.rel (%p175_p2) target bundleno = 41 (0x29), region = 36  ;;  %p206_p3 = scmp.lt.s32.totalorder (!%p175_p2), %s439_s17, 63 }
   0xb   : > { %s633_s17 = smov (!%p206_p3, %s439_s17), 63  ;;  %v503_v0 = vld [vmem:[%s628_s1] ss:$0 sm:$0xff]  ;;  %vm349_vm0 = vcmask 31744  }
   0xc   : > { %s498_s18 = sshll.u32 %s633_s17, 3  ;;  %v515_v2 = vld [vmem:[%s629_s2] ss:$0 sm:$0xff] }
   0xd   : > { %s509_s23 = scalar_lea.vmem %s627_s0, %s498_s18  ;;  %s528_s28 = scalar_lea.vmem %s630_s3, %s498_s18 }
   0xe   : > { %v223_v1 = vld [vmem:[%s509_s23] sm:$0xff]  ;;  %v224_v3 = vld [vmem:[%s509_s23 + $0x8] sm:$0xff]  ;;  %v225_v6 = vld [vmem:[%s509_s23 + $0x10] sm:$0xff]  ;;  %s552_s5 = scalar_lea.vmem %s631_s4, %s498_s18 }
   0xf   : > { %v246_v4 = vmul.f32 %v503_v0, %v223_v1  ;;  %v247_v5 = vmul.f32 %v503_v0, %v224_v3  ;;  %v248_v7 = vmul.f32 %v503_v0, %v225_v6  ;;  %v226_v8 = vld [vmem:[%s509_s23 + $0x18] sm:$0xff]  ;;  %v227_v9 = vld [vmem:[%s509_s23 + $0x20] sm:$0xff]  ;;  %v228_v14 = vld [vmem:[%s509_s23 + $0x28] sm:$0xff] }
  0x10   : > { %v249_v12 = vmul.f32 %v503_v0, %v226_v8  ;;  %v250_v13 = vmul.f32 %v503_v0, %v227_v9  ;;  %v251_v16 = vmul.f32 %v503_v0, %v228_v14  ;;  %v229_v17 = vld [vmem:[%s509_s23 + $0x30] sm:$0xff]  ;;  %v230_v18 = vld [vmem:[%s509_s23 + $0x38] sm:$0xff]  ;;  %v317_v23 = vld [vmem:[%s528_s28] sm:$0xff] }
  0x11   : > { %v269_v10 = vadd.f32 %v515_v2, %v246_v4  ;;  %v270_v11 = vadd.f32 %v515_v2, %v247_v5  ;;  %v271_v15 = vadd.f32 %v515_v2, %v248_v7  ;;  %v318_v24 = vld [vmem:[%s528_s28 + $0x8] sm:$0xff]  ;;  %v252_v27 = vmul.f32 %v503_v0, %v229_v17  ;;  %v319_v31 = vld [vmem:[%s528_s28 + $0x10] sm:$0xff]  ;;  %v320_v33 = vld [vmem:[%s528_s28 + $0x18] sm:$0xff] }
  0x12   : > { %v272_v21 = vadd.f32 %v515_v2, %v249_v12  ;;  %v273_v22 = vadd.f32 %v515_v2, %v250_v13  ;;  %v274_v26 = vadd.f32 %v515_v2, %v251_v16  ;;  %v253_v28 = vmul.f32 %v503_v0, %v230_v18  ;;  %v321_v36 = vld [vmem:[%s528_s28 + $0x20] sm:$0xff]  ;;  %v232_v41 = vld [vmem:[%s509_s23 + $0x48] sm:$0xff]  ;;  %v233_v47 = vld [vmem:[%s509_s23 + $0x50] sm:$0xff] }
  0x13   : > { %v285_v19 = vmul.f32 0.1, %v269_v10  ;;  %v286_v20 = vmul.f32 0.1, %v270_v11  ;;  %v287_v25 = vmul.f32 0.1, %v271_v15  ;;  %v275_v38 = vadd.f32 %v515_v2, %v252_v27 }
  0x14   : > { %v288_v32 = vmul.f32 0.1, %v272_v21  ;;  %v289_v34 = vmul.f32 0.1, %v273_v22  ;;  %v290_v37 = vmul.f32 0.1, %v274_v26  ;;  %v276_v39 = vadd.f32 %v515_v2, %v253_v28 }
  0x15   : > { %v301_v29 = vmax.f32 %v269_v10, %v285_v19  ;;  %v302_v30 = vmax.f32 %v270_v11, %v286_v20  ;;  %v303_v35 = vmax.f32 %v271_v15, %v287_v25  ;;  %v231_v40 = vld [vmem:[%s509_s23 + $0x40] sm:$0xff]  ;;  %v322_v46 = vld [vmem:[%s528_s28 + $0x28] sm:$0xff]  ;;  %v291_v50 = vmul.f32 0.1, %v275_v38  ;;  %v234_v52 = vld [vmem:[%s509_s23 + $0x58] sm:$0xff] }
  0x16   : > { %v304_v44 = vmax.f32 %v272_v21, %v288_v32  ;;  %v305_v45 = vmax.f32 %v273_v22, %v289_v34  ;;  %v306_v49 = vmax.f32 %v274_v26, %v290_v37  ;;  %v292_v51 = vmul.f32 0.1, %v276_v39  ;;  %v235_v53 = vld [vmem:[%s509_s23 + $0x60] sm:$0xff]  ;;  %v323_v56 = vld [vmem:[%s528_s28 + $0x30] sm:$0xff]  ;;  %v324_v57 = vld [vmem:[%s528_s28 + $0x38] sm:$0xff] }
  0x17   : > { %v333_v42 = vadd.f32 %v317_v23, %v301_v29  ;;  %v334_v43 = vadd.f32 %v318_v24, %v302_v30  ;;  %v335_v48 = vadd.f32 %v319_v31, %v303_v35  ;;  %v254_v58 = vmul.f32 %v503_v0, %v231_v40  ;;  %v236_v60 = vld [vmem:[%s509_s23 + $0x68] sm:$0xff]  ;;  %v237_v7 = vld [vmem:[%s509_s23 + $0x70] sm:$0xff]  ;;  %v238_v8 = vld [vmem:[%s509_s23 + $0x78] sm:$0xff] }
  0x18   : > { %v336_v54 = vadd.f32 %v320_v33, %v304_v44  ;;  %v337_v55 = vadd.f32 %v321_v36, %v305_v45  ;;  %v255_v59 = vmul.f32 %v503_v0, %v232_v41  ;;  %v338_v61 = vadd.f32 %v322_v46, %v306_v49  ;;  %v325_v17 = vld [vmem:[%s528_s28 + $0x40] sm:$0xff]  ;;  %v326_v18 = vld [vmem:[%s528_s28 + $0x48] sm:$0xff]  ;;  %v327_v25 = vld [vmem:[%s528_s28 + $0x50] sm:$0xff] }
  0x19   : > { %350 = vst.msk [vmem:[%s552_s5] sm:$0xff] %vm349_vm0, %v333_v42  ;;  %351 = vst.msk [vmem:[%s552_s5 + $0x8] sm:$0xff] %vm349_vm0, %v334_v43  ;;  %v307_v62 = vmax.f32 %v275_v38, %v291_v50  ;;  %v308_v63 = vmax.f32 %v276_v39, %v292_v51  ;;  %v256_v1 = vmul.f32 %v503_v0, %v233_v47  ;;  %v328_v29 = vld [vmem:[%s528_s28 + $0x58] sm:$0xff]  ;;  %v329_v30 = vld [vmem:[%s528_s28 + $0x60] sm:$0xff] }
  0x1a   : > { %352 = vst.msk [vmem:[%s552_s5 + $0x10] sm:$0xff] %vm349_vm0, %v335_v48  ;;  %353 = vst.msk [vmem:[%s552_s5 + $0x18] sm:$0xff] %vm349_vm0, %v336_v54  ;;  %v277_v3 = vadd.f32 %v515_v2, %v254_v58  ;;  %v278_v4 = vadd.f32 %v515_v2, %v255_v59  ;;  %v257_v5 = vmul.f32 %v503_v0, %v234_v52  ;;  %v330_v37 = vld [vmem:[%s528_s28 + $0x68] sm:$0xff]  ;;  %v331_v43 = vld [vmem:[%s528_s28 + $0x70] sm:$0xff] }
  0x1b   : > { %354 = vst.msk [vmem:[%s552_s5 + $0x20] sm:$0xff] %vm349_vm0, %v337_v55  ;;  %v258_v6 = vmul.f32 %v503_v0, %v235_v53  ;;  %355 = vst.msk [vmem:[%s552_s5 + $0x28] sm:$0xff] %vm349_vm0, %v338_v61  ;;  %v339_v9 = vadd.f32 %v323_v56, %v307_v62  ;;  %v340_v10 = vadd.f32 %v324_v57, %v308_v63  ;;  %v332_v44 = vld [vmem:[%s528_s28 + $0x78] sm:$0xff] }
  0x1c   : > { %v279_v11 = vadd.f32 %v515_v2, %v256_v1  ;;  %v259_v12 = vmul.f32 %v503_v0, %v236_v60  ;;  %v293_v13 = vmul.f32 0.1, %v277_v3  ;;  %v294_v14 = vmul.f32 0.1, %v278_v4 }
  0x1d   : > { %v280_v15 = vadd.f32 %v515_v2, %v257_v5  ;;  %v281_v16 = vadd.f32 %v515_v2, %v258_v6  ;;  %356 = vst.msk [vmem:[%s552_s5 + $0x30] sm:$0xff] %vm349_vm0, %v339_v9  ;;  %357 = vst.msk [vmem:[%s552_s5 + $0x38] sm:$0xff] %vm349_vm0, %v340_v10  ;;  %v260_v21 = vmul.f32 %v503_v0, %v237_v7 }
  0x1e   : > { %v295_v19 = vmul.f32 0.1, %v279_v11  ;;  %v282_v20 = vadd.f32 %v515_v2, %v259_v12  ;;  %v261_v22 = vmul.f32 %v503_v0, %v238_v8  ;;  %v309_v23 = vmax.f32 %v277_v3, %v293_v13 }
  0x1f   : > { %v310_v24 = vmax.f32 %v278_v4, %v294_v14  ;;  %v296_v26 = vmul.f32 0.1, %v280_v15  ;;  %v297_v27 = vmul.f32 0.1, %v281_v16  ;;  %v283_v32 = vadd.f32 %v515_v2, %v260_v21 }
  0x20   : > { %v311_v28 = vmax.f32 %v279_v11, %v295_v19  ;;  %v298_v31 = vmul.f32 0.1, %v282_v20  ;;  %v284_v33 = vadd.f32 %v515_v2, %v261_v22  ;;  %v341_v0 = vadd.f32 %v325_v17, %v309_v23 }
  0x21   : > { %v342_v34 = vadd.f32 %v326_v18, %v310_v24  ;;  %v312_v35 = vmax.f32 %v280_v15, %v296_v26  ;;  %v313_v36 = vmax.f32 %v281_v16, %v297_v27  ;;  %v299_v40 = vmul.f32 0.1, %v283_v32 }
  0x22   : > { %v343_v38 = vadd.f32 %v327_v25, %v311_v28  ;;  %v314_v39 = vmax.f32 %v282_v20, %v298_v31  ;;  %v300_v41 = vmul.f32 0.1, %v284_v33  ;;  %358 = vst.msk [vmem:[%s552_s5 + $0x40] sm:$0xff] %vm349_vm0, %v341_v0 }
  0x23   : > { %359 = vst.msk [vmem:[%s552_s5 + $0x48] sm:$0xff] %vm349_vm0, %v342_v34  ;;  %v344_v2 = vadd.f32 %v328_v29, %v312_v35  ;;  %v345_v42 = vadd.f32 %v329_v30, %v313_v36  ;;  %v315_v46 = vmax.f32 %v283_v32, %v299_v40 }
  0x24   : > { %360 = vst.msk [vmem:[%s552_s5 + $0x50] sm:$0xff] %vm349_vm0, %v343_v38  ;;  %v346_v45 = vadd.f32 %v330_v37, %v314_v39  ;;  %v316_v47 = vmax.f32 %v284_v33, %v300_v41 }
  0x25   : > { %361 = vst.msk [vmem:[%s552_s5 + $0x58] sm:$0xff] %vm349_vm0, %v344_v2  ;;  %362 = vst.msk [vmem:[%s552_s5 + $0x60] sm:$0xff] %vm349_vm0, %v345_v42  ;;  %v347_v48 = vadd.f32 %v331_v43, %v315_v46 }
  0x26   : > { %363 = vst.msk [vmem:[%s552_s5 + $0x68] sm:$0xff] %vm349_vm0, %v346_v45  ;;  %v348_v49 = vadd.f32 %v332_v44, %v316_v47 }
  0x27   : > { %364 = vst.msk [vmem:[%s552_s5 + $0x70] sm:$0xff] %vm349_vm0, %v347_v48 }
  0x28   : > { %365 = vst.msk [vmem:[%s552_s5 + $0x78] sm:$0xff] %vm349_vm0, %v348_v49 }
  0x29 PF: > { %s14_s15 = sadd.s32 1, %s463_s15  }
  0x2a   : > { %p11_p4 = scmp.ge.s32.totalorder %s14_s15, 6  }
  0x2c   :  { %13 = sbr.rel (!%p11_p4) target bundleno = 1 (0x1), region = 69 }

// kernel: residual_block.10
= control target key start
LH: loop header
LB: loop body
LE: loop exit
PB: predicated region body
PF: predicated region fallthrough
CT: control target
= control target key end

     0   :  { %s3593_s15 = smov 0   ;;  %s5098_s0 = inlined_call_operand.vmem [shape: bf16[2,18,18,2], index: 0, kind: input, shape index: {}]   ;;  %s5099_s1 = inlined_call_operand.vmem [shape: bf16[9,2,4], index: 1, kind: input, shape index: {}]   ;;  %s5100_s2 = inlined_call_operand.vmem [shape: f32[512,4], index: 2, kind: output, shape index: {0}]   ;;  %s5101_s3 = inlined_call_operand.vmem [shape: f32[2,1,4], index: 3, kind: output, shape index: {1}]   ;;  %s5102_s4 = inlined_call_operand.vmem [shape: f32[2,1,4], index: 4, kind: output, shape index: {2}]  }
   0x1 LB: > { %s3599_s16 = sadd.s32 4294967295, %s3566_s15   ;;  %p2876_p0 = scmp.ge.s32.totalorder %s3566_s15, 1  ;;  %s3566_s15 = sphi %s3593_s15, %s15_s15  }
   0x2   : > { %p167_p1 = scmp.lt.s32.totalorder %s3566_s15, 3 }
   0x4   : > { %p168_p2 = pnand %p2876_p0, %p167_p1 }
   0x6   : > { %171 = sbr.rel (%p168_p2) target bundleno = 541 (0x21d), region = 28 }
   0xb   : > { %v326_v0 = vld [vmem:[%s5099_s1 + $0x1] sm:$0x1]  ;;  %vm576_vm0 = vcmask 1040384   ;;  %p199_p3 = scmp.lt.s32.totalorder %s3599_s16, 1  ;;  %v325_v2 = vld [vmem:[%s5099_s1] sm:$0x1] }
   0xc   : > { %3506 = vmatprep.subr.msk.bf16.mxu1 %vm576_vm0, %v326_v0  ;;  %3505 = vmatprep.subr.msk.bf16.mxu0 %vm576_vm0, %v326_v0  ;;  %v578_v1 = vsel %vm576_vm0, %v326_v0, 0  ;;  %v327_v3 = vld [vmem:[%s5099_s1 + $0x2] sm:$0x1]  ;;  %vm398_vm1 = vcmask 1046528   ;;  %vm527_vm2 = vcmask 15360   ;;  %v3650_v17 = vsel %vm576_vm0, %v325_v2, 0 }
   0xd   : > { %3504 = vmatpush3.bf16.msra.mxu1 %v578_v1  ;;  %3198 = vmatpush3.bf16.msra.mxu0 %v578_v1  ;;  %s3617_s23 = scalar_select %p199_p3, %s3599_s16, 1  ;;  %v1131_v25 = vsel %vm576_vm0, %v327_v3, 0  ;;  %v3720_v60 = vld [vmem:[%s5099_s1 + $0x4] sm:$0x1]  ;;  %vm953_vm3 = vcmask 1045504   ;;  %vm2560_vm4 = vcmask 31744  }
   0xe   : > { %3507 = vmatprep.subr.msk.bf16.mxu1 %vm576_vm0, %v325_v2  ;;  %3508 = vmatprep.subr.msk.bf16.mxu0 %vm576_vm0, %v327_v3  ;;  %s2878_s14 = sshll.u32 %s3599_s16, 5  ;;  %vm2662_vm5 = vcmask 24576  }
   0xf   : > { %s3515_s24 = smul.u32 216, %s3617_s23  ;;  %p205_p4 = scmp.lt.s32.totalorder %s2878_s14, 63 }
  0x10   : > { %s212_s22 = scalar_lea.vmem %s5101_s3, %s3617_s23  ;;  %s215_s26 = scalar_lea.vmem %s5102_s4, %s3617_s23 }
  0x11   : > { %s3625_s27 = scalar_lea.vmem %s5098_s0, %s3515_s24  ;;  %s5293_s14 = smov (!%p205_p4, %s2878_s14), 63 }
  0x12   : > { %v3628_v4 = vld [vmem:[%s3625_s27] sm:$0xff]   ;;  %v219_v5 = vld [vmem:[%s3625_s27 + $0x8] sm:$0x1]  ;;  %v3641_v12 = vld [vmem:[%s3625_s27 + $0xc] sm:$0xff]   ;;  %s2879_s16 = sshll.u32 %s5293_s14, 3 }
  0x13   : > { %v3632_v6 = vld [vmem:[%s3625_s27 + $0x60] sm:$0xff]   ;;  %v271_v7 = vunpack.c.l.bf16 %v3628_v4  ;;  %v272_v8 = vunpack.c.h.bf16 %v3628_v4  ;;  %v273_v9 = vunpack.c.l.bf16 %v219_v5  ;;  %v3637_v10 = vld [vmem:[%s3625_s27 + $0x68] sm:$0x1]  ;;  %v3646_v15 = vld [vmem:[%s3625_s27 + $0x14] sm:$0x1]  ;;  %v274_v16 = vunpack.c.l.bf16 %v3641_v12  ;;  %s4830_s19 = scalar_lea.vmem %s5100_s2, %s2879_s16 }
  0x14   : > { %v5117_v11 = vunpack.c.l.bf16 %v3632_v6  ;;  %v5116_v13 = vunpack.c.h.bf16 %v3632_v6  ;;  %v5115_v14 = vunpack.c.l.bf16 %v3637_v10  ;;  %v275_v21 = vunpack.c.h.bf16 %v3641_v12  ;;  %v3666_v30 = vld [vmem:[%s3625_s27 + $0x6c] sm:$0xff]   ;;  %v3672_v35 = vld [vmem:[%s3625_s27 + $0x74] sm:$0x1]  ;;  %v3680_v40 = vld [vmem:[%s3625_s27 + $0x18] sm:$0xff]  }
  0x15   : > { %v399_v18 = vrot.slane %v271_v7, 1  ;;  %v400_v19 = vrot.slane %v272_v8, 1  ;;  %v402_v20 = vrot.slane %v273_v9, 1  ;;  %v3653_v22 = vrot.slane %v271_v7, 2  ;;  %v3691_v45 = vld [vmem:[%s3625_s27 + $0x20] sm:$0x1] }
  0x16   : > { %v439_v23 = vrot.slane %v5117_v11, 1  ;;  %v440_v24 = vrot.slane %v5116_v13, 1  ;;  %v442_v28 = vrot.slane %v5115_v14, 1  ;;  %v5137_v29 = vunpack.c.l.bf16 %v3646_v15  ;;  %v3694_v46 = vld [vmem:[%s3625_s27 + $0x78] sm:$0xff]   ;;  %v3701_v51 = vld [vmem:[%s3625_s27 + $0x80] sm:$0x1] }
  0x17   : > { %v401_v26 = vsel %vm398_vm1, %v399_v18, %v400_v19  ;;  %v403_v27 = vsel %vm398_vm1, %v400_v19, %v402_v20  ;;  %v3668_v32 = vrot.slane %v272_v8, 2  ;;  %v404_v34 = vrot.slane %v274_v16, 1  ;;  %v3731_v1 = vld [vmem:[%s3625_s27 + $0x24] sm:$0xff]   ;;  %v3734_v2 = vld [vmem:[%s3625_s27 + $0x2c] sm:$0x1] }
  0x18   : > { %v511_v31 = vpack.c.bf16 %v403_v27, %v401_v26  ;;  %v441_v33 = vsel %vm398_vm1, %v439_v23, %v440_v24  ;;  %v3674_v36 = vrot.slane %v273_v9, 2  ;;  %v443_v37 = vsel %vm398_vm1, %v440_v24, %v442_v28  ;;  %v3743_v9 = vld [vmem:[%s3625_s27 + $0x84] sm:$0xff]   ;;  %v3759_v26 = vld [vmem:[%s3625_s27 + $0x8c] sm:$0x1]  ;;  %v3762_v27 = vld [vmem:[%s3625_s27 + $0x30] sm:$0xff]  }
  0x19   : > { %v405_v38 = vrot.slane %v275_v21, 1  ;;  %v407_v39 = vrot.slane %v5137_v29, 1  ;;  %v3683_v41 = vpack.c.bf16 %v443_v37, %v441_v33  ;;  %v3685_v42 = vrot.slane %v274_v16, 2  ;;  %v3767_v28 = vld [vmem:[%s5099_s1 + $0x3] sm:$0x1]  ;;  %v3875_v11 = vld [vmem:[%s3625_s27 + $0xa8] sm:$0xff]  }
  0x1a   : > { %3199 = vmatprep.mubr.msk.bf16.mxu0 %vm527_vm2, %v511_v31  ;;  %v3687_v43 = vrot.slane %v275_v21, 2  ;;  %v5111_v44 = vunpack.c.l.bf16 %v3666_v30  ;;  %v5110_v49 = vunpack.c.h.bf16 %v3666_v30  ;;  %v5109_v50 = vunpack.c.l.bf16 %v3672_v35  ;;  %v3872_v13 = vld [vmem:[%s3625_s27 + $0x50] sm:$0x1] }
  0x1b   : > { %v406_v47 = vsel %vm398_vm1, %v404_v34, %v405_v38  ;;  %v408_v48 = vsel %vm398_vm1, %v405_v38, %v407_v39  ;;  %3215 = vmatprep.mubr.msk.bf16.mxu1 %vm527_vm2, %v3683_v41  ;;  %v5136_v54 = vunpack.c.l.bf16 %v3680_v40  ;;  %v5134_v55 = vunpack.c.h.bf16 %v3680_v40  ;;  %v3777_v38 = vld [vmem:[%s3625_s27 + $0x38] sm:$0x1] }
  0x1c   : > { %v3705_v52 = vpack.c.bf16 %v408_v48, %v406_v47  ;;  %v444_v53 = vrot.slane %v5111_v44, 1  ;;  %v445_v56 = vrot.slane %v5110_v49, 1  ;;  %v447_v57 = vrot.slane %v5109_v50, 1  ;;  %v3845_v44 = vld [vmem:[%s3625_s27 + $0xa4] sm:$0x1] }
  0x1d   : > { %v5130_v58 = vunpack.c.l.bf16 %v3691_v45  ;;  %v5105_v59 = vunpack.c.l.bf16 %v3694_v46  ;;  %v409_v61 = vrot.slane %v5136_v54, 1  ;;  %v410_v62 = vrot.slane %v5134_v55, 1  ;;  %v3937_v55 = vld [vmem:[%s3625_s27 + $0xbc] sm:$0x1] }
  0x1e   : > { %3200 = vmatmul.mubr.msk.bf16.vlgmr.msra.gmra.mxu0 %vm527_vm2, %v3705_v52  ;;  %v5104_v63 = vunpack.c.h.bf16 %v3694_v46  ;;  %v5103_v0 = vunpack.c.l.bf16 %v3701_v51  ;;  %v446_v3 = vsel %vm398_vm1, %v444_v53, %v445_v56  ;;  %v448_v5 = vsel %vm398_vm1, %v445_v56, %v447_v57 }
  0x1f   : > { %3266 = vmatpush3.bf16.msra.mxu0 %v1131_v25  ;;  %v412_v7 = vrot.slane %v5130_v58, 1  ;;  %v449_v8 = vrot.slane %v5105_v59, 1  ;;  %v3745_v16 = vpack.c.bf16 %v448_v5, %v446_v3  ;;  %v411_v18 = vsel %vm398_vm1, %v409_v61, %v410_v62  ;;  %v3832_v59 = vld [vmem:[%s3625_s27 + $0x44] sm:$0x1]  ;;  %v3910_v58 = vld [vmem:[%s3625_s27 + $0x5c] sm:$0x1] }
  0x20   : > { %v450_v19 = vrot.slane %v5104_v63, 1  ;;  %v452_v20 = vrot.slane %v5103_v0, 1  ;;  %3510 = vmatprep.subr.msk.bf16.mxu0 %vm576_vm0, %v3720_v60  ;;  %v5129_v23 = vunpack.c.l.bf16 %v3731_v1  ;;  %v5128_v24 = vunpack.c.h.bf16 %v3731_v1 }
  0x21   : > { %v413_v21 = vsel %vm398_vm1, %v410_v62, %v412_v7  ;;  %v5127_v25 = vunpack.c.l.bf16 %v3734_v2  ;;  %3216 = vmatmul.mubr.msk.bf16.vlgmr.msra.gmra.mxu1 %vm527_vm2, %v3745_v16  ;;  %v5108_v37 = vunpack.c.l.bf16 %v3743_v9  ;;  %v5107_v56 = vunpack.c.h.bf16 %v3743_v9  ;;  %v3796_v62 = vld [vmem:[%s3625_s27 + $0x90] sm:$0xff]  }
  0x22   : > { %v3771_v31 = vpack.c.bf16 %v413_v21, %v411_v18  ;;  %v451_v33 = vsel %vm398_vm1, %v449_v8, %v450_v19  ;;  %v453_v34 = vsel %vm398_vm1, %v450_v19, %v452_v20  ;;  %3232 = vmatpush3.bf16.msra.mxu1 %v3650_v17  ;;  %v414_v47 = vrot.slane %v5129_v23, 1  ;;  %v3807_v18 = vld [vmem:[%s3625_s27 + $0x98] sm:$0x1]  ;;  %v3810_v19 = vld [vmem:[%s3625_s27 + $0x3c] sm:$0xff]  }
  0x23   : > { %v3780_v39 = vpack.c.bf16 %v453_v34, %v451_v33  ;;  %v415_v48 = vrot.slane %v5128_v24, 1  ;;  %v417_v53 = vrot.slane %v5127_v25, 1  ;;  %v5106_v17 = vunpack.c.l.bf16 %v3759_v26  ;;  %3509 = vmatprep.subr.msk.bf16.mxu1 %vm576_vm0, %v3767_v28 }
  0x24   : > { %3203 = vmatprep.mubr.msk.bf16.mxu0 %vm527_vm2, %v3771_v31  ;;  %v454_v57 = vrot.slane %v5108_v37, 1  ;;  %v5125_v61 = vunpack.c.l.bf16 %v3762_v27  ;;  %v5121_v7 = vunpack.c.h.bf16 %v3762_v27  ;;  %v5119_v8 = vunpack.c.l.bf16 %v3777_v38 }
  0x25   : > { %3219 = vmatprep.mubr.msk.bf16.mxu1 %vm527_vm2, %v3780_v39  ;;  %v416_v3 = vsel %vm398_vm1, %v414_v47, %v415_v48  ;;  %v418_v5 = vsel %vm398_vm1, %v415_v48, %v417_v53  ;;  %v455_v21 = vrot.slane %v5107_v56, 1  ;;  %v457_v33 = vrot.slane %v5106_v17, 1  ;;  %v3836_v56 = vld [vmem:[%s3625_s27 + $0x9c] sm:$0xff]  }
  0x26   : > { %v3812_v20 = vpack.c.bf16 %v418_v5, %v416_v3  ;;  %v419_v34 = vrot.slane %v5125_v61, 1  ;;  %v420_v47 = vrot.slane %v5121_v7, 1  ;;  %v422_v48 = vrot.slane %v5119_v8, 1  ;;  %v3900_v61 = vld [vmem:[%s3625_s27 + $0x54] sm:$0xff]  }
  0x27   : > { %v5114_v53 = vunpack.c.l.bf16 %v3796_v62  ;;  %v5113_v3 = vunpack.c.h.bf16 %v3796_v62  ;;  %v456_v5 = vsel %vm398_vm1, %v454_v57, %v455_v21  ;;  %v458_v0 = vsel %vm398_vm1, %v455_v21, %v457_v33 }
  0x28   : > { %3204 = vmatmul.mubr.msk.bf16.gmra.mxu0 %vm527_vm2, %v3812_v20  ;;  %v5112_v63 = vunpack.c.l.bf16 %v3807_v18  ;;  %v5118_v17 = vunpack.c.l.bf16 %v3810_v19  ;;  %v3838_v37 = vpack.c.bf16 %v458_v0, %v456_v5  ;;  %v421_v50 = vsel %vm398_vm1, %v419_v34, %v420_v47 }
  0x29   : > { %v423_v49 = vsel %vm398_vm1, %v420_v47, %v422_v48  ;;  %v459_v57 = vrot.slane %v5114_v53, 1  ;;  %v460_v33 = vrot.slane %v5113_v3, 1  ;;  %v5120_v5 = vunpack.c.h.bf16 %v3810_v19  ;;  %v3862_v48 = vld [vmem:[%s3625_s27 + $0x48] sm:$0xff]  }
  0x2a   : > { %v3847_v21 = vpack.c.bf16 %v423_v49, %v421_v50  ;;  %v462_v0 = vrot.slane %v5112_v63, 1  ;;  %3220 = vmatmul.mubr.msk.bf16.gmra.mxu1 %vm527_vm2, %v3838_v37  ;;  %v5124_v34 = vunpack.c.l.bf16 %v3832_v59  ;;  %v424_v47 = vrot.slane %v5118_v17, 1 }
  0x2b   : > { %v5122_v49 = vunpack.c.l.bf16 %v3836_v56  ;;  %v5123_v50 = vunpack.c.h.bf16 %v3836_v56  ;;  %v461_v63 = vsel %vm398_vm1, %v459_v57, %v460_v33  ;;  %v425_v53 = vrot.slane %v5120_v5, 1 }
  0x2c   : > { %3207 = vmatprep.mubr.msk.bf16.mxu0 %vm527_vm2, %v3847_v21  ;;  %v463_v3 = vsel %vm398_vm1, %v460_v33, %v462_v0  ;;  %v5126_v14 = vunpack.c.l.bf16 %v3845_v44  ;;  %v427_v8 = vrot.slane %v5124_v34, 1  ;;  %v5133_v7 = vunpack.c.l.bf16 %v3862_v48 }
  0x2d   : > { %v3877_v17 = vpack.c.bf16 %v463_v3, %v461_v63  ;;  %v464_v57 = vrot.slane %v5122_v49, 1  ;;  %v465_v33 = vrot.slane %v5123_v50, 1  ;;  %v426_v0 = vsel %vm398_vm1, %v424_v47, %v425_v53  ;;  %v3891_v3 = vld [vmem:[%s3625_s27 + $0xb0] sm:$0x1] }
  0x2e   : > { %v467_v5 = vrot.slane %v5126_v14, 1  ;;  %v5132_v63 = vunpack.c.h.bf16 %v3862_v48  ;;  %v428_v49 = vsel %vm398_vm1, %v425_v53, %v427_v8  ;;  %v5131_v34 = vunpack.c.l.bf16 %v3872_v13 }
  0x2f   : > { %3223 = vmatprep.mubr.msk.bf16.mxu1 %vm527_vm2, %v3877_v17  ;;  %v466_v50 = vsel %vm398_vm1, %v464_v57, %v465_v33  ;;  %v5135_v47 = vunpack.c.l.bf16 %v3875_v11  ;;  %v3902_v14 = vpack.c.bf16 %v428_v49, %v426_v0  ;;  %v429_v24 = vrot.slane %v5133_v7, 1  ;;  %v3919_v0 = vld [vmem:[%s3625_s27 + $0xb4] sm:$0xff]  }
  0x30   : > { %v468_v25 = vsel %vm398_vm1, %v465_v33, %v467_v5  ;;  %v430_v23 = vrot.slane %v5132_v63, 1  ;;  %v432_v53 = vrot.slane %v5131_v34, 1  ;;  %v5138_v57 = vunpack.c.h.bf16 %v3875_v11 }
  0x31   : > { %v3912_v8 = vpack.c.bf16 %v468_v25, %v466_v50  ;;  %v5139_v49 = vunpack.c.l.bf16 %v3891_v3  ;;  %3208 = vmatmul.mubr.msk.bf16.gmra.mxu0 %vm527_vm2, %v3902_v14  ;;  %v469_v33 = vrot.slane %v5135_v47, 1  ;;  %v5143_v25 = vunpack.c.l.bf16 %v3900_v61 }
  0x32   : > { %v431_v5 = vsel %vm398_vm1, %v429_v24, %v430_v23  ;;  %v5142_v50 = vunpack.c.h.bf16 %v3900_v61  ;;  %v433_v34 = vsel %vm398_vm1, %v430_v23, %v432_v53  ;;  %v470_v63 = vrot.slane %v5138_v57, 1 }
  0x33   : > { %5149 = vst [vmem:[#allocation2_spill] sm:$0xff] %v3912_v8  ;;  %3224 = vmatmul.mubr.msk.bf16.gmra.mxu1 %vm527_vm2, %v3912_v8  ;;  %v472_v7 = vrot.slane %v5139_v49, 1  ;;  %v5144_v24 = vunpack.c.l.bf16 %v3910_v58  ;;  %v3939_v47 = vpack.c.bf16 %v433_v34, %v431_v5  ;;  %v434_v54 = vrot.slane %v5143_v25, 1 }
  0x34   : > { %v435_v29 = vrot.slane %v5142_v50, 1  ;;  %v5146_v23 = vunpack.c.l.bf16 %v3919_v0  ;;  %v471_v53 = vsel %vm398_vm1, %v469_v33, %v470_v63  ;;  %v5145_v8 = vunpack.c.h.bf16 %v3919_v0 }
  0x35   : > { %v473_v57 = vsel %vm398_vm1, %v470_v63, %v472_v7  ;;  %v437_v49 = vrot.slane %v5144_v24, 1  ;;  %3211 = vmatprep.mubr.msk.bf16.mxu0 %vm527_vm2, %v3939_v47  ;;  %v5147_v50 = vunpack.c.l.bf16 %v3937_v55  ;;  %v5150_v33 = vunpack.c.l.bf16 %v3646_v15 }
  0x36   : > { %v3953_v34 = vpack.c.bf16 %v473_v57, %v471_v53  ;;  %v436_v5 = vsel %vm398_vm1, %v434_v54, %v435_v29  ;;  %v474_v25 = vrot.slane %v5146_v23, 1  ;;  %v475_v24 = vrot.slane %v5145_v8, 1 }
  0x37   : > { %v962_v7 = vrot.slane %v5150_v33, 2  ;;  %v438_v63 = vsel %vm398_vm1, %v435_v29, %v437_v49  ;;  %v956_v57 = vsel %vm953_vm3, %v3653_v22, %v3668_v32  ;;  %v477_v53 = vrot.slane %v5147_v50, 1 }
  0x38   : > { %3227 = vmatprep.mubr.msk.bf16.mxu1 %vm527_vm2, %v3953_v34  ;;  %v3969_v54 = vpack.c.bf16 %v438_v63, %v436_v5  ;;  %v958_v15 = vsel %vm953_vm3, %v3668_v32, %v3674_v36  ;;  %v476_v29 = vsel %vm398_vm1, %v474_v25, %v475_v24  ;;  %v5151_v33 = vunpack.c.l.bf16 %v3680_v40 }
  0x39   : > { %v1066_v49 = vpack.c.bf16 %v958_v15, %v956_v57  ;;  %v478_v22 = vsel %vm398_vm1, %v475_v24, %v477_v53  ;;  %v5152_v5 = vunpack.c.h.bf16 %v3680_v40  ;;  %v961_v32 = vsel %vm953_vm3, %v3685_v42, %v3687_v43 }
  0x3a   : > { %3212 = vmatmul.mubr.msk.bf16.gmra.mxu0 %vm527_vm2, %v3969_v54  ;;  %v964_v8 = vrot.slane %v5151_v33, 2  ;;  %v3984_v23 = vpack.c.bf16 %v478_v22, %v476_v29  ;;  %v963_v36 = vsel %vm953_vm3, %v3687_v43, %v962_v7  ;;  %v5153_v25 = vunpack.c.l.bf16 %v3691_v45 }
  0x3b   : > { %v965_v63 = vrot.slane %v5152_v5, 2  ;;  %3267 = vmatprep.mubr.msk.bf16.mxu0 %vm527_vm2, %v1066_v49  ;;  %v5154_v15 = vunpack.c.l.bf16 %v3731_v1  ;;  %v5155_v49 = vunpack.c.h.bf16 %v3731_v1  ;;  %v5156_v42 = vunpack.c.l.bf16 %v3734_v2 }
  0x3c   : > { %v967_v24 = vrot.slane %v5153_v25, 2  ;;  %3228 = vmatmul.mubr.msk.bf16.gmra.mxu1 %vm527_vm2, %v3984_v23  ;;  %v4006_v43 = vpack.c.bf16 %v963_v36, %v961_v32  ;;  %v5157_v45 = vunpack.c.l.bf16 %v3762_v27  ;;  %v5158_v7 = vunpack.c.h.bf16 %v3762_v27  ;;  %v4023_v32 = vld [vmem:[%s5099_s1 + $0x6] sm:$0x1] }
  0x3d   : > { %v966_v57 = vsel %vm953_vm3, %v964_v8, %v965_v63  ;;  %v969_v29 = vrot.slane %v5154_v15, 2  ;;  %v970_v22 = vrot.slane %v5155_v49, 2  ;;  %v972_v33 = vrot.slane %v5156_v42, 2  ;;  %3233 = vmatprep.mubr.msk.bf16.mxu1 %vm527_vm2, %v3628_v4  ;;  %v4042_v42 = vld [vmem:[%s5099_s1 + $0x5] sm:$0x1] }
  0x3e   : > { %v968_v53 = vsel %vm953_vm3, %v965_v63, %v967_v24  ;;  %v974_v8 = vrot.slane %v5157_v45, 2  ;;  %v975_v5 = vrot.slane %v5158_v7, 2  ;;  %v5159_v63 = vunpack.c.l.bf16 %v3777_v38 }
  0x3f   : > { %v4014_v24 = vpack.c.bf16 %v968_v53, %v966_v57  ;;  %v1541_v2 = vsel %vm576_vm0, %v3720_v60, 0  ;;  %v971_v15 = vsel %vm953_vm3, %v969_v29, %v970_v22  ;;  %v973_v4 = vsel %vm953_vm3, %v970_v22, %v972_v33 }
  0x40   : > { %v977_v25 = vrot.slane %v5159_v63, 2  ;;  %v976_v38 = vsel %vm953_vm3, %v974_v8, %v975_v5  ;;  %v1331_v57 = vsel %vm576_vm0, %v3767_v28, 0  ;;  %v4033_v60 = vpack.c.bf16 %v973_v4, %v971_v15 }
  0x41   : > { %v5160_v53 = vunpack.c.l.bf16 %v3810_v19  ;;  %v5161_v49 = vunpack.c.l.bf16 %v3632_v6  ;;  %v5162_v33 = vunpack.c.h.bf16 %v3810_v19  ;;  %v5163_v8 = vunpack.c.h.bf16 %v3632_v6 }
  0x42   : > { %3268 = vmatmul.mubr.msk.bf16.vlgmr.msra.gmra.mxu0 %vm527_vm2, %v4006_v43  ;;  %v978_v36 = vsel %vm953_vm3, %v975_v5, %v977_v25  ;;  %v5164_v5 = vunpack.c.l.bf16 %v3637_v10  ;;  %v5165_v25 = vunpack.c.l.bf16 %v3832_v59  ;;  %v5166_v15 = vunpack.c.l.bf16 %v3666_v30 }
  0x43   : > { %3334 = vmatpush3.bf16.msra.mxu0 %v1541_v2  ;;  %3271 = vmatprep.mubr.msk.bf16.mxu0 %vm527_vm2, %v4014_v24  ;;  %v979_v29 = vrot.slane %v5160_v53, 2  ;;  %v994_v22 = vrot.slane %v5161_v49, 2  ;;  %v4048_v28 = vpack.c.bf16 %v978_v36, %v976_v38  ;;  %v980_v45 = vrot.slane %v5162_v33, 2 }
  0x44   : > { %3512 = vmatprep.subr.msk.bf16.mxu0 %vm576_vm0, %v4023_v32  ;;  %3234 = vmatmul.mubr.msk.bf16.vlgmr.msra.gmra.mxu1 %vm527_vm2, %v3641_v12  ;;  %v995_v7 = vrot.slane %v5163_v8, 2  ;;  %v997_v63 = vrot.slane %v5164_v5, 2  ;;  %v982_v2 = vrot.slane %v5165_v25, 2  ;;  %v999_v4 = vrot.slane %v5166_v15, 2 }
  0x45   : > { %3300 = vmatpush3.bf16.msra.mxu1 %v1331_v57  ;;  %3237 = vmatprep.mubr.msk.bf16.mxu1 %vm527_vm2, %v3680_v40  ;;  %v5167_v38 = vunpack.c.h.bf16 %v3666_v30  ;;  %v5168_v53 = vunpack.c.l.bf16 %v3672_v35  ;;  %v5169_v33 = vunpack.c.l.bf16 %v3862_v48  ;;  %v5170_v57 = vunpack.c.h.bf16 %v3862_v48 }
  0x46   : > { %v996_v5 = vsel %vm953_vm3, %v994_v22, %v995_v7  ;;  %v998_v59 = vsel %vm953_vm3, %v995_v7, %v997_v63  ;;  %3511 = vmatprep.subr.msk.bf16.mxu1 %vm576_vm0, %v4042_v42  ;;  %v5171_v25 = vunpack.c.l.bf16 %v3872_v13  ;;  %v5173_v22 = vunpack.c.h.bf16 %v3743_v9 }
  0x47   : > { %v1000_v36 = vrot.slane %v5167_v38, 2  ;;  %v1002_v49 = vrot.slane %v5168_v53, 2  ;;  %v984_v10 = vrot.slane %v5169_v33, 2  ;;  %v985_v8 = vrot.slane %v5170_v57, 2 }
  0x48   : > { %v987_v15 = vrot.slane %v5171_v25, 2  ;;  %v4076_v38 = vpack.c.bf16 %v998_v59, %v996_v5  ;;  %v5172_v57 = vunpack.c.l.bf16 %v3743_v9  ;;  %v1010_v7 = vrot.slane %v5173_v22, 2 }
  0x49   : > { %v1001_v35 = vsel %vm953_vm3, %v999_v4, %v1000_v36  ;;  %v1003_v53 = vsel %vm953_vm3, %v1000_v36, %v1002_v49  ;;  %v5174_v13 = vunpack.c.l.bf16 %v3759_v26  ;;  %v981_v4 = vsel %vm953_vm3, %v979_v29, %v980_v45 }
  0x4a   : > { %v4080_v33 = vpack.c.bf16 %v1003_v53, %v1001_v35  ;;  %v1009_v50 = vrot.slane %v5172_v57, 2  ;;  %3272 = vmatmul.mubr.msk.bf16.gmra.mxu0 %vm527_vm2, %v4033_v60  ;;  %v983_v36 = vsel %vm953_vm3, %v980_v45, %v982_v2  ;;  %v986_v49 = vsel %vm953_vm3, %v984_v10, %v985_v8 }
  0x4b   : > { %v1012_v63 = vrot.slane %v5174_v13, 2  ;;  %3275 = vmatprep.mubr.msk.bf16.mxu0 %vm527_vm2, %v4048_v28  ;;  %v988_v5 = vsel %vm953_vm3, %v985_v8, %v987_v15  ;;  %v5175_v35 = vunpack.c.l.bf16 %v3836_v56  ;;  %v4106_v29 = vpack.c.bf16 %v983_v36, %v981_v4 }
  0x4c   : > { %v1011_v59 = vsel %vm953_vm3, %v1009_v50, %v1010_v7  ;;  %3238 = vmatmul.mubr.msk.bf16.gmra.mxu1 %vm527_vm2, %v3731_v1  ;;  %v5176_v45 = vunpack.c.h.bf16 %v3836_v56  ;;  %v5177_v50 = vunpack.c.l.bf16 %v3845_v44  ;;  %v4112_v8 = vpack.c.bf16 %v988_v5, %v986_v49 }
  0x4d   : > { %v1013_v25 = vsel %vm953_vm3, %v1010_v7, %v1012_v63  ;;  %v1019_v53 = vrot.slane %v5175_v35, 2  ;;  %3241 = vmatprep.mubr.msk.bf16.mxu1 %vm527_vm2, %v3762_v27  ;;  %v5178_v15 = vunpack.c.l.bf16 %v3900_v61  ;;  %v5179_v22 = vunpack.c.h.bf16 %v3900_v61 }
  0x4e   : > { %v4100_v26 = vpack.c.bf16 %v1013_v25, %v1011_v59  ;;  %v1020_v2 = vrot.slane %v5176_v45, 2  ;;  %v1022_v10 = vrot.slane %v5177_v50, 2  ;;  %v5180_v13 = vunpack.c.l.bf16 %v3910_v58 }
  0x4f   : > { %v989_v57 = vrot.slane %v5178_v15, 2  ;;  %v990_v7 = vrot.slane %v5179_v22, 2  ;;  %v5181_v5 = vunpack.c.l.bf16 %v3694_v46  ;;  %v5182_v35 = vunpack.c.h.bf16 %v3694_v46 }
  0x50   : > { %v992_v63 = vrot.slane %v5180_v13, 2  ;;  %v1021_v4 = vsel %vm953_vm3, %v1019_v53, %v1020_v2  ;;  %v1023_v36 = vsel %vm953_vm3, %v1020_v2, %v1022_v10  ;;  %v5183_v45 = vunpack.c.l.bf16 %v3701_v51 }
  0x51   : > { %v4122_v59 = vpack.c.bf16 %v1023_v36, %v1021_v4  ;;  %v991_v44 = vsel %vm953_vm3, %v989_v57, %v990_v7  ;;  %v1004_v25 = vrot.slane %v5181_v5, 2  ;;  %v1005_v53 = vrot.slane %v5182_v35, 2 }
  0x52   : > { %3276 = vmatmul.mubr.msk.bf16.gmra.mxu0 %vm527_vm2, %v4106_v29  ;;  %v993_v49 = vsel %vm953_vm3, %v990_v7, %v992_v63  ;;  %v1007_v2 = vrot.slane %v5183_v45, 2  ;;  %v5184_v51 = vunpack.c.l.bf16 %v3796_v62  ;;  %v5185_v22 = vunpack.c.h.bf16 %v3796_v62 }
  0x53   : > { %3279 = vmatprep.mubr.msk.bf16.mxu0 %vm527_vm2, %v4112_v8  ;;  %v4134_v58 = vpack.c.bf16 %v993_v49, %v991_v44  ;;  %v1006_v50 = vsel %vm953_vm3, %v1004_v25, %v1005_v53  ;;  %v5186_v13 = vunpack.c.l.bf16 %v3807_v18  ;;  %v5187_v18 = vunpack.c.l.bf16 %v3875_v11 }
  0x54   : > { %3242 = vmatmul.mubr.msk.bf16.gmra.mxu1 %vm527_vm2, %v3810_v19  ;;  %v1008_v10 = vsel %vm953_vm3, %v1005_v53, %v1007_v2  ;;  %v1014_v57 = vrot.slane %v5184_v51, 2  ;;  %v1015_v7 = vrot.slane %v5185_v22, 2  ;;  %v5188_v5 = vunpack.c.h.bf16 %v3875_v11 }
  0x55   : > { %3245 = vmatprep.mubr.msk.bf16.mxu1 %vm527_vm2, %v3862_v48  ;;  %v4152_v15 = vpack.c.bf16 %v1008_v10, %v1006_v50  ;;  %v1017_v63 = vrot.slane %v5186_v13, 2  ;;  %v1024_v49 = vrot.slane %v5187_v18, 2  ;;  %v5189_v35 = vunpack.c.l.bf16 %v3891_v3  ;;  %v4197_v13 = vld [vmem:[%s3625_s27 + $0xc0] sm:$0xff]  }
  0x56   : > { %v1016_v4 = vsel %vm953_vm3, %v1014_v57, %v1015_v7  ;;  %v1025_v25 = vrot.slane %v5188_v5, 2  ;;  %v5190_v3 = vunpack.c.l.bf16 %v3919_v0  ;;  %v5191_v51 = vunpack.c.h.bf16 %v3919_v0 }
  0x57   : > { %v1018_v36 = vsel %vm953_vm3, %v1015_v7, %v1017_v63  ;;  %v1027_v53 = vrot.slane %v5189_v35, 2  ;;  %v5192_v22 = vunpack.c.l.bf16 %v3937_v55  ;;  %v319_v18 = vunpack.c.l.bf16 %v4197_v13 }
  0x58   : > { %v4170_v44 = vpack.c.bf16 %v1018_v36, %v1016_v4  ;;  %v1026_v45 = vsel %vm953_vm3, %v1024_v49, %v1025_v25  ;;  %v1029_v10 = vrot.slane %v5190_v3, 2  ;;  %v1030_v57 = vrot.slane %v5191_v51, 2  ;;  %v267_v36 = vld [vmem:[%s3625_s27 + $0xc8] sm:$0x1] }
  0x59   : > { %v1028_v2 = vsel %vm953_vm3, %v1025_v25, %v1027_v53  ;;  %v1032_v7 = vrot.slane %v5192_v22, 2  ;;  %v320_v49 = vunpack.c.h.bf16 %v4197_v13  ;;  %v1736_v5 = vrot.slane %v319_v18, 2  ;;  %v333_v51 = vld [vmem:[%s5099_s1 + $0x8] sm:$0x1] }
  0x5a   : > { %3280 = vmatmul.mubr.msk.bf16.gmra.mxu0 %vm527_vm2, %v4134_v58  ;;  %v4188_v50 = vpack.c.bf16 %v1028_v2, %v1026_v45  ;;  %v1031_v63 = vsel %vm953_vm3, %v1029_v10, %v1030_v57  ;;  %v321_v35 = vunpack.c.l.bf16 %v267_v36  ;;  %v1948_v10 = vsel %vm576_vm0, %v4023_v32, 0  ;;  %v5193_v32 = vld [vmem:[#allocation2_spill] sm:$0xff] }
  0x5b   : > { %3283 = vmatprep.mubr.msk.bf16.mxu0 %vm527_vm2, %v4076_v38  ;;  %v1033_v4 = vsel %vm953_vm3, %v1030_v57, %v1032_v7  ;;  %v1737_v25 = vrot.slane %v320_v49, 2  ;;  %v1530_v57 = vrot.slane %v320_v49, 1  ;;  %v2365_v36 = vsel %vm576_vm0, %v333_v51, 0 }
  0x5c   : > { %3246 = vmatmul.mubr.msk.bf16.gmra.mxu1 %vm527_vm2, %v3900_v61  ;;  %v4212_v55 = vpack.c.bf16 %v1033_v4, %v1031_v63  ;;  %v1739_v53 = vrot.slane %v321_v35, 2  ;;  %v1532_v22 = vrot.slane %v321_v35, 1 }
  0x5d   : > { %3249 = vmatprep.mubr.msk.bf16.mxu1 %vm527_vm2, %v3632_v6  ;;  %v1738_v45 = vsel %vm953_vm3, %v1736_v5, %v1737_v25 }
  0x5e   : > { %v1740_v2 = vsel %vm953_vm3, %v1737_v25, %v1739_v53  ;;  %v1533_v63 = vsel %vm398_vm1, %v1530_v57, %v1532_v22  ;;  %v4391_v53 = vld [vmem:[%s3625_s27 + $0xcc] sm:$0xff]  }
  0x5f   : > { %v4220_v3 = vpack.c.bf16 %v1740_v2, %v1738_v45 }
  0x62   : > { %3284 = vmatmul.mubr.msk.bf16.gmra.mxu0 %vm527_vm2, %v4080_v33 }
  0x63   : > { %3287 = vmatprep.mubr.msk.bf16.mxu0 %vm527_vm2, %v4152_v15 }
  0x64   : > { %3250 = vmatmul.mubr.msk.bf16.gmra.mxu1 %vm527_vm2, %v3666_v30 }
  0x65   : > { %3253 = vmatprep.mubr.msk.bf16.mxu1 %vm527_vm2, %v3694_v46 }
  0x6a   : > { %3288 = vmatmul.mubr.msk.bf16.gmra.mxu0 %vm527_vm2, %v4100_v26 }
  0x6b   : > { %3291 = vmatprep.mubr.msk.bf16.mxu0 %vm527_vm2, %v4170_v44 }
  0x6c   : > { %3254 = vmatmul.mubr.msk.bf16.gmra.mxu1 %vm527_vm2, %v3743_v9 }
  0x6d   : > { %3257 = vmatprep.mubr.msk.bf16.mxu1 %vm527_vm2, %v3796_v62 }
  0x72   : > { %3292 = vmatmul.mubr.msk.bf16.gmra.mxu0 %vm527_vm2, %v4122_v59 }
  0x73   : > { %3295 = vmatprep.mubr.msk.bf16.mxu0 %vm527_vm2, %v4188_v50 }
  0x74   : > { %3258 = vmatmul.mubr.msk.bf16.gmra.mxu1 %vm527_vm2, %v3836_v56 }
  0x75   : > { %3261 = vmatprep.mubr.msk.bf16.mxu1 %vm527_vm2, %v3875_v11 }
  0x7a   : > { %3296 = vmatmul.mubr.msk.bf16.gmra.mxu0 %vm527_vm2, %v4212_v55 }
  0x7b   : > { %3335 = vmatprep.mubr.msk.bf16.mxu0 %vm527_vm2, %v3705_v52  ;;  %v1748_v52 = vsel %vm576_vm0, %v4042_v42, 0  ;;  %v1529_v42 = vrot.slane %v319_v18, 1 }
  0x7c   : > { %3262 = vmatmul.mubr.msk.bf16.gmra.mxu1 %vm527_vm2, %v3919_v0 }
  0x7d   : > { %3301 = vmatprep.mubr.msk.bf16.mxu1 %vm527_vm2, %v3641_v12  ;;  %v332_v12 = vld [vmem:[%s5099_s1 + $0x7] sm:$0x1]  ;;  %v1531_v7 = vsel %vm398_vm1, %v1529_v42, %v1530_v57 }
  0x7e   : > { %v4296_v4 = vpack.c.bf16 %v1533_v63, %v1531_v7  ;;  %v2158_v18 = vsel %vm576_vm0, %v332_v12, 0 }
  0x80   : > { %5194 = vst [vmem:[#allocation2_spill] sm:$0xff] %v4296_v4 }
  0x82   : > { %3336 = vmatmul.mubr.msk.bf16.vlgmr.msra.gmra.mxu0 %vm527_vm2, %v3771_v31 }
  0x83   : > { %3402 = vmatpush3.bf16.msra.mxu0 %v1948_v10  ;;  %3339 = vmatprep.mubr.msk.bf16.mxu0 %vm527_vm2, %v3812_v20 }
  0x84   : > { %3514 = vmatprep.subr.msk.bf16.mxu0 %vm576_vm0, %v333_v51  ;;  %3302 = vmatmul.mubr.msk.bf16.vlgmr.msra.gmra.mxu1 %vm527_vm2, %v3680_v40 }
  0x85   : > { %3368 = vmatpush3.bf16.msra.mxu1 %v1748_v52  ;;  %3305 = vmatprep.mubr.msk.bf16.mxu1 %vm527_vm2, %v3731_v1 }
  0x86   : > { %3513 = vmatprep.subr.msk.bf16.mxu1 %vm576_vm0, %v332_v12 }
  0x8a   : > { %3340 = vmatmul.mubr.msk.bf16.gmra.mxu0 %vm527_vm2, %v3847_v21 }
  0x8b   : > { %3343 = vmatprep.mubr.msk.bf16.mxu0 %vm527_vm2, %v3902_v14 }
  0x8c   : > { %3306 = vmatmul.mubr.msk.bf16.gmra.mxu1 %vm527_vm2, %v3762_v27 }
  0x8d   : > { %3309 = vmatprep.mubr.msk.bf16.mxu1 %vm527_vm2, %v3810_v19 }
  0x92   : > { %3344 = vmatmul.mubr.msk.bf16.gmra.mxu0 %vm527_vm2, %v3939_v47 }
  0x93   : > { %3347 = vmatprep.mubr.msk.bf16.mxu0 %vm527_vm2, %v3969_v54 }
  0x94   : > { %3310 = vmatmul.mubr.msk.bf16.gmra.mxu1 %vm527_vm2, %v3862_v48 }
  0x95   : > { %3313 = vmatprep.mubr.msk.bf16.mxu1 %vm527_vm2, %v3900_v61 }
  0x9a   : > { %3348 = vmatmul.mubr.msk.bf16.gmra.mxu0 %vm527_vm2, %v3683_v41 }
  0x9b   : > { %3351 = vmatprep.mubr.msk.bf16.mxu0 %vm527_vm2, %v3745_v16 }
  0x9c   : > { %3314 = vmatmul.mubr.msk.bf16.gmra.mxu1 %vm527_vm2, %v3632_v6 }
  0x9d   : > { %3317 = vmatprep.mubr.msk.bf16.mxu1 %vm527_vm2, %v3666_v30 }
  0xa2   : > { %3352 = vmatmul.mubr.msk.bf16.gmra.mxu0 %vm527_vm2, %v3780_v39 }
  0xa3   : > { %3355 = vmatprep.mubr.msk.bf16.mxu0 %vm527_vm2, %v3838_v37 }
  0xa4   : > { %3318 = vmatmul.mubr.msk.bf16.gmra.mxu1 %vm527_vm2, %v3694_v46 }
  0xa5   : > { %3321 = vmatprep.mubr.msk.bf16.mxu1 %vm527_vm2, %v3743_v9 }
  0xaa   : > { %3356 = vmatmul.mubr.msk.bf16.gmra.mxu0 %vm527_vm2, %v3877_v17 }
  0xab   : > { %3359 = vmatprep.mubr.msk.bf16.mxu0 %vm527_vm2, %v5193_v32 }
  0xac   : > { %3322 = vmatmul.mubr.msk.bf16.gmra.mxu1 %vm527_vm2, %v3796_v62 }
  0xad   : > { %3325 = vmatprep.mubr.msk.bf16.mxu1 %vm527_vm2, %v3836_v56 }
  0xb2   : > { %3360 = vmatmul.mubr.msk.bf16.gmra.mxu0 %vm527_vm2, %v3953_v34 }
  0xb3   : > { %3363 = vmatprep.mubr.msk.bf16.mxu0 %vm527_vm2, %v3984_v23 }
  0xb4   : > { %3326 = vmatmul.mubr.msk.bf16.gmra.mxu1 %vm527_vm2, %v3875_v11 }
  0xb5   : > { %3329 = vmatprep.mubr.msk.bf16.mxu1 %vm527_vm2, %v3919_v0 }
  0xba   : > { %3364 = vmatmul.mubr.msk.bf16.gmra.mxu0 %vm527_vm2, %v4296_v4 }
  0xbb   : > { %3403 = vmatprep.mubr.msk.bf16.mxu0 %vm527_vm2, %v3680_v40 }
  0xbc   : > { %3330 = vmatmul.mubr.msk.bf16.gmra.mxu1 %vm527_vm2, %v4197_v13 }
  0xbd   : > { %3369 = vmatprep.mubr.msk.bf16.mxu1 %vm527_vm2, %v4006_v43 }
  0xc2   : > { %3404 = vmatmul.mubr.msk.bf16.vlgmr.msra.gmra.mxu0 %vm527_vm2, %v3731_v1 }
  0xc3   : > { %3470 = vmatpush3.bf16.msra.mxu0 %v2365_v36  ;;  %3407 = vmatprep.mubr.msk.bf16.mxu0 %vm527_vm2, %v3762_v27 }
  0xc4   : > { %3370 = vmatmul.mubr.msk.bf16.vlgmr.msra.gmra.mxu1 %vm527_vm2, %v4014_v24 }
  0xc5   : > { %3436 = vmatpush3.bf16.msra.mxu1 %v2158_v18  ;;  %3373 = vmatprep.mubr.msk.bf16.mxu1 %vm527_vm2, %v4033_v60 }
  0xca   : > { %3408 = vmatmul.mubr.msk.bf16.gmra.mxu0 %vm527_vm2, %v3810_v19 }
  0xcb   : > { %3411 = vmatprep.mubr.msk.bf16.mxu0 %vm527_vm2, %v3862_v48 }
  0xcc   : > { %3374 = vmatmul.mubr.msk.bf16.gmra.mxu1 %vm527_vm2, %v4048_v28 }
  0xcd   : > { %3377 = vmatprep.mubr.msk.bf16.mxu1 %vm527_vm2, %v4106_v29 }
  0xd2   : > { %3412 = vmatmul.mubr.msk.bf16.gmra.mxu0 %vm527_vm2, %v3900_v61 }
  0xd3   : > { %3415 = vmatprep.mubr.msk.bf16.mxu0 %vm527_vm2, %v3632_v6 }
  0xd4   : > { %3378 = vmatmul.mubr.msk.bf16.gmra.mxu1 %vm527_vm2, %v4112_v8 }
  0xd5   : > { %3381 = vmatprep.mubr.msk.bf16.mxu1 %vm527_vm2, %v4134_v58 }
  0xda   : > { %3416 = vmatmul.mubr.msk.bf16.gmra.mxu0 %vm527_vm2, %v3666_v30 }
  0xdb   : > { %3419 = vmatprep.mubr.msk.bf16.mxu0 %vm527_vm2, %v3694_v46 }
  0xdc   : > { %3382 = vmatmul.mubr.msk.bf16.gmra.mxu1 %vm527_vm2, %v4076_v38 }
  0xdd   : > { %3385 = vmatprep.mubr.msk.bf16.mxu1 %vm527_vm2, %v4080_v33 }
  0xde   : > { %v3201_v40 = vpop.f32.mrf.mxu0 }
  0xe0   : > { %v614_v6 = vpop.f32.mrf.mxu0 }
  0xe1   : > { %v4340_v1 = vpop.f32.mrf.mxu1 }
  0xe2   : > { %3420 = vmatmul.mubr.msk.bf16.gmra.mxu0 %vm527_vm2, %v3743_v9  ;;  %v3202_v27 = vpop.f32.mrf.mxu0 }
  0xe3   : > { %3423 = vmatprep.mubr.msk.bf16.mxu0 %vm527_vm2, %v3796_v62  ;;  %v4346_v30 = vpop.f32.mrf.mxu1 }
  0xe4   : > { %v4348_v46 = vpop.f32.mrf.mxu0  ;;  %3386 = vmatmul.mubr.msk.bf16.gmra.mxu1 %vm527_vm2, %v4152_v15 }
  0xe5   : > { %v4352_v61 = vpop.f32.mrf.mxu1  ;;  %3389 = vmatprep.mubr.msk.bf16.mxu1 %vm527_vm2, %v4100_v26 }
  0xe7   : > { %v4356_v19 = vpop.f32.mrf.mxu1 }
  0xe8   : > { %v4358_v48 = vpop.f32.mrf.mxu0 }
  0xea   : > { %3424 = vmatmul.mubr.msk.bf16.gmra.mxu0 %vm527_vm2, %v3836_v56  ;;  %v4362_v9 = vpop.f32.mrf.mxu0  ;;  %v4364_v62 = vpop.f32.mrf.mxu1 }
  0xeb   : > { %3427 = vmatprep.mubr.msk.bf16.mxu0 %vm527_vm2, %v3875_v11 }
  0xec   : > { %v4368_v43 = vpop.f32.mrf.mxu0  ;;  %3390 = vmatmul.mubr.msk.bf16.gmra.mxu1 %vm527_vm2, %v4170_v44  ;;  %v4372_v49 = vpop.f32.mrf.mxu1 }
  0xed   : > { %3393 = vmatprep.mubr.msk.bf16.mxu1 %vm527_vm2, %v4122_v59 }
  0xee   : > { %v4374_v5 = vpop.f32.mrf.mxu0  ;;  %v4378_v56 = vpop.f32.mrf.mxu1 }
  0xf0   : > { %v4380_v25 = vpop.f32.mrf.mxu1 }
  0xf1   : > { %v4382_v35 = vpop.f32.mrf.mxu0 }
  0xf2   : > { %3428 = vmatmul.mubr.msk.bf16.gmra.mxu0 %vm527_vm2, %v3919_v0 }
  0xf3   : > { %v4386_v11 = vpop.f32.mrf.mxu1  ;;  %3431 = vmatprep.mubr.msk.bf16.mxu0 %vm527_vm2, %v4197_v13  ;;  %v4393_v45 = vpop.f32.mrf.mxu0 }
  0xf4   : > { %5195 = vst [vmem:[#allocation3_spill] sm:$0xff] %v4386_v11  ;;  %3394 = vmatmul.mubr.msk.bf16.gmra.mxu1 %vm527_vm2, %v4188_v50 }
  0xf5   : > { %v4397_v2 = vpop.f32.mrf.mxu1  ;;  %v4399_v10 = vpop.f32.mrf.mxu0  ;;  %3397 = vmatprep.mubr.msk.bf16.mxu1 %vm527_vm2, %v4212_v55 }
  0xf6   : > { %5196 = vst [vmem:[#allocation4_spill] sm:$0xff] %v4397_v2 }
  0xf7   : > { %v4403_v0 = vpop.f32.mrf.mxu1  ;;  %v4405_v51 = vpop.f32.mrf.mxu0 }
  0xf8   : > { %5197 = vst [vmem:[#allocation5_spill] sm:$0xff] %v4403_v0 }
  0xf9   : > { %v4407_v52 = vpop.f32.mrf.mxu1 }
  0xfa   : > { %5198 = vst [vmem:[#allocation6_spill] sm:$0xff] %v4407_v52  ;;  %v4409_v13 = vpop.f32.mrf.mxu0  ;;  %3432 = vmatmul.mubr.msk.bf16.gmra.mxu0 %vm527_vm2, %v4391_v53 }
  0xfb   : > { %3471 = vmatprep.mubr.msk.bf16.mxu0 %vm527_vm2, %v4014_v24 }
  0xfc   : > { %v4415_v12 = vpop.f32.mrf.mxu0  ;;  %v4417_v42 = vpop.f32.mrf.mxu1  ;;  %3398 = vmatmul.mubr.msk.bf16.gmra.mxu1 %vm527_vm2, %v4220_v3 }
  0xfd   : > { %5199 = vst [vmem:[#allocation7_spill] sm:$0xff] %v4417_v42  ;;  %3437 = vmatprep.mubr.msk.bf16.mxu1 %vm527_vm2, %v3771_v31 }
  0xfe   : > { %v4421_v57 = vpop.f32.mrf.mxu0  ;;  %v4425_v22 = vpop.f32.mrf.mxu1 }
  0xff   : > { %5200 = vst [vmem:[#allocation8_spill] sm:$0xff] %v4425_v22 }
 0x100   : > { %v4427_v7 = vpop.f32.mrf.mxu0  ;;  %v4429_v63 = vpop.f32.mrf.mxu1 }
 0x101   : > { %5201 = vst [vmem:[#allocation9_spill] sm:$0xff] %v4429_v63 }
 0x102   : > { %v3269_v36 = vpop.f32.mrf.mxu0  ;;  %3472 = vmatmul.mubr.msk.bf16.vlgmr.msra.gmra.mxu0 %vm527_vm2, %v4033_v60  ;;  %v4433_v24 = vpop.f32.mrf.mxu1 }
 0x103   : > { %5202 = vst [vmem:[#allocation10_spill] sm:$0xff] %v4433_v24  ;;  %3475 = vmatprep.mubr.msk.bf16.mxu0 %vm527_vm2, %v4048_v28 }
 0x104   : > { %v1167_v18 = vpop.f32.mrf.mxu0  ;;  %v3235_v42 = vpop.f32.mrf.mxu1  ;;  %3438 = vmatmul.mubr.msk.bf16.vlgmr.msra.gmra.mxu1 %vm527_vm2, %v3812_v20 }
 0x105   : > { %v835_v31 = vadd.f32 %v3235_v42, %v3201_v40  ;;  %3441 = vmatprep.mubr.msk.bf16.mxu1 %vm527_vm2, %v3847_v21 }
 0x106   : > { %v3270_v22 = vpop.f32.mrf.mxu0  ;;  %v826_v63 = vpop.f32.mrf.mxu1 }
 0x107   : > { %v4441_v52 = vadd.f32 %v3269_v36, %v835_v31  ;;  %v827_v0 = vadd.f32 %v826_v63, %v614_v6 }
 0x108   : > { %v1170_v60 = vpop.f32.mrf.mxu0  ;;  %v3236_v2 = vpop.f32.mrf.mxu1 }
 0x109   : > { %v4443_v24 = vadd.f32 %v1167_v18, %v827_v0  ;;  %v838_v4 = vadd.f32 %v3236_v2, %v3202_v27 }
 0x10a   : > { %v3273_v28 = vpop.f32.mrf.mxu0  ;;  %3476 = vmatmul.mubr.msk.bf16.gmra.mxu0 %vm527_vm2, %v4106_v29  ;;  %v829_v11 = vpop.f32.mrf.mxu1 }
 0x10b   : > { %3479 = vmatprep.mubr.msk.bf16.mxu0 %vm527_vm2, %v4112_v8  ;;  %v4449_v20 = vadd.f32 %v3270_v22, %v838_v4  ;;  %v830_v21 = vadd.f32 %v829_v11, %v4348_v46 }
 0x10c   : > { %v1183_v40 = vpop.f32.mrf.mxu0  ;;  %v3239_v42 = vpop.f32.mrf.mxu1  ;;  %3442 = vmatmul.mubr.msk.bf16.gmra.mxu1 %vm527_vm2, %v3902_v14 }
 0x10d   : > { %v4454_v6 = vadd.f32 %v1170_v60, %v830_v21  ;;  %v851_v27 = vadd.f32 %v3239_v42, %v4358_v48  ;;  %3445 = vmatprep.mubr.msk.bf16.mxu1 %vm527_vm2, %v3939_v47 }
 0x10e   : > { %v3274_v2 = vpop.f32.mrf.mxu0  ;;  %v842_v29 = vpop.f32.mrf.mxu1 }
 0x10f   : > { %v4459_v0 = vadd.f32 %v3273_v28, %v851_v27  ;;  %v843_v8 = vadd.f32 %v842_v29, %v4362_v9 }
 0x110   : > { %v1186_v4 = vpop.f32.mrf.mxu0  ;;  %v3240_v46 = vpop.f32.mrf.mxu1 }
 0x111   : > { %v4462_v11 = vadd.f32 %v1183_v40, %v843_v8  ;;  %v854_v22 = vadd.f32 %v3240_v46, %v4368_v43 }
 0x112   : > { %v3277_v14 = vpop.f32.mrf.mxu0  ;;  %3480 = vmatmul.mubr.msk.bf16.gmra.mxu0 %vm527_vm2, %v4134_v58  ;;  %v845_v48 = vpop.f32.mrf.mxu1 }
 0x113   : > { %3483 = vmatprep.mubr.msk.bf16.mxu0 %vm527_vm2, %v4076_v38  ;;  %v4469_v47 = vadd.f32 %v3274_v2, %v854_v22  ;;  %v846_v63 = vadd.f32 %v845_v48, %v4374_v5 }
 0x114   : > { %v1199_v36 = vpop.f32.mrf.mxu0  ;;  %v3243_v9 = vpop.f32.mrf.mxu1  ;;  %3446 = vmatmul.mubr.msk.bf16.gmra.mxu1 %vm527_vm2, %v3969_v54 }
 0x115   : > { %v4474_v18 = vadd.f32 %v1186_v4, %v846_v63  ;;  %v867_v43 = vadd.f32 %v3243_v9, %v4382_v35  ;;  %3449 = vmatprep.mubr.msk.bf16.mxu1 %vm527_vm2, %v3683_v41 }
 0x116   : > { %v3278_v31 = vpop.f32.mrf.mxu0  ;;  %v858_v58 = vpop.f32.mrf.mxu1 }
 0x117   : > { %v4479_v60 = vadd.f32 %v3277_v14, %v867_v43  ;;  %v859_v38 = vadd.f32 %v858_v58, %v4393_v45 }
 0x118   : > { %v1202_v28 = vpop.f32.mrf.mxu0  ;;  %v3244_v5 = vpop.f32.mrf.mxu1 }
 0x119   : > { %v4482_v21 = vadd.f32 %v1199_v36, %v859_v38  ;;  %v870_v40 = vadd.f32 %v3244_v5, %v4399_v10 }
 0x11a   : > { %v3281_v54 = vpop.f32.mrf.mxu0  ;;  %3484 = vmatmul.mubr.msk.bf16.gmra.mxu0 %vm527_vm2, %v4080_v33  ;;  %v861_v35 = vpop.f32.mrf.mxu1 }
 0x11b   : > { %3487 = vmatprep.mubr.msk.bf16.mxu0 %vm527_vm2, %v4152_v15  ;;  %v4489_v41 = vadd.f32 %v3278_v31, %v870_v40  ;;  %v862_v42 = vadd.f32 %v861_v35, %v4405_v51 }
 0x11c   : > { %v1215_v27 = vpop.f32.mrf.mxu0  ;;  %v3247_v45 = vpop.f32.mrf.mxu1  ;;  %3450 = vmatmul.mubr.msk.bf16.gmra.mxu1 %vm527_vm2, %v3745_v16 }
 0x11d   : > { %v4494_v2 = vadd.f32 %v1202_v28, %v862_v42  ;;  %v883_v10 = vadd.f32 %v3247_v45, %v4409_v13  ;;  %3453 = vmatprep.mubr.msk.bf16.mxu1 %vm527_vm2, %v3780_v39 }
 0x11e   : > { %v3282_v29 = vpop.f32.mrf.mxu0  ;;  %v874_v33 = vpop.f32.mrf.mxu1 }
 0x11f   : > { %v4499_v8 = vadd.f32 %v3281_v54, %v883_v10  ;;  %v875_v15 = vadd.f32 %v874_v33, %v4415_v12 }
 0x120   : > { %v1218_v4 = vpop.f32.mrf.mxu0  ;;  %v3248_v51 = vpop.f32.mrf.mxu1 }
 0x121   : > { %v4502_v46 = vadd.f32 %v1215_v27, %v875_v15  ;;  %v886_v22 = vadd.f32 %v3248_v51, %v4421_v57 }
 0x122   : > { %v3285_v16 = vpop.f32.mrf.mxu0  ;;  %3488 = vmatmul.mubr.msk.bf16.gmra.mxu0 %vm527_vm2, %v4100_v26  ;;  %v877_v13 = vpop.f32.mrf.mxu1 }
 0x123   : > { %3491 = vmatprep.mubr.msk.bf16.mxu0 %vm527_vm2, %v4170_v44  ;;  %v4509_v39 = vadd.f32 %v3282_v29, %v886_v22  ;;  %v878_v14 = vadd.f32 %v877_v13, %v4427_v7  ;;  %v270_v7 = vld [vmem:[%s3625_s27 + $0xd4] sm:$0x1] }
 0x124   : > { %v1231_v12 = vpop.f32.mrf.mxu0  ;;  %v3251_v48 = vpop.f32.mrf.mxu1  ;;  %3454 = vmatmul.mubr.msk.bf16.gmra.mxu1 %vm527_vm2, %v3838_v37 }
 0x125   : > { %v4514_v63 = vadd.f32 %v1218_v4, %v878_v14  ;;  %v899_v57 = vadd.f32 %v3251_v48, %v4340_v1  ;;  %3457 = vmatprep.mubr.msk.bf16.mxu1 %vm527_vm2, %v3877_v17  ;;  %v322_v1 = vunpack.c.l.bf16 %v4391_v53  ;;  %v323_v17 = vunpack.c.h.bf16 %v4391_v53 }
 0x126   : > { %v3286_v36 = vpop.f32.mrf.mxu0  ;;  %v890_v26 = vpop.f32.mrf.mxu1 }
 0x127   : > { %v4519_v9 = vadd.f32 %v3285_v16, %v899_v57  ;;  %v891_v44 = vadd.f32 %v890_v26, %v4346_v30  ;;  %v324_v30 = vunpack.c.l.bf16 %v270_v7  ;;  %v2353_v53 = vrot.slane %v322_v1, 2  ;;  %v5203_v57 = vld [vmem:[#allocation3_spill] sm:$0xff]  ;;  %v5204_v26 = vld [vmem:[#allocation2_spill] sm:$0xff] }
 0x128   : > { %v1234_v43 = vpop.f32.mrf.mxu0  ;;  %v3252_v31 = vpop.f32.mrf.mxu1  ;;  %v2146_v33 = vrot.slane %v322_v1, 1  ;;  %v2147_v15 = vrot.slane %v323_v17, 1 }
 0x129   : > { %v4523_v58 = vadd.f32 %v1231_v12, %v891_v44  ;;  %v902_v37 = vadd.f32 %v3252_v31, %v4352_v61  ;;  %v2356_v45 = vrot.slane %v324_v30, 2  ;;  %v5205_v31 = vld [vmem:[#allocation4_spill] sm:$0xff] }
 0x12a   : > { %v3289_v38 = vpop.f32.mrf.mxu0  ;;  %3492 = vmatmul.mubr.msk.bf16.gmra.mxu0 %vm527_vm2, %v4122_v59  ;;  %v893_v28 = vpop.f32.mrf.mxu1 }
 0x12b   : > { %3495 = vmatprep.mubr.msk.bf16.mxu0 %vm527_vm2, %v4188_v50  ;;  %v4532_v5 = vadd.f32 %v3286_v36, %v902_v37  ;;  %v894_v40 = vadd.f32 %v893_v28, %v4356_v19  ;;  %v2354_v50 = vrot.slane %v323_v17, 2  ;;  %v5206_v28 = vld [vmem:[#allocation5_spill] sm:$0xff] }
 0x12c   : > { %v1247_v54 = vpop.f32.mrf.mxu0  ;;  %v3255_v35 = vpop.f32.mrf.mxu1  ;;  %3458 = vmatmul.mubr.msk.bf16.gmra.mxu1 %vm527_vm2, %v5193_v32 }
 0x12d   : > { %v4537_v61 = vadd.f32 %v1234_v43, %v894_v40  ;;  %v915_v59 = vadd.f32 %v3255_v35, %v4364_v62  ;;  %3461 = vmatprep.mubr.msk.bf16.mxu1 %vm527_vm2, %v3953_v34  ;;  %v2149_v34 = vrot.slane %v324_v30, 1  ;;  %v2355_v16 = vsel %vm953_vm3, %v2353_v53, %v2354_v50 }
 0x12e   : > { %v3290_v42 = vpop.f32.mrf.mxu0  ;;  %v906_v27 = vpop.f32.mrf.mxu1 }
 0x12f   : > { %v4542_v10 = vadd.f32 %v3289_v38, %v915_v59  ;;  %v907_v19 = vadd.f32 %v906_v27, %v4372_v49  ;;  %v2357_v49 = vsel %vm953_vm3, %v2354_v50, %v2356_v45  ;;  %v2150_v44 = vsel %vm398_vm1, %v2147_v15, %v2149_v34  ;;  %v5207_v59 = vld [vmem:[#allocation6_spill] sm:$0xff]  ;;  %v5208_v45 = vld [vmem:[#allocation7_spill] sm:$0xff] }
 0x130   : > { %v1250_v29 = vpop.f32.mrf.mxu0  ;;  %v3256_v32 = vpop.f32.mrf.mxu1  ;;  %v2360_v43 = vpack.c.bf16 %v2357_v49, %v2355_v16  ;;  %v5210_v16 = vld [vmem:[#allocation9_spill] sm:$0xff] }
 0x131   : > { %v4545_v4 = vadd.f32 %v1247_v54, %v907_v19  ;;  %v918_v62 = vadd.f32 %v3256_v32, %v4378_v56  ;;  %v5209_v32 = vld [vmem:[#allocation8_spill] sm:$0xff] }
 0x132   : > { %v3293_v51 = vpop.f32.mrf.mxu0  ;;  %3496 = vmatmul.mubr.msk.bf16.gmra.mxu0 %vm527_vm2, %v4212_v55  ;;  %v909_v22 = vpop.f32.mrf.mxu1  ;;  %v2148_v55 = vsel %vm398_vm1, %v2146_v33, %v2147_v15 }
 0x133   : > { %3499 = vmatprep.mubr.msk.bf16.mxu0 %vm527_vm2, %v4220_v3  ;;  %v4554_v13 = vadd.f32 %v3290_v42, %v918_v62  ;;  %v910_v14 = vadd.f32 %v909_v22, %v4380_v25  ;;  %v2153_v1 = vpack.c.bf16 %v2150_v44, %v2148_v55  ;;  %v5211_v55 = vld [vmem:[#allocation10_spill] sm:$0xff] }
 0x134   : > { %v1263_v12 = vpop.f32.mrf.mxu0  ;;  %v3259_v48 = vpop.f32.mrf.mxu1  ;;  %3462 = vmatmul.mubr.msk.bf16.gmra.mxu1 %vm527_vm2, %v3984_v23 }
 0x135   : > { %v4560_v56 = vadd.f32 %v1250_v29, %v910_v14  ;;  %v931_v36 = vadd.f32 %v3259_v48, %v5203_v57  ;;  %3465 = vmatprep.mubr.msk.bf16.mxu1 %vm527_vm2, %v5204_v26 }
 0x136   : > { %v3294_v3 = vpop.f32.mrf.mxu0  ;;  %v922_v7 = vpop.f32.mrf.mxu1 }
 0x137   : > { %v4566_v25 = vadd.f32 %v3293_v51, %v931_v36  ;;  %v923_v37 = vadd.f32 %v922_v7, %v5205_v31 }
 0x138   : > { %v1266_v38 = vpop.f32.mrf.mxu0  ;;  %v3260_v23 = vpop.f32.mrf.mxu1 }
 0x139   : > { %v4569_v17 = vadd.f32 %v1263_v12, %v923_v37  ;;  %v934_v30 = vadd.f32 %v3260_v23, %v5206_v28 }
 0x13a   : > { %v3297_v40 = vpop.f32.mrf.mxu0  ;;  %3500 = vmatmul.mubr.msk.bf16.gmra.mxu0 %vm527_vm2, %v2360_v43  ;;  %v925_v54 = vpop.f32.mrf.mxu1 }
 0x13b   : > { %v4573_v35 = vadd.f32 %v3294_v3, %v934_v30  ;;  %v926_v42 = vadd.f32 %v925_v54, %v5207_v59 }
 0x13c   : > { %v1279_v53 = vpop.f32.mrf.mxu0  ;;  %v3263_v50 = vpop.f32.mrf.mxu1  ;;  %3466 = vmatmul.mubr.msk.bf16.gmra.mxu1 %vm527_vm2, %v2153_v1 }
 0x13d   : > { %v4577_v27 = vadd.f32 %v1266_v38, %v926_v42  ;;  %v947_v19 = vadd.f32 %v3263_v50, %v5208_v45 }
 0x13e   : > { %v3298_v29 = vpop.f32.mrf.mxu0  ;;  %v938_v33 = vpop.f32.mrf.mxu1 }
 0x13f   : > { %v4580_v15 = vadd.f32 %v3297_v40, %v947_v19  ;;  %v939_v62 = vadd.f32 %v938_v33, %v5209_v32 }
 0x140   : > { %v1282_v51 = vpop.f32.mrf.mxu0  ;;  %v3264_v34 = vpop.f32.mrf.mxu1 }
 0x141   : > { %v4583_v22 = vadd.f32 %v1279_v53, %v939_v62  ;;  %v950_v49 = vadd.f32 %v3264_v34, %v5210_v16 }
 0x142   : > { %v3337_v14 = vpop.f32.mrf.mxu0  ;;  %v941_v12 = vpop.f32.mrf.mxu1 }
 0x143   : > { %v4586_v48 = vadd.f32 %v3298_v29, %v950_v49  ;;  %v942_v57 = vadd.f32 %v941_v12, %v5211_v55 }
 0x144   : > { %v1577_v36 = vpop.f32.mrf.mxu0  ;;  %v3303_v3 = vpop.f32.mrf.mxu1 }
 0x145   : > { %v4589_v26 = vadd.f32 %v1282_v51, %v942_v57  ;;  %v1496_v44 = vadd.f32 %v3303_v3, %v4441_v52 }
 0x146   : > { %v3338_v43 = vpop.f32.mrf.mxu0  ;;  %v1367_v7 = vpop.f32.mrf.mxu1 }
 0x147   : > { %v4592_v31 = vadd.f32 %v3337_v14, %v1496_v44  ;;  %v1494_v37 = vadd.f32 %v1367_v7, %v4443_v24 }
 0x148   : > { %v1580_v38 = vpop.f32.mrf.mxu0  ;;  %v3304_v23 = vpop.f32.mrf.mxu1 }
 0x149   : > { %v4595_v1 = vadd.f32 %v1577_v36, %v1494_v37  ;;  %v1497_v28 = vadd.f32 %v3304_v23, %v4449_v20 }
 0x14a   : > { %v3341_v30 = vpop.f32.mrf.mxu0  ;;  %v1370_v40 = vpop.f32.mrf.mxu1 }
 0x14b   : > { %v4598_v54 = vadd.f32 %v3338_v43, %v1497_v28  ;;  %v1495_v59 = vadd.f32 %v1370_v40, %v4454_v6 }
 0x14c   : > { %v1593_v42 = vpop.f32.mrf.mxu0  ;;  %v3307_v52 = vpop.f32.mrf.mxu1 }
 0x14d   : > { %v4601_v53 = vadd.f32 %v1580_v38, %v1495_v59  ;;  %v1500_v50 = vadd.f32 %v3307_v52, %v4459_v0 }
 0x14e   : > { %v3342_v45 = vpop.f32.mrf.mxu0  ;;  %v1383_v24 = vpop.f32.mrf.mxu1 }
 0x14f   : > { %v4604_v19 = vadd.f32 %v3341_v30, %v1500_v50  ;;  %v1498_v29 = vadd.f32 %v1383_v24, %v4462_v11 }
 0x150   : > { %v1596_v33 = vpop.f32.mrf.mxu0  ;;  %v3308_v20 = vpop.f32.mrf.mxu1 }
 0x151   : > { %v4607_v32 = vadd.f32 %v1593_v42, %v1498_v29  ;;  %v1501_v62 = vadd.f32 %v3308_v20, %v4469_v47 }
 0x152   : > { %v3345_v51 = vpop.f32.mrf.mxu0  ;;  %v1386_v6 = vpop.f32.mrf.mxu1 }
 0x153   : > { %v4610_v34 = vadd.f32 %v3342_v45, %v1501_v62  ;;  %v1499_v16 = vadd.f32 %v1386_v6, %v4474_v18 }
 0x154   : > { %v1609_v49 = vpop.f32.mrf.mxu0  ;;  %v3311_v0 = vpop.f32.mrf.mxu1 }
 0x155   : > { %v4613_v14 = vadd.f32 %v1596_v33, %v1499_v16  ;;  %v1504_v12 = vadd.f32 %v3311_v0, %v4479_v60 }
 0x156   : > { %v3346_v55 = vpop.f32.mrf.mxu0  ;;  %v1399_v11 = vpop.f32.mrf.mxu1 }
 0x157   : > { %v4616_v57 = vadd.f32 %v3345_v51, %v1504_v12  ;;  %v1502_v36 = vadd.f32 %v1399_v11, %v4482_v21 }
 0x158   : > { %v1612_v3 = vpop.f32.mrf.mxu0  ;;  %v3312_v47 = vpop.f32.mrf.mxu1 }
 0x159   : > { %v4619_v44 = vadd.f32 %v1609_v49, %v1502_v36  ;;  %v1505_v43 = vadd.f32 %v3312_v47, %v4489_v41 }
 0x15a   : > { %v3349_v7 = vpop.f32.mrf.mxu0  ;;  %v1402_v18 = vpop.f32.mrf.mxu1 }
 0x15b   : > { %v4622_v37 = vadd.f32 %v3346_v55, %v1505_v43  ;;  %v1503_v38 = vadd.f32 %v1402_v18, %v4494_v2 }
 0x15c   : > { %v1625_v23 = vpop.f32.mrf.mxu0  ;;  %v3315_v60 = vpop.f32.mrf.mxu1 }
 0x15d   : > { %v4625_v28 = vadd.f32 %v1612_v3, %v1503_v38  ;;  %v1508_v30 = vadd.f32 %v3315_v60, %v4499_v8 }
 0x15e   : > { %v3350_v40 = vpop.f32.mrf.mxu0  ;;  %v1415_v21 = vpop.f32.mrf.mxu1 }
 0x15f   : > { %v4628_v59 = vadd.f32 %v3349_v7, %v1508_v30  ;;  %v1506_v42 = vadd.f32 %v1415_v21, %v4502_v46 }
 0x160   : > { %v1628_v52 = vpop.f32.mrf.mxu0  ;;  %v3316_v41 = vpop.f32.mrf.mxu1 }
 0x161   : > { %v4631_v50 = vadd.f32 %v1625_v23, %v1506_v42  ;;  %v1509_v45 = vadd.f32 %v3316_v41, %v4509_v39 }
 0x162   : > { %v3353_v24 = vpop.f32.mrf.mxu0  ;;  %v1418_v2 = vpop.f32.mrf.mxu1 }
 0x163   : > { %v4634_v29 = vadd.f32 %v3350_v40, %v1509_v45  ;;  %v1507_v33 = vadd.f32 %v1418_v2, %v4514_v63 }
 0x164   : > { %v1641_v20 = vpop.f32.mrf.mxu0  ;;  %v3319_v8 = vpop.f32.mrf.mxu1 }
 0x165   : > { %v4637_v62 = vadd.f32 %v1628_v52, %v1507_v33  ;;  %v1512_v51 = vadd.f32 %v3319_v8, %v4519_v9 }
 0x166   : > { %v3354_v6 = vpop.f32.mrf.mxu0  ;;  %v1431_v46 = vpop.f32.mrf.mxu1 }
 0x167   : > { %v4640_v16 = vadd.f32 %v3353_v24, %v1512_v51  ;;  %v1510_v49 = vadd.f32 %v1431_v46, %v4523_v58 }
 0x168   : > { %v1644_v0 = vpop.f32.mrf.mxu0  ;;  %v3320_v39 = vpop.f32.mrf.mxu1 }
 0x169   : > { %v4643_v12 = vadd.f32 %v1641_v20, %v1510_v49  ;;  %v1513_v55 = vadd.f32 %v3320_v39, %v4532_v5 }
 0x16a   : > { %v3357_v11 = vpop.f32.mrf.mxu0  ;;  %v1434_v63 = vpop.f32.mrf.mxu1 }
 0x16b   : > { %v4646_v36 = vadd.f32 %v3354_v6, %v1513_v55  ;;  %v1511_v3 = vadd.f32 %v1434_v63, %v4537_v61 }
 0x16c   : > { %v1657_v47 = vpop.f32.mrf.mxu0  ;;  %v3323_v9 = vpop.f32.mrf.mxu1 }
 0x16d   : > { %v4649_v43 = vadd.f32 %v1644_v0, %v1511_v3  ;;  %v1516_v7 = vadd.f32 %v3323_v9, %v4542_v10 }
 0x16e   : > { %v3358_v18 = vpop.f32.mrf.mxu0  ;;  %v1447_v58 = vpop.f32.mrf.mxu1 }
 0x16f   : > { %5212 = vst [vmem:[#allocation3_spill] sm:$0xff] %v4649_v43  ;;  %v4652_v38 = vadd.f32 %v3357_v11, %v1516_v7  ;;  %v1514_v23 = vadd.f32 %v1447_v58, %v4545_v4 }
 0x170   : > { %v1660_v60 = vpop.f32.mrf.mxu0  ;;  %v3324_v5 = vpop.f32.mrf.mxu1 }
 0x171   : > { %5213 = vst [vmem:[#allocation2_spill] sm:$0xff] %v4652_v38  ;;  %v4655_v30 = vadd.f32 %v1657_v47, %v1514_v23  ;;  %v1517_v40 = vadd.f32 %v3324_v5, %v4554_v13 }
 0x172   : > { %v3361_v21 = vpop.f32.mrf.mxu0  ;;  %v1450_v61 = vpop.f32.mrf.mxu1 }
 0x173   : > { %5214 = vst [vmem:[#allocation4_spill] sm:$0xff] %v4655_v30  ;;  %v4658_v42 = vadd.f32 %v3358_v18, %v1517_v40  ;;  %v1515_v52 = vadd.f32 %v1450_v61, %v4560_v56 }
 0x174   : > { %v1673_v41 = vpop.f32.mrf.mxu0  ;;  %v3327_v10 = vpop.f32.mrf.mxu1 }
 0x175   : > { %5215 = vst [vmem:[#allocation5_spill] sm:$0xff] %v4658_v42  ;;  %v4661_v45 = vadd.f32 %v1660_v60, %v1515_v52  ;;  %v1520_v24 = vadd.f32 %v3327_v10, %v4566_v25 }
 0x176   : > { %v3362_v2 = vpop.f32.mrf.mxu0  ;;  %v1463_v4 = vpop.f32.mrf.mxu1 }
 0x177   : > { %5216 = vst [vmem:[#allocation6_spill] sm:$0xff] %v4661_v45  ;;  %v4664_v33 = vadd.f32 %v3361_v21, %v1520_v24  ;;  %v1518_v20 = vadd.f32 %v1463_v4, %v4569_v17 }
 0x178   : > { %v1676_v8 = vpop.f32.mrf.mxu0  ;;  %v3328_v13 = vpop.f32.mrf.mxu1 }
 0x179   : > { %5217 = vst [vmem:[#allocation7_spill] sm:$0xff] %v4664_v33  ;;  %v4667_v51 = vadd.f32 %v1673_v41, %v1518_v20  ;;  %v1521_v6 = vadd.f32 %v3328_v13, %v4573_v35 }
 0x17a   : > { %v3365_v46 = vpop.f32.mrf.mxu0  ;;  %v1466_v56 = vpop.f32.mrf.mxu1 }
 0x17b   : > { %5218 = vst [vmem:[#allocation8_spill] sm:$0xff] %v4667_v51  ;;  %v4670_v49 = vadd.f32 %v3362_v2, %v1521_v6  ;;  %v1519_v0 = vadd.f32 %v1466_v56, %v4577_v27 }
 0x17c   : > { %v1689_v39 = vpop.f32.mrf.mxu0  ;;  %v3331_v25 = vpop.f32.mrf.mxu1 }
 0x17d   : > { %5219 = vst [vmem:[#allocation9_spill] sm:$0xff] %v4670_v49  ;;  %v4673_v55 = vadd.f32 %v1676_v8, %v1519_v0  ;;  %v1524_v11 = vadd.f32 %v3331_v25, %v4580_v15 }
 0x17e   : > { %v3366_v63 = vpop.f32.mrf.mxu0  ;;  %v1479_v17 = vpop.f32.mrf.mxu1 }
 0x17f   : > { %5220 = vst [vmem:[#allocation10_spill] sm:$0xff] %v4673_v55  ;;  %v4676_v3 = vadd.f32 %v3365_v46, %v1524_v11  ;;  %v1522_v47 = vadd.f32 %v1479_v17, %v4583_v22 }
 0x180   : > { %v1692_v9 = vpop.f32.mrf.mxu0  ;;  %v3332_v35 = vpop.f32.mrf.mxu1 }
 0x181   : > { %5221 = vst [vmem:[#allocation11_spill] sm:$0xff] %v4676_v3  ;;  %v4679_v7 = vadd.f32 %v1689_v39, %v1522_v47  ;;  %v1525_v18 = vadd.f32 %v3332_v35, %v4586_v48 }
 0x182   : > { %v4682_v58 = vpop.f32.mrf.mxu0  ;;  %v1482_v27 = vpop.f32.mrf.mxu1 }
 0x183   : > { %5222 = vst [vmem:[#allocation12_spill] sm:$0xff] %v4679_v7  ;;  %v4684_v23 = vadd.f32 %v3366_v63, %v1525_v18  ;;  %v1523_v60 = vadd.f32 %v1482_v27, %v4589_v26 }
 0x184   : > { %v4687_v15 = vpop.f32.mrf.mxu0  ;;  %v3371_v5 = vpop.f32.mrf.mxu1 }
 0x185   : > { %5223 = vst [vmem:[#allocation13_spill] sm:$0xff] %v4684_v23  ;;  %v4689_v40 = vadd.f32 %v1692_v9, %v1523_v60 }
 0x186   : > { %v4691_v21 = vpop.f32.mrf.mxu0  ;;  %v4693_v22 = vpop.f32.mrf.mxu1 }
 0x187   : > { %5224 = vst [vmem:[#allocation14_spill] sm:$0xff] %v4689_v40 }
 0x188   : > { %v4695_v61 = vpop.f32.mrf.mxu0  ;;  %v3372_v52 = vpop.f32.mrf.mxu1 }
 0x18a   : > { %v4697_v48 = vpop.f32.mrf.mxu0  ;;  %v1787_v41 = vpop.f32.mrf.mxu1 }
 0x18c   : > { %v4699_v10 = vpop.f32.mrf.mxu0  ;;  %v3375_v24 = vpop.f32.mrf.mxu1 }
 0x18e   : > { %v4701_v2 = vpop.f32.mrf.mxu0  ;;  %v4703_v26 = vpop.f32.mrf.mxu1 }
 0x190   : > { %v4705_v4 = vpop.f32.mrf.mxu0  ;;  %v4707_v20 = vpop.f32.mrf.mxu1 }
 0x192   : > { %v4709_v8 = vpop.f32.mrf.mxu0  ;;  %v4711_v13 = vpop.f32.mrf.mxu1 }
 0x194   : > { %v4713_v6 = vpop.f32.mrf.mxu0  ;;  %v4715_v46 = vpop.f32.mrf.mxu1 }
 0x196   : > { %v4717_v56 = vpop.f32.mrf.mxu0  ;;  %v4719_v0 = vpop.f32.mrf.mxu1 }
 0x198   : > { %v4721_v39 = vpop.f32.mrf.mxu0  ;;  %v4723_v25 = vpop.f32.mrf.mxu1 }
 0x19a   : > { %v4725_v11 = vpop.f32.mrf.mxu0  ;;  %v4727_v63 = vpop.f32.mrf.mxu1 }
 0x19c   : > { %v4729_v17 = vpop.f32.mrf.mxu0  ;;  %v4731_v47 = vpop.f32.mrf.mxu1 }
 0x19e   : > { %v4733_v9 = vpop.f32.mrf.mxu0  ;;  %v4735_v35 = vpop.f32.mrf.mxu1 }
 0x1a0   : > { %v4737_v18 = vpop.f32.mrf.mxu0  ;;  %v4739_v27 = vpop.f32.mrf.mxu1 }
 0x1a1   : > { %5225 = vst [vmem:[#allocation15_spill] sm:$0xff] %v4737_v18 }
 0x1a2   : > { %v4741_v60 = vpop.f32.mrf.mxu0  ;;  %v4743_v40 = vpop.f32.mrf.mxu1 }
 0x1a3   : > { %5226 = vst [vmem:[#allocation16_spill] sm:$0xff] %v4741_v60 }
 0x1a4   : > { %v4745_v23 = vpop.f32.mrf.mxu0  ;;  %v4747_v7 = vpop.f32.mrf.mxu1 }
 0x1a5   : > { %5227 = vst [vmem:[#allocation17_spill] sm:$0xff] %v4745_v23 }
 0x1a6   : > { %v4749_v3 = vpop.f32.mrf.mxu0  ;;  %v4751_v55 = vpop.f32.mrf.mxu1 }
 0x1a7   : > { %5228 = vst [vmem:[#allocation18_spill] sm:$0xff] %v4749_v3 }
 0x1a8   : > { %v4753_v49 = vpop.f32.mrf.mxu0  ;;  %v4755_v51 = vpop.f32.mrf.mxu1 }
 0x1a9   : > { %5229 = vst [vmem:[#allocation19_spill] sm:$0xff] %v4753_v49 }
 0x1aa   : > { %v4757_v33 = vpop.f32.mrf.mxu0  ;;  %v4759_v45 = vpop.f32.mrf.mxu1 }
 0x1ab   : > { %5230 = vst [vmem:[#allocation20_spill] sm:$0xff] %v4757_v33  ;;  %5231 = vst [vmem:[#allocation21_spill] sm:$0xff] %v4759_v45 }
 0x1ac   : > { %v4761_v42 = vpop.f32.mrf.mxu0  ;;  %v4763_v30 = vpop.f32.mrf.mxu1 }
 0x1ad   : > { %5232 = vst [vmem:[#allocation22_spill] sm:$0xff] %v4761_v42  ;;  %5233 = vst [vmem:[#allocation23_spill] sm:$0xff] %v4763_v30 }
 0x1ae   : > { %v4765_v38 = vpop.f32.mrf.mxu0  ;;  %v4767_v43 = vpop.f32.mrf.mxu1 }
 0x1af   : > { %5234 = vst [vmem:[#allocation24_spill] sm:$0xff] %v4765_v38 }
 0x1b0   : > { %v4769_v3 = vpop.f32.mrf.mxu0  ;;  %v4771_v23 = vpop.f32.mrf.mxu1 }
 0x1b1   : > { %5235 = vst [vmem:[#allocation25_spill] sm:$0xff] %v4769_v3  ;;  %5236 = vst [vmem:[#allocation26_spill] sm:$0xff] %v4771_v23 }
 0x1b2   : > { %v4773_v49 = vpop.f32.mrf.mxu0  ;;  %v4775_v60 = vpop.f32.mrf.mxu1 }
 0x1b3   : > { %5237 = vst [vmem:[#allocation27_spill] sm:$0xff] %v4773_v49  ;;  %5238 = vst [vmem:[#allocation28_spill] sm:$0xff] %v4775_v60 }
 0x1b4   : > { %v4777_v33 = vpop.f32.mrf.mxu0  ;;  %v4779_v18 = vpop.f32.mrf.mxu1 }
 0x1b5   : > { %5239 = vst [vmem:[#allocation29_spill] sm:$0xff] %v4777_v33  ;;  %5240 = vst [vmem:[#allocation30_spill] sm:$0xff] %v4779_v18 }
 0x1b6   : > { %v4781_v45 = vpop.f32.mrf.mxu0  ;;  %v4783_v42 = vpop.f32.mrf.mxu1 }
 0x1b7   : > { %5241 = vst [vmem:[#allocation31_spill] sm:$0xff] %v4781_v45  ;;  %5242 = vst [vmem:[#allocation32_spill] sm:$0xff] %v4783_v42  ;;  %v1913_v45 = vadd.f32 %v3371_v5, %v4592_v31  ;;  %v1915_v5 = vadd.f32 %v4703_v26, %v4607_v32  ;;  %v1921_v32 = vadd.f32 %v4715_v46, %v4616_v57 }
 0x1b8   : > { %v4785_v30 = vpop.f32.mrf.mxu0  ;;  %v4787_v38 = vpop.f32.mrf.mxu1  ;;  %v1920_v57 = vadd.f32 %v4727_v63, %v4625_v28 }
 0x1b9   : > { %5243 = vst [vmem:[#allocation33_spill] sm:$0xff] %v4785_v30  ;;  %5244 = vst [vmem:[#allocation34_spill] sm:$0xff] %v4787_v38  ;;  %v2121_v26 = vadd.f32 %v4709_v8, %v1921_v32 }
 0x1ba   : > { %v4790_v3 = vpop.f32.mrf.mxu0  ;;  %v4792_v23 = vpop.f32.mrf.mxu1 }
 0x1bb   : > { %5245 = vst [vmem:[#allocation35_spill] sm:$0xff] %v4790_v3  ;;  %5246 = vst [vmem:[#allocation36_spill] sm:$0xff] %v4792_v23  ;;  %v1911_v3 = vadd.f32 %v4693_v22, %v4595_v1  ;;  %v1914_v23 = vadd.f32 %v3372_v52, %v4598_v54 }
 0x1bc   : > { %v4794_v49 = vpop.f32.mrf.mxu0  ;;  %v4796_v60 = vpop.f32.mrf.mxu1 }
 0x1bd   : > { %5247 = vst [vmem:[#allocation37_spill] sm:$0xff] %v4794_v49  ;;  %5248 = vst [vmem:[#allocation38_spill] sm:$0xff] %v4796_v60  ;;  %v1912_v49 = vadd.f32 %v1787_v41, %v4601_v53  ;;  %v1917_v60 = vadd.f32 %v3375_v24, %v4604_v19  ;;  %v2111_v1 = vadd.f32 %v4687_v15, %v1911_v3 }
 0x1be   : > { %v4798_v33 = vpop.f32.mrf.mxu0  ;;  %v4800_v18 = vpop.f32.mrf.mxu1  ;;  %v2114_v54 = vadd.f32 %v4691_v21, %v1914_v23  ;;  %v1922_v3 = vadd.f32 %v4723_v25, %v4622_v37  ;;  %v1925_v21 = vadd.f32 %v4731_v47, %v4628_v59  ;;  %v1924_v37 = vadd.f32 %v4743_v40, %v4637_v62  ;;  %v5255_v47 = vld [vmem:[#allocation3_spill] sm:$0xff] }
 0x1bf   : > { %5249 = vst [vmem:[#allocation39_spill] sm:$0xff] %v4798_v33  ;;  %5250 = vst [vmem:[#allocation40_spill] sm:$0xff] %v4800_v18  ;;  %v2113_v18 = vadd.f32 %v4682_v58, %v1913_v45  ;;  %v2112_v53 = vadd.f32 %v4695_v61, %v1912_v49  ;;  %v2117_v19 = vadd.f32 %v4697_v48, %v1917_v60 }
 0x1c0   : > { %v4803_v42 = vpop.f32.mrf.mxu0  ;;  %v4805_v30 = vpop.f32.mrf.mxu1  ;;  %v1918_v45 = vadd.f32 %v4707_v20, %v4610_v34  ;;  %v1916_v58 = vadd.f32 %v4711_v13, %v4613_v14  ;;  %v2115_v14 = vadd.f32 %v4699_v10, %v1915_v5  ;;  %v1923_v61 = vadd.f32 %v4735_v35, %v4631_v50  ;;  %v5257_v5 = vld [vmem:[#allocation18_spill] sm:$0xff] }
 0x1c1   : > { %5251 = vst [vmem:[#allocation41_spill] sm:$0xff] %v4803_v42  ;;  %v1929_v50 = vadd.f32 %v4747_v7, %v4640_v16  ;;  %v1927_v24 = vadd.f32 %v4751_v55, %v4643_v12  ;;  %v4860_v40 = vadd.f32 %v4717_v56, %v1922_v3  ;;  %v4865_v20 = vadd.f32 %v4721_v39, %v1920_v57  ;;  %v5253_v39 = vld [vmem:[#allocation16_spill] sm:$0xff] }
 0x1c2   : > { %v3473_v38 = vpop.f32.mrf.mxu0  ;;  %v4812_v33 = vpop.f32.mrf.mxu1  ;;  %v2118_v28 = vadd.f32 %v4701_v2, %v1918_v45  ;;  %v2116_v59 = vadd.f32 %v4705_v4, %v1916_v58  ;;  %v4868_v16 = vadd.f32 %v4725_v11, %v1925_v21  ;;  %v1930_v12 = vadd.f32 %v4755_v51, %v4646_v36  ;;  %v5254_v36 = vld [vmem:[#allocation17_spill] sm:$0xff]  ;;  %v5259_v45 = vld [vmem:[#allocation23_spill] sm:$0xff] }
 0x1c3   : > { %v4873_v8 = vadd.f32 %v4729_v17, %v1923_v61  ;;  %v4884_v25 = vadd.f32 %v5253_v39, %v1929_v50  ;;  %v4887_v51 = vadd.f32 %v5254_v36, %v1927_v24  ;;  %v5260_v61 = vld [vmem:[#allocation19_spill] sm:$0xff] }
 0x1c4   : > { %v2401_v31 = vpop.f32.mrf.mxu0  ;;  %v3439_v42 = vpop.f32.mrf.mxu1 }
 0x1c5   : > { %v2323_v22 = vadd.f32 %v3439_v42, %v2113_v18  ;;  %v1919_v42 = vadd.f32 %v4719_v0, %v4619_v44  ;;  %v1926_v44 = vadd.f32 %v4739_v27, %v4634_v29 }
 0x1c6   : > { %v3474_v52 = vpop.f32.mrf.mxu0  ;;  %v2194_v49 = vpop.f32.mrf.mxu1 }
 0x1c7   : > { %v2530_v34 = vadd.f32 %v3473_v38, %v2323_v22  ;;  %v2321_v23 = vadd.f32 %v2194_v49, %v2111_v1  ;;  %v4857_v62 = vadd.f32 %v4713_v6, %v1919_v42  ;;  %v4876_v13 = vadd.f32 %v4733_v9, %v1926_v44  ;;  %v5252_v6 = vld [vmem:[#allocation15_spill] sm:$0xff]  ;;  %v5256_v9 = vld [vmem:[#allocation21_spill] sm:$0xff] }
 0x1c8   : > { %v2404_v15 = vpop.f32.mrf.mxu0  ;;  %v3440_v48 = vpop.f32.mrf.mxu1  ;;  %v4879_v46 = vadd.f32 %v5252_v6, %v1924_v37  ;;  %v1928_v35 = vadd.f32 %v5256_v9, %v5255_v47  ;;  %v4892_v1 = vadd.f32 %v5257_v5, %v1930_v12  ;;  %v5263_v5 = vld [vmem:[#allocation22_spill] sm:$0xff] }
 0x1c9   : > { %2563 = vst.msk [vmem:[%s4830_s19 + $0x10] sm:$0xff] %vm2560_vm4, %v2530_v34  ;;  %v2528_v38 = vadd.f32 %v2401_v31, %v2321_v23  ;;  %v2324_v41 = vadd.f32 %v3440_v48, %v2114_v54  ;;  %v2666_v18 = vmul.f32 %v2530_v34, %v2530_v34  ;;  %v2596_v32 = vsel %vm2560_vm4, %v2530_v34, 0.0 }
 0x1ca   : > { %v3477_v10 = vpop.f32.mrf.mxu0  ;;  %v2197_v29 = vpop.f32.mrf.mxu1  ;;  %v4906_v48 = vadd.f32 %v5260_v61, %v1928_v35 }
 0x1cb   : > { %2561 = vst.msk [vmem:[%s4830_s19] sm:$0xff] %vm2560_vm4, %v2528_v38  ;;  %v2531_v2 = vadd.f32 %v3474_v52, %v2324_v41  ;;  %v2322_v55 = vadd.f32 %v2197_v29, %v2112_v53  ;;  %v2664_v11 = vmul.f32 %v2528_v38, %v2528_v38  ;;  %v2593_v54 = vsel %vm2560_vm4, %v2528_v38, 0.0 }
 0x1cc   : > { %v2417_v4 = vpop.f32.mrf.mxu0  ;;  %v3443_v7 = vpop.f32.mrf.mxu1  ;;  %v2699_v44 = vsel %vm2560_vm4, %v2666_v18, 0.0 }
 0x1cd   : > { %2564 = vst.msk [vmem:[%s4830_s19 + $0x18] sm:$0xff] %vm2560_vm4, %v2531_v2  ;;  %v2327_v56 = vadd.f32 %v3443_v7, %v2117_v19  ;;  %v2529_v63 = vadd.f32 %v2404_v15, %v2322_v55  ;;  %v5258_v19 = vld [vmem:[#allocation2_spill] sm:$0xff]  ;;  %v2696_v23 = vsel %vm2560_vm4, %v2664_v11, 0.0  ;;  %v2667_v15 = vmul.f32 %v2531_v2, %v2531_v2 }
 0x1ce   : > { %v3478_v0 = vpop.f32.mrf.mxu0  ;;  %v2210_v17 = vpop.f32.mrf.mxu1  ;;  %v1933_v58 = vadd.f32 %v5259_v45, %v5258_v19  ;;  %v2598_v41 = vsel %vm2560_vm4, %v2531_v2, 0.0 }
 0x1cf   : > { %v2534_v27 = vadd.f32 %v3477_v10, %v2327_v56  ;;  %v2325_v60 = vadd.f32 %v2210_v17, %v2115_v14  ;;  %2562 = vst.msk [vmem:[%s4830_s19 + $0x8] sm:$0xff] %vm2560_vm4, %v2529_v63  ;;  %v2594_v53 = vsel %vm2560_vm4, %v2529_v63, 0.0  ;;  %v2665_v22 = vmul.f32 %v2529_v63, %v2529_v63  ;;  %v5262_v56 = vld [vmem:[#allocation20_spill] sm:$0xff] }
 0x1d0   : > { %v2420_v31 = vpop.f32.mrf.mxu0  ;;  %v3444_v52 = vpop.f32.mrf.mxu1  ;;  %v2595_v49 = vadd.f32 %v2594_v53, %v2593_v54  ;;  %v4915_v39 = vadd.f32 %v5262_v56, %v1933_v58  ;;  %v2701_v36 = vsel %vm2560_vm4, %v2667_v15, 0.0 }
 0x1d1   : > { %2567 = vst.msk [vmem:[%s4830_s19 + $0x30] sm:$0xff] %vm2560_vm4, %v2534_v27  ;;  %v2532_v42 = vadd.f32 %v2417_v4, %v2325_v60  ;;  %v2697_v14 = vsel %vm2560_vm4, %v2665_v22, 0.0  ;;  %v2328_v57 = vadd.f32 %v3444_v52, %v2118_v28  ;;  %v5261_v4 = vld [vmem:[#allocation4_spill] sm:$0xff] }
 0x1d2   : > { %v3481_v3 = vpop.f32.mrf.mxu0  ;;  %v2213_v21 = vpop.f32.mrf.mxu1  ;;  %v2597_v37 = vadd.f32 %v2596_v32, %v2595_v49  ;;  %v2698_v38 = vadd.f32 %v2697_v14, %v2696_v23  ;;  %v1931_v28 = vadd.f32 %v4767_v43, %v5261_v4  ;;  %v5264_v49 = vld [vmem:[#allocation5_spill] sm:$0xff]  ;;  %v5268_v4 = vld [vmem:[#allocation7_spill] sm:$0xff] }
 0x1d3   : > { %2565 = vst.msk [vmem:[%s4830_s19 + $0x20] sm:$0xff] %vm2560_vm4, %v2532_v42  ;;  %v2668_v10 = vmul.f32 %v2532_v42, %v2532_v42  ;;  %v2535_v50 = vadd.f32 %v3478_v0, %v2328_v57  ;;  %v2326_v24 = vadd.f32 %v2213_v21, %v2116_v59  ;;  %v2600_v11 = vsel %vm2560_vm4, %v2532_v42, 0.0  ;;  %v5265_v42 = vld [vmem:[#allocation26_spill] sm:$0xff] }
 0x1d4   : > { %v2433_v34 = vpop.f32.mrf.mxu0  ;;  %v3447_v29 = vpop.f32.mrf.mxu1  ;;  %v2700_v12 = vadd.f32 %v2699_v44, %v2698_v38  ;;  %v2599_v55 = vadd.f32 %v2598_v41, %v2597_v37  ;;  %v4927_v54 = vadd.f32 %v5263_v5, %v1931_v28  ;;  %v5269_v28 = vld [vmem:[#allocation30_spill] sm:$0xff] }
 0x1d5   : > { %v2331_v7 = vadd.f32 %v3447_v29, %v2121_v26  ;;  %2568 = vst.msk [vmem:[%s4830_s19 + $0x38] sm:$0xff] %vm2560_vm4, %v2535_v50  ;;  %v2533_v2 = vadd.f32 %v2420_v31, %v2326_v24  ;;  %v2670_v26 = vmul.f32 %v2534_v27, %v2534_v27  ;;  %v2703_v9 = vsel %vm2560_vm4, %v2668_v10, 0.0  ;;  %v5266_v24 = vld [vmem:[#allocation6_spill] sm:$0xff] }
 0x1d6   : > { %v3482_v6 = vpop.f32.mrf.mxu0  ;;  %v2226_v59 = vpop.f32.mrf.mxu1  ;;  %v2601_v0 = vadd.f32 %v2600_v11, %v2599_v55  ;;  %v2702_v63 = vadd.f32 %v2701_v36, %v2700_v12  ;;  %v2604_v31 = vsel %vm2560_vm4, %v2534_v27, 0.0  ;;  %v2671_v52 = vmul.f32 %v2535_v50, %v2535_v50 }
 0x1d7   : > { %v2538_v43 = vadd.f32 %v3481_v3, %v2331_v7  ;;  %v2329_v17 = vadd.f32 %v2226_v59, %v4857_v62  ;;  %2566 = vst.msk [vmem:[%s4830_s19 + $0x28] sm:$0xff] %vm2560_vm4, %v2533_v2  ;;  %v2602_v35 = vsel %vm2560_vm4, %v2533_v2, 0.0  ;;  %v2669_v18 = vmul.f32 %v2533_v2, %v2533_v2 }
 0x1d8   : > { %v2436_v47 = vpop.f32.mrf.mxu0  ;;  %v3448_v60 = vpop.f32.mrf.mxu1  ;;  %v2704_v53 = vadd.f32 %v2703_v9, %v2702_v63  ;;  %v2603_v22 = vadd.f32 %v2602_v35, %v2601_v0  ;;  %v1934_v3 = vadd.f32 %v5265_v42, %v5264_v49  ;;  %v2707_v57 = vsel %vm2560_vm4, %v2670_v26, 0.0 }
 0x1d9   : > { %2571 = vst.msk [vmem:[%s4830_s19 + $0x50] sm:$0xff] %vm2560_vm4, %v2538_v43  ;;  %v2705_v19 = vsel %vm2560_vm4, %v2669_v18, 0.0  ;;  %v2536_v45 = vadd.f32 %v2433_v34, %v2329_v17  ;;  %v2332_v58 = vadd.f32 %v3448_v60, %v4860_v40  ;;  %v2606_v21 = vsel %vm2560_vm4, %v2535_v50, 0.0  ;;  %v5270_v60 = vld [vmem:[#allocation24_spill] sm:$0xff] }
 0x1da   : > { %v3485_v62 = vpop.f32.mrf.mxu0  ;;  %v2229_v32 = vpop.f32.mrf.mxu1  ;;  %v2605_v23 = vadd.f32 %v2604_v31, %v2603_v22  ;;  %v2706_v15 = vadd.f32 %v2705_v19, %v2704_v53  ;;  %v1937_v12 = vadd.f32 %v5269_v28, %v5268_v4  ;;  %v2709_v50 = vsel %vm2560_vm4, %v2671_v52, 0.0 }
 0x1db   : > { %v2330_v27 = vadd.f32 %v2229_v32, %v4865_v20  ;;  %2569 = vst.msk [vmem:[%s4830_s19 + $0x40] sm:$0xff] %vm2560_vm4, %v2536_v45  ;;  %v2672_v61 = vmul.f32 %v2536_v45, %v2536_v45  ;;  %v2539_v44 = vadd.f32 %v3482_v6, %v2332_v58  ;;  %v5267_v20 = vld [vmem:[#allocation28_spill] sm:$0xff]  ;;  %v2608_v55 = vsel %vm2560_vm4, %v2536_v45, 0.0 }
 0x1dc   : > { %v2449_v14 = vpop.f32.mrf.mxu0  ;;  %v3451_v40 = vpop.f32.mrf.mxu1  ;;  %v2708_v37 = vadd.f32 %v2707_v57, %v2706_v15  ;;  %v2607_v38 = vadd.f32 %v2606_v21, %v2605_v23  ;;  %v1932_v29 = vadd.f32 %v5267_v20, %v5266_v24  ;;  %v2674_v2 = vmul.f32 %v2538_v43, %v2538_v43  ;;  %v5272_v23 = vld [vmem:[#allocation27_spill] sm:$0xff] }
 0x1dd   : > { %v2537_v34 = vadd.f32 %v2436_v47, %v2330_v27  ;;  %v2335_v41 = vadd.f32 %v3451_v40, %v4868_v16  ;;  %2572 = vst.msk [vmem:[%s4830_s19 + $0x58] sm:$0xff] %vm2560_vm4, %v2539_v44  ;;  %v2711_v59 = vsel %vm2560_vm4, %v2672_v61, 0.0  ;;  %v4958_v5 = vadd.f32 %v5270_v60, %v1934_v3  ;;  %v5273_v27 = vld [vmem:[#allocation8_spill] sm:$0xff] }
 0x1de   : > { %v3486_v10 = vpop.f32.mrf.mxu0  ;;  %v2242_v7 = vpop.f32.mrf.mxu1  ;;  %v2609_v6 = vadd.f32 %v2608_v55, %v2607_v38  ;;  %v2710_v56 = vadd.f32 %v2709_v50, %v2708_v37  ;;  %v2612_v31 = vsel %vm2560_vm4, %v2538_v43, 0.0  ;;  %v2675_v53 = vmul.f32 %v2539_v44, %v2539_v44 }
 0x1df   : > { %2570 = vst.msk [vmem:[%s4830_s19 + $0x48] sm:$0xff] %vm2560_vm4, %v2537_v34  ;;  %v2610_v16 = vsel %vm2560_vm4, %v2537_v34, 0.0  ;;  %v2673_v36 = vmul.f32 %v2537_v34, %v2537_v34  ;;  %v2542_v0 = vadd.f32 %v3485_v62, %v2335_v41  ;;  %v2333_v63 = vadd.f32 %v2242_v7, %v4873_v8 }
 0x1e0   : > { %v2452_v11 = vpop.f32.mrf.mxu0  ;;  %v3452_v17 = vpop.f32.mrf.mxu1  ;;  %v2712_v47 = vadd.f32 %v2711_v59, %v2710_v56  ;;  %v2611_v26 = vadd.f32 %v2610_v16, %v2609_v6  ;;  %v2715_v49 = vsel %vm2560_vm4, %v2674_v2, 0.0  ;;  %v2614_v42 = vsel %vm2560_vm4, %v2539_v44, 0.0 }
 0x1e1   : > { %v2713_v9 = vsel %vm2560_vm4, %v2673_v36, 0.0  ;;  %v2336_v35 = vadd.f32 %v3452_v17, %v4876_v13  ;;  %2575 = vst.msk [vmem:[%s4830_s19 + $0x70] sm:$0xff] %vm2560_vm4, %v2542_v0  ;;  %v2540_v22 = vadd.f32 %v2449_v14, %v2333_v63  ;;  %v5271_v13 = vld [vmem:[#allocation25_spill] sm:$0xff]  ;;  %v4972_v15 = vadd.f32 %v5272_v23, %v1937_v12  ;;  %v5274_v14 = vld [vmem:[#allocation32_spill] sm:$0xff] }
 0x1e2   : > { %v3489_v18 = vpop.f32.mrf.mxu0  ;;  %v2245_v62 = vpop.f32.mrf.mxu1  ;;  %v2613_v8 = vadd.f32 %v2612_v31, %v2611_v26  ;;  %v2714_v52 = vadd.f32 %v2713_v9, %v2712_v47  ;;  %v4965_v32 = vadd.f32 %v5271_v13, %v1932_v29  ;;  %v1935_v57 = vadd.f32 %v5274_v14, %v5273_v27  ;;  %v5275_v36 = vld [vmem:[#allocation9_spill] sm:$0xff] }
 0x1e3   : > { %v2543_v19 = vadd.f32 %v3486_v10, %v2336_v35  ;;  %v2334_v45 = vadd.f32 %v2245_v62, %v4879_v46  ;;  %2573 = vst.msk [vmem:[%s4830_s19 + $0x60] sm:$0xff] %vm2560_vm4, %v2540_v22  ;;  %v2676_v43 = vmul.f32 %v2540_v22, %v2540_v22  ;;  %v2717_v40 = vsel %vm2560_vm4, %v2675_v53, 0.0  ;;  %v5277_v47 = vld [vmem:[#allocation29_spill] sm:$0xff]  ;;  %v5278_v62 = vld [vmem:[#allocation10_spill] sm:$0xff] }
 0x1e4   : > { %v2465_v58 = vpop.f32.mrf.mxu0  ;;  %v3455_v3 = vpop.f32.mrf.mxu1  ;;  %v2716_v46 = vadd.f32 %v2715_v49, %v2714_v52  ;;  %v2615_v21 = vadd.f32 %v2614_v42, %v2613_v8  ;;  %v2616_v44 = vsel %vm2560_vm4, %v2540_v22, 0.0  ;;  %v2678_v41 = vmul.f32 %v2542_v0, %v2542_v0  ;;  %v5279_v8 = vld [vmem:[#allocation36_spill] sm:$0xff]  ;;  %v5280_v42 = vld [vmem:[#allocation31_spill] sm:$0xff] }
 0x1e5   : > { %2576 = vst.msk [vmem:[%s4830_s19 + $0x78] sm:$0xff] %vm2560_vm4, %v2543_v19  ;;  %v2541_v37 = vadd.f32 %v2452_v11, %v2334_v45  ;;  %v2339_v38 = vadd.f32 %v3455_v3, %v4884_v25  ;;  %v2719_v4 = vsel %vm2560_vm4, %v2676_v43, 0.0  ;;  %v2620_v2 = vsel %vm2560_vm4, %v2542_v0, 0.0 }
 0x1e6   : > { %v3490_v61 = vpop.f32.mrf.mxu0  ;;  %v2258_v34 = vpop.f32.mrf.mxu1  ;;  %v2617_v10 = vadd.f32 %v2616_v44, %v2615_v21  ;;  %v2718_v24 = vadd.f32 %v2717_v40, %v2716_v46  ;;  %v2679_v59 = vmul.f32 %v2543_v19, %v2543_v19  ;;  %v4994_v26 = vadd.f32 %v5277_v47, %v1935_v57 }
 0x1e7   : > { %v2337_v20 = vadd.f32 %v2258_v34, %v4887_v51  ;;  %2574 = vst.msk [vmem:[%s4830_s19 + $0x68] sm:$0xff] %vm2560_vm4, %v2541_v37  ;;  %v2618_v28 = vsel %vm2560_vm4, %v2541_v37, 0.0  ;;  %v2677_v12 = vmul.f32 %v2541_v37, %v2541_v37  ;;  %v2546_v50 = vadd.f32 %v3489_v18, %v2339_v38  ;;  %v5276_v51 = vld [vmem:[#allocation34_spill] sm:$0xff]  ;;  %v5281_v38 = vld [vmem:[#allocation33_spill] sm:$0xff] }
 0x1e8   : > { %v2468_v29 = vpop.f32.mrf.mxu0  ;;  %v3456_v55 = vpop.f32.mrf.mxu1  ;;  %v2720_v7 = vadd.f32 %v2719_v4, %v2718_v24  ;;  %v2619_v25 = vadd.f32 %v2618_v28, %v2617_v10  ;;  %v1938_v11 = vadd.f32 %v5276_v51, %v5275_v36  ;;  %v2723_v9 = vsel %vm2560_vm4, %v2678_v41, 0.0 }
 0x1e9   : > { %v2544_v6 = vadd.f32 %v2465_v58, %v2337_v20  ;;  %v2340_v56 = vadd.f32 %v3456_v55, %v4892_v1  ;;  %v2721_v63 = vsel %vm2560_vm4, %v2677_v12, 0.0  ;;  %2579 = vst.msk [vmem:[%s4830_s19 + $0x90] sm:$0xff] %vm2560_vm4, %v2546_v50  ;;  %v2622_v60 = vsel %vm2560_vm4, %v2543_v19, 0.0  ;;  %v5282_v55 = vld [vmem:[#allocation11_spill] sm:$0xff] }
 0x1ea   : > { %v3493_v16 = vpop.f32.mrf.mxu0  ;;  %v2261_v17 = vpop.f32.mrf.mxu1  ;;  %v2621_v35 = vadd.f32 %v2620_v2, %v2619_v25  ;;  %v2722_v18 = vadd.f32 %v2721_v63, %v2720_v7  ;;  %v1936_v52 = vadd.f32 %v5279_v8, %v5278_v62  ;;  %v5005_v43 = vadd.f32 %v5280_v42, %v1938_v11  ;;  %v5283_v7 = vld [vmem:[#allocation38_spill] sm:$0xff] }
 0x1eb   : > { %2577 = vst.msk [vmem:[%s4830_s19 + $0x80] sm:$0xff] %vm2560_vm4, %v2544_v6  ;;  %v2680_v0 = vmul.f32 %v2544_v6, %v2544_v6  ;;  %v2547_v31 = vadd.f32 %v3490_v61, %v2340_v56  ;;  %v2338_v53 = vadd.f32 %v2261_v17, %v4906_v48  ;;  %v2725_v3 = vsel %vm2560_vm4, %v2679_v59, 0.0 }
 0x1ec   : > { %v2481_v1 = vpop.f32.mrf.mxu0  ;;  %v3459_v22 = vpop.f32.mrf.mxu1  ;;  %v2724_v45 = vadd.f32 %v2723_v9, %v2722_v18  ;;  %v2623_v58 = vadd.f32 %v2622_v60, %v2621_v35  ;;  %v2624_v19 = vsel %vm2560_vm4, %v2544_v6, 0.0  ;;  %v2136_v34 = vadd.f32 %v5281_v38, %v1936_v52  ;;  %v5284_v35 = vld [vmem:[#allocation12_spill] sm:$0xff]  ;;  %v5288_v38 = vld [vmem:[#allocation37_spill] sm:$0xff] }
 0x1ed   : > { %v2343_v13 = vadd.f32 %v3459_v22, %v4915_v39  ;;  %2580 = vst.msk [vmem:[%s4830_s19 + $0x98] sm:$0xff] %vm2560_vm4, %v2547_v31  ;;  %v2545_v48 = vadd.f32 %v2468_v29, %v2338_v53  ;;  %v2682_v39 = vmul.f32 %v2546_v50, %v2546_v50  ;;  %v2727_v61 = vsel %vm2560_vm4, %v2680_v0, 0.0 }
 0x1ee   : > { %v3494_v49 = vpop.f32.mrf.mxu0  ;;  %v2274_v23 = vpop.f32.mrf.mxu1  ;;  %v2625_v27 = vadd.f32 %v2624_v19, %v2623_v58  ;;  %v2726_v14 = vadd.f32 %v2725_v3, %v2724_v45  ;;  %v2628_v41 = vsel %vm2560_vm4, %v2546_v50, 0.0  ;;  %v2683_v20 = vmul.f32 %v2547_v31, %v2547_v31 }
 0x1ef   : > { %v2550_v57 = vadd.f32 %v3493_v16, %v2343_v13  ;;  %v2341_v46 = vadd.f32 %v2274_v23, %v4927_v54  ;;  %2578 = vst.msk [vmem:[%s4830_s19 + $0x88] sm:$0xff] %vm2560_vm4, %v2545_v48  ;;  %v2626_v40 = vsel %vm2560_vm4, %v2545_v48, 0.0  ;;  %v2681_v44 = vmul.f32 %v2545_v48, %v2545_v48 }
 0x1f0   : > { %v2484_v21 = vpop.f32.mrf.mxu0  ;;  %v3460_v37 = vpop.f32.mrf.mxu1  ;;  %v2728_v10 = vadd.f32 %v2727_v61, %v2726_v14  ;;  %v2627_v24 = vadd.f32 %v2626_v40, %v2625_v27  ;;  %v1941_v25 = vadd.f32 %v5283_v7, %v5282_v55  ;;  %v2731_v36 = vsel %vm2560_vm4, %v2682_v39, 0.0  ;;  %v5287_v27 = vld [vmem:[#allocation35_spill] sm:$0xff] }
 0x1f1   : > { %2583 = vst.msk [vmem:[%s4830_s19 + $0xb0] sm:$0xff] %vm2560_vm4, %v2550_v57  ;;  %v2729_v29 = vsel %vm2560_vm4, %v2681_v44, 0.0  ;;  %v2548_v4 = vadd.f32 %v2481_v1, %v2341_v46  ;;  %v2344_v28 = vadd.f32 %v3460_v37, %v4958_v5  ;;  %v2630_v51 = vsel %vm2560_vm4, %v2547_v31, 0.0  ;;  %v5286_v1 = vld [vmem:[#allocation13_spill] sm:$0xff] }
 0x1f2   : > { %v3497_v54 = vpop.f32.mrf.mxu0  ;;  %v2277_v12 = vpop.f32.mrf.mxu1  ;;  %v2629_v6 = vadd.f32 %v2628_v41, %v2627_v24  ;;  %v2730_v56 = vadd.f32 %v2729_v29, %v2728_v10  ;;  %v1942_v60 = vadd.f32 %v4805_v30, %v5286_v1  ;;  %v2733_v0 = vsel %vm2560_vm4, %v2683_v20, 0.0  ;;  %v5290_v29 = vld [vmem:[#allocation14_spill] sm:$0xff] }
 0x1f3   : > { %v2342_v50 = vadd.f32 %v2277_v12, %v4965_v32  ;;  %2581 = vst.msk [vmem:[%s4830_s19 + $0xa0] sm:$0xff] %vm2560_vm4, %v2548_v4  ;;  %v2684_v11 = vmul.f32 %v2548_v4, %v2548_v4  ;;  %v2551_v2 = vadd.f32 %v3494_v49, %v2344_v28  ;;  %v5285_v32 = vld [vmem:[#allocation40_spill] sm:$0xff]  ;;  %v2632_v31 = vsel %vm2560_vm4, %v2548_v4, 0.0 }
 0x1f4   : > { %v2497_v16 = vpop.f32.mrf.mxu0  ;;  %v3463_v5 = vpop.f32.mrf.mxu1  ;;  %v2732_v59 = vadd.f32 %v2731_v36, %v2730_v56  ;;  %v2631_v63 = vadd.f32 %v2630_v51, %v2629_v6  ;;  %v1939_v18 = vadd.f32 %v5285_v32, %v5284_v35  ;;  %v2686_v45 = vmul.f32 %v2550_v57, %v2550_v57  ;;  %v5291_v32 = vld [vmem:[#allocation41_spill] sm:$0xff] }
 0x1f5   : > { %v2549_v17 = vadd.f32 %v2484_v21, %v2342_v50  ;;  %v2347_v47 = vadd.f32 %v3463_v5, %v4972_v15  ;;  %2584 = vst.msk [vmem:[%s4830_s19 + $0xb8] sm:$0xff] %vm2560_vm4, %v2551_v2  ;;  %v2735_v58 = vsel %vm2560_vm4, %v2684_v11, 0.0  ;;  %v2141_v14 = vadd.f32 %v5287_v27, %v1941_v25 }
 0x1f6   : > { %v3498_v9 = vpop.f32.mrf.mxu0  ;;  %v2290_v53 = vpop.f32.mrf.mxu1  ;;  %v2633_v22 = vadd.f32 %v2632_v31, %v2631_v63  ;;  %v2734_v62 = vadd.f32 %v2733_v0, %v2732_v59  ;;  %v2636_v46 = vsel %vm2560_vm4, %v2550_v57, 0.0  ;;  %v2687_v21 = vmul.f32 %v2551_v2, %v2551_v2 }
 0x1f7   : > { %2582 = vst.msk [vmem:[%s4830_s19 + $0xa8] sm:$0xff] %vm2560_vm4, %v2549_v17  ;;  %v2634_v15 = vsel %vm2560_vm4, %v2549_v17, 0.0  ;;  %v2685_v8 = vmul.f32 %v2549_v17, %v2549_v17  ;;  %v2554_v30 = vadd.f32 %v3497_v54, %v2347_v47  ;;  %v2345_v13 = vadd.f32 %v2290_v53, %v4994_v26  ;;  %v5289_v54 = vld [vmem:[#allocation39_spill] sm:$0xff] }
 0x1f8   : > { %v2500_v52 = vpop.f32.mrf.mxu0  ;;  %v3464_v49 = vpop.f32.mrf.mxu1  ;;  %v2736_v42 = vadd.f32 %v2735_v58, %v2734_v62  ;;  %v2635_v3 = vadd.f32 %v2634_v15, %v2633_v22  ;;  %v2139_v41 = vadd.f32 %v5288_v38, %v1939_v18  ;;  %v2739_v10 = vsel %vm2560_vm4, %v2686_v45, 0.0 }
 0x1f9   : > { %v2737_v19 = vsel %vm2560_vm4, %v2685_v8, 0.0  ;;  %v2348_v48 = vadd.f32 %v3464_v49, %v5005_v43  ;;  %2587 = vst.msk [vmem:[%s4830_s19 + $0xd0] sm:$0xff] %vm2560_vm4, %v2554_v30  ;;  %v2552_v39 = vadd.f32 %v2497_v16, %v2345_v13  ;;  %v2638_v43 = vsel %vm2560_vm4, %v2551_v2, 0.0 }
 0x1fa   : > { %v3501_v23 = vpop.f32.mrf.mxu0  ;;  %v2293_v61 = vpop.f32.mrf.mxu1  ;;  %v2637_v26 = vadd.f32 %v2636_v46, %v2635_v3  ;;  %v2738_v40 = vadd.f32 %v2737_v19, %v2736_v42  ;;  %v2142_v20 = vadd.f32 %v5289_v54, %v1942_v60  ;;  %v1940_v4 = vadd.f32 %v4812_v33, %v5290_v29 }
 0x1fb   : > { %v2555_v44 = vadd.f32 %v3498_v9, %v2348_v48  ;;  %v2346_v37 = vadd.f32 %v2293_v61, %v2136_v34  ;;  %2585 = vst.msk [vmem:[%s4830_s19 + $0xc0] sm:$0xff] %vm2560_vm4, %v2552_v39  ;;  %v2688_v24 = vmul.f32 %v2552_v39, %v2552_v39  ;;  %v2741_v55 = vsel %vm2560_vm4, %v2687_v21, 0.0 }
 0x1fc   : > { %v3467_v57 = vpop.f32.mrf.mxu1  ;;  %v2740_v28 = vadd.f32 %v2739_v10, %v2738_v40  ;;  %v2639_v12 = vadd.f32 %v2638_v43, %v2637_v26  ;;  %v2513_v34 = vpop.f32.mrf.mxu0  ;;  %v2640_v7 = vsel %vm2560_vm4, %v2552_v39, 0.0  ;;  %v2690_v50 = vmul.f32 %v2554_v30, %v2554_v30 }
 0x1fd   : > { %2588 = vst.msk [vmem:[%s4830_s19 + $0xd8] sm:$0xff] %vm2560_vm4, %v2555_v44  ;;  %v2553_v25 = vadd.f32 %v2500_v52, %v2346_v37  ;;  %v2351_v6 = vadd.f32 %v3467_v57, %v2141_v14  ;;  %v2743_v11 = vsel %vm2560_vm4, %v2688_v24, 0.0  ;;  %v2140_v18 = vadd.f32 %v5291_v32, %v1940_v4 }
 0x1fe   : > { %v2306_v56 = vpop.f32.mrf.mxu1  ;;  %v2641_v16 = vadd.f32 %v2640_v7, %v2639_v12  ;;  %v2742_v36 = vadd.f32 %v2741_v55, %v2740_v28  ;;  %v3502_v35 = vpop.f32.mrf.mxu0  ;;  %v2644_v1 = vsel %vm2560_vm4, %v2554_v30, 0.0  ;;  %v2691_v60 = vmul.f32 %v2555_v44, %v2555_v44 }
 0x1ff   : > { %v2349_v51 = vadd.f32 %v2306_v56, %v2139_v41  ;;  %2586 = vst.msk [vmem:[%s4830_s19 + $0xc8] sm:$0xff] %vm2560_vm4, %v2553_v25  ;;  %v2642_v33 = vsel %vm2560_vm4, %v2553_v25, 0.0  ;;  %v2689_v2 = vmul.f32 %v2553_v25, %v2553_v25  ;;  %v2558_v5 = vadd.f32 %v3501_v23, %v2351_v6 }
 0x200   : > { %v3468_v59 = vpop.f32.mrf.mxu1  ;;  %v2744_v63 = vadd.f32 %v2743_v11, %v2742_v36  ;;  %v2643_v17 = vadd.f32 %v2642_v33, %v2641_v16  ;;  %v2747_v53 = vsel %vm2560_vm4, %v2690_v50, 0.0  ;;  %v2646_v15 = vsel %vm2560_vm4, %v2555_v44, 0.0  ;;  %v2516_v13 = vpop.f32.mrf.mxu0 }
 0x201   : > { %v2556_v47 = vadd.f32 %v2513_v34, %v2349_v51  ;;  %v2352_v9 = vadd.f32 %v3468_v59, %v2142_v20  ;;  %v2745_v0 = vsel %vm2560_vm4, %v2689_v2, 0.0  ;;  %2591 = vst.msk [vmem:[%s4830_s19 + $0xf0] sm:$0xff] %vm2560_vm4, %v2558_v5  ;;  %v2749_v49 = vsel %vm2560_vm4, %v2691_v60, 0.0 }
 0x202   : > { %v2309_v31 = vpop.f32.mrf.mxu1  ;;  %v2645_v22 = vadd.f32 %v2644_v1, %v2643_v17  ;;  %v2746_v62 = vadd.f32 %v2745_v0, %v2744_v63  ;;  %v2694_v23 = vmul.f32 %v2558_v5, %v2558_v5  ;;  %v2652_v61 = vsel %vm2560_vm4, %v2558_v5, 0.0 }
 0x203   : > { %2589 = vst.msk [vmem:[%s4830_s19 + $0xe0] sm:$0xff] %vm2560_vm4, %v2556_v47  ;;  %v2692_v8 = vmul.f32 %v2556_v47, %v2556_v47  ;;  %v2559_v52 = vadd.f32 %v3502_v35, %v2352_v9  ;;  %v2350_v45 = vadd.f32 %v2309_v31, %v2140_v18  ;;  %v2648_v42 = vsel %vm2560_vm4, %v2556_v47, 0.0 }
 0x204   : > { %v2748_v58 = vadd.f32 %v2747_v53, %v2746_v62  ;;  %v2647_v30 = vadd.f32 %v2646_v15, %v2645_v22  ;;  %v2755_v38 = vsel %vm2560_vm4, %v2694_v23, 0.0 }
 0x205   : > { %2592 = vst.msk [vmem:[%s4830_s19 + $0xf8] sm:$0xff] %vm2560_vm4, %v2559_v52  ;;  %v2557_v3 = vadd.f32 %v2516_v13, %v2350_v45  ;;  %v2751_v27 = vsel %vm2560_vm4, %v2692_v8, 0.0  ;;  %v2695_v26 = vmul.f32 %v2559_v52, %v2559_v52  ;;  %v2654_v41 = vsel %vm2560_vm4, %v2559_v52, 0.0 }
 0x206   : > { %v2649_v19 = vadd.f32 %v2648_v42, %v2647_v30  ;;  %v2750_v48 = vadd.f32 %v2749_v49, %v2748_v58 }
 0x207   : > { %2590 = vst.msk [vmem:[%s4830_s19 + $0xe8] sm:$0xff] %vm2560_vm4, %v2557_v3  ;;  %v2650_v14 = vsel %vm2560_vm4, %v2557_v3, 0.0  ;;  %v2693_v46 = vmul.f32 %v2557_v3, %v2557_v3  ;;  %v2757_v24 = vsel %vm2560_vm4, %v2695_v26, 0.0 }
 0x208   : > { %v2752_v21 = vadd.f32 %v2751_v27, %v2750_v48  ;;  %v2651_v39 = vadd.f32 %v2650_v14, %v2649_v19 }
 0x209   : > { %v2753_v40 = vsel %vm2560_vm4, %v2693_v46, 0.0 }
 0x20a   : > { %v2653_v44 = vadd.f32 %v2652_v61, %v2651_v39  ;;  %v2754_v37 = vadd.f32 %v2753_v40, %v2752_v21 }
 0x20c   : > { %v2655_v10 = vadd.f32 %v2654_v41, %v2653_v44  ;;  %v2756_v43 = vadd.f32 %v2755_v38, %v2754_v37 }
 0x20e   : > { %v2656_v57 = vrot.slane %v2655_v10, 4  ;;  %v2758_v54 = vadd.f32 %v2757_v24, %v2756_v43 }
 0x210   : > { %v2657_v20 = vadd.f32 %v2656_v57, %v2655_v10  ;;  %v2759_v29 = vrot.slane %v2758_v54, 4 }
 0x212   : > { %v2658_v4 = vrot.slane %v2657_v20, 2  ;;  %v2760_v28 = vadd.f32 %v2759_v29, %v2758_v54 }
 0x214   : > { %v2659_v12 = vadd.f32 %v2658_v4, %v2657_v20  ;;  %v2761_v34 = vrot.slane %v2760_v28, 2 }
 0x216   : > { %v2660_v55 = vrot.slane %v2659_v12, 1  ;;  %v2762_v7 = vadd.f32 %v2761_v34, %v2760_v28 }
 0x218   : > { %v2661_v25 = vadd.f32 %v2660_v55, %v2659_v12  ;;  %v2763_v6 = vrot.slane %v2762_v7, 1 }
 0x21a   : > { %2663 = vst.msk [vmem:[%s212_s22] sm:$0x1] %vm2662_vm5, %v2661_v25  ;;  %v2764_v56 = vadd.f32 %v2763_v6, %v2762_v7 }
 0x21c   : > { %2765 = vst.msk [vmem:[%s215_s26] sm:$0x1] %vm2662_vm5, %v2764_v56 }
 0x21d PF: > { %s15_s15 = sadd.s32 1, %s3566_s15  }
 0x21e   : > { %p12_p5 = scmp.ge.s32.totalorder %s15_s15, 4  }
 0x220   :  { %14 = sbr.rel (!%p12_p5) target bundleno = 1 (0x1), region = 82 }

</bundles_post_ra>
